<compile_context>
chip_gen: v7x
topology: tpu7x:2x2x1
jax: 0.10.0
libtpu: 0.0.40
codegen_flags: <defaults>
</compile_context>

<pallas_src>
import jax
import jax.numpy as jnp
from jax import lax
from jax.experimental import pallas as pl
from jax.experimental.pallas import tpu as pltpu


_TAPS = ((0, 0), (0, 1), (1, 0), (1, 1))     # folded 2x2 tap order (r, c)
_DEFAULT_VMEM_CAPACITY = 64 * 1024 * 1024    # conservative fallback (v7x per-TC)


def _vmem_capacity_bytes():
    try:
        return int(pltpu.get_tpu_info().vmem_capacity_bytes)
    except Exception:
        return _DEFAULT_VMEM_CAPACITY


def _upsample_conv_kernel(x_ref, halo_ref, w_ref, b_ref, o_ref):
    """Fused nearest-2x upsample + Conv2d(3x3, s=1, p=1) on one row tile (NHWC).

    x_ref:    (1, TH, W+2, Cin)       padded rows [t*TH, t*TH+TH)
    halo_ref: (1, 2,  W+2, Cin)       padded rows [t*TH+TH, t*TH+TH+2)
    w_ref:    (2, 2, 2, 2, Cin, Cout) folded weights, indexed [a, b, r, c]
    b_ref:    (1, Cout)               bias (f32)
    o_ref:    (1, TH, 2, W, 2*Cout)   element [i, a, j, b*Cout + co] is output
                                      pixel (2i+a, 2j+b), channel co
    """
    TH = x_ref.shape[1]
    W = x_ref.shape[2] - 2
    Cin = x_ref.shape[3]
    Cout = o_ref.shape[4] // 2

    bias = b_ref[...]                         # (1, Cout) f32

    def patch(dr, dc):
        # Rows [dr, dr+TH), cols [dc, dc+W) of the (TH+2, W+2) padded window,
        # flattened to the (M=TH*W, K=Cin) operand the MXU wants.  Built
        # lazily: only the 4 patches of the current parity are ever live.
        main = x_ref[0, dr:TH, dc:dc + W, :]
        if dr == 0:
            rows = main
        else:
            rows = jnp.concatenate(
                [main, halo_ref[0, 0:dr, dc:dc + W, :]], axis=0)
        return rows.reshape(TH * W, Cin)

    for a in range(2):            # output row parity
        for b in range(2):        # output col parity
            acc = None
            for (r, c) in _TAPS:  # four accumulating K=Cin dots (no K-concat)
                d = jnp.dot(patch(a + r, b + c), w_ref[a, b, r, c],
                            preferred_element_type=jnp.float32)
                acc = d if acc is None else acc + d
            res = (acc + bias).astype(o_ref.dtype).reshape(TH, W, Cout)
            # Lane-dense store: trailing block dim is 2*Cout and the offset
            # b*Cout is 128-aligned at real decoder channel counts.
            o_ref[0, :, a, :, b * Cout:(b + 1) * Cout] = res


def _pick_row_tile(H, W, C, in_bpe, out_bpe, w_bytes, capacity, force_t_ge2):
    """Largest even divisor of H whose pipelined footprint fits ~55% of VMEM."""
    budget = int(capacity * 0.55)
    cands = [th for th in range(2, H + 1, 2) if H % th == 0]
    if not cands:
        return H
    if force_t_ge2:
        halved = [th for th in cands if th <= H // 2]
        if halved:
            cands = halved
    best = cands[0]
    for th in cands:
        in_blk = th * (W + 2) * C * in_bpe
        halo_blk = 2 * (W + 2) * C * in_bpe
        out_blk = th * 2 * W * 2 * C * out_bpe
        # acc (f32) + patch/concat temps + store temp + weight upcast temp
        temps = th * W * C * (4 + out_bpe + 2 * in_bpe) + C * C * 4
        need = 2 * (in_blk + halo_blk + out_blk) + temps + 2 * w_bytes
        if need <= budget and th > best:
            best = th
    return best


class Upsample:
    """Pallas/TPU port of the torch Upsample module.

    Default data_format is "NCHW" (the torch contract).  Pass
    data_format="NHWC" to skip the wrapper transposes entirely (recommended
    when the surrounding decoder is kept channels-last end-to-end).
    """

    def __init__(self, in_channels, with_conv, key=None,
                 compute_dtype=jnp.float32, weight_dtype=jnp.bfloat16,
                 out_dtype=None):
        self.in_channels = in_channels
        self.with_conv = with_conv
        self.compute_dtype = compute_dtype
        self.out_dtype = compute_dtype if out_dtype is None else out_dtype
        if with_conv:
            key = jax.random.PRNGKey(0) if key is None else key
            kw, kb = jax.random.split(key)
            fan_in = in_channels * 3 * 3
            bound = 1.0 / (fan_in ** 0.5)
            # torch Conv2d default init: U(-bound, bound); weight (Cout, Cin, 3, 3)
            self.weight = jax.random.uniform(
                kw, (in_channels, in_channels, 3, 3), jnp.float32, -bound, bound)
            self.bias = jax.random.uniform(
                kb, (in_channels,), jnp.float32, -bound, bound)
            # Fold the nearest-2x upsample into the conv weights.
            # M[a, r, ky]: which 3x3 row tap ky feeds folded tap r for output
            # row parity a (same matrix for columns).
            M = jnp.array([[[1., 0., 0.], [0., 1., 1.]],
                           [[1., 1., 0.], [0., 0., 1.]]], jnp.float32)
            weff = jnp.einsum('ary,bcx,oiyx->abrcio', M, M, self.weight)
            # (2, 2, 2, 2, Cin, Cout), indexed [row_parity, col_parity, r, c].
            self.w_fold = weff.astype(weight_dtype)
            self.bias2d = self.bias.reshape(1, in_channels).astype(jnp.float32)

    def _nearest(self, x, data_format):
        h_ax, w_ax = (2, 3) if data_format == "NCHW" else (1, 2)
        return jnp.repeat(jnp.repeat(x, 2, axis=h_ax), 2, axis=w_ax)

    def __call__(self, x, row_tile=None, data_format="NCHW"):
        assert data_format in ("NCHW", "NHWC")
        if not self.with_conv:
            # Nearest-2x only: pure data movement; plain XLA broadcast.
            return self._nearest(x, data_format)

        dt = self.compute_dtype
        if data_format == "NCHW":
            B, C, H, W = x.shape
            x_nhwc = jnp.transpose(x, (0, 2, 3, 1)).astype(dt)
        else:
            B, H, W, C = x.shape
            x_nhwc = x.astype(dt)
        assert C == self.in_channels
        assert H % 2 == 0, "H must be even"

        in_bpe = jnp.dtype(dt).itemsize
        out_bpe = jnp.dtype(self.out_dtype).itemsize
        capacity = _vmem_capacity_bytes()

        TH = row_tile if row_tile is not None else _pick_row_tile(
            H, W, C, in_bpe, out_bpe, int(self.w_fold.nbytes), capacity,
            force_t_ge2=(B == 1 and H >= 4))
        assert H % TH == 0 and TH % 2 == 0, \
            f"row_tile {TH} must be an even divisor of H={H}"
        T = H // TH

        # Single input-sized pre-pass (1-px zero border).  Each tile's 1-row
        # bottom halo is fetched by a second, 2-row BlockSpec on this same
        # padded array -- no overlapping-tile gather, no manual DMA.
        xpad = jnp.pad(x_nhwc, ((0, 0), (1, 1), (1, 1), (0, 0)))

        flops = 32 * B * H * W * C * C
        bytes_accessed = int(xpad.nbytes
                             + B * T * 2 * (W + 2) * C * in_bpe
                             + self.w_fold.nbytes + self.bias2d.nbytes
                             + B * H * 2 * W * 2 * C * out_bpe)

        def build(single_buffer_weights):
            wmode = ({"pipeline_mode": pl.Buffered(1)}
                     if single_buffer_weights else {})
            return pl.pallas_call(
                _upsample_conv_kernel,
                out_shape=jax.ShapeDtypeStruct((B, H, 2, W, 2 * C),
                                               self.out_dtype),
                grid=(B, T),
                in_specs=[
                    # main rows [t*TH, (t+1)*TH) of the padded input
                    pl.BlockSpec((1, TH, W + 2, C), lambda b, t: (b, t, 0, 0)),
                    # 2-row bottom halo [(t+1)*TH, (t+1)*TH + 2)
                    pl.BlockSpec((1, 2, W + 2, C),
                                 lambda b, t: (b, (t + 1) * (TH // 2), 0, 0)),
                    # folded weights: constant block, single-buffered
                    pl.BlockSpec((2, 2, 2, 2, C, C),
                                 lambda b, t: (0, 0, 0, 0, 0, 0), **wmode),
                    pl.BlockSpec((1, C), lambda b, t: (0, 0), **wmode),
                ],
                out_specs=pl.BlockSpec((1, TH, 2, W, 2 * C),
                                       lambda b, t: (b, t, 0, 0, 0)),
                compiler_params=pltpu.CompilerParams(
                    dimension_semantics=("parallel", "parallel"),
                    vmem_limit_bytes=int(capacity * 0.9)),
                cost_estimate=pl.CostEstimate(
                    flops=flops, transcendentals=0,
                    bytes_accessed=bytes_accessed),
            )

        try:
            out_pp = build(True)(xpad, xpad, self.w_fold, self.bias2d)
        except Exception:
            # pl.Buffered(1) rejected by this backend: fall back to the
            # default (double-buffered) weight pipeline.
            out_pp = build(False)(xpad, xpad, self.w_fold, self.bias2d)

        # Free row-major reshape: (B, H, 2, W, 2C) == (B, 2H, 2W, C).
        out_nhwc = out_pp.reshape(B, 2 * H, 2 * W, C)
        if data_format == "NHWC":
            return out_nhwc
        # NCHW output contract of the torch module.
        return jnp.transpose(out_nhwc, (0, 3, 1, 2))


if __name__ == "__main__":
    key = jax.random.PRNGKey(0)
    kx, kp = jax.random.split(key)
    B, C, H, W = 2, 4, 16, 16
    x = jax.random.normal(kx, (B, C, H, W), jnp.float32)

    def ref_upsample_conv(x, weight, bias):
        x_up = jnp.repeat(jnp.repeat(x, 2, axis=2), 2, axis=3)
        y = lax.conv_general_dilated(
            x_up, weight, window_strides=(1, 1), padding=((1, 1), (1, 1)),
            dimension_numbers=('NCHW', 'OIHW', 'NCHW'),
            precision=lax.Precision.HIGHEST)
        return y + bias[None, :, None, None]

    # --- with_conv=True, f32 compute + f32 weights, explicit row tiling -----
    mod = Upsample(C, with_conv=True, key=kp,
                   compute_dtype=jnp.float32, weight_dtype=jnp.float32)
    out = jax.block_until_ready(mod(x, row_tile=8))
    assert out.shape == (B, C, 2 * H, 2 * W)
    ref = ref_upsample_conv(x, mod.weight, mod.bias)
    err = float(jnp.max(jnp.abs(out - ref)))
    assert err < 5e-3, f"f32 max abs err {err}"

    # --- default config: f32 activations, bf16 folded weights ---------------
    mod_w16 = Upsample(C, with_conv=True, key=kp, compute_dtype=jnp.float32)
    out_w16 = jax.block_until_ready(mod_w16(x))
    err_w16 = float(jnp.max(jnp.abs(out_w16 - ref)))
    assert err_w16 < 5e-2, f"bf16-weight max abs err {err_w16}"

    # --- bf16 activations + weights (memory-bound fast path, all gens) ------
    mod_bf16 = Upsample(C, with_conv=True, key=kp, compute_dtype=jnp.bfloat16)
    out_bf16 = jax.block_until_ready(mod_bf16(x, row_tile=8))
    assert out_bf16.shape == (B, C, 2 * H, 2 * W)
    err_bf16 = float(jnp.max(jnp.abs(out_bf16.astype(jnp.float32) - ref)))
    assert err_bf16 < 1e-1, f"bf16 max abs err {err_bf16}"

    # --- NHWC fast path (no wrapper transposes) ------------------------------
    x_nhwc = jnp.transpose(x, (0, 2, 3, 1))
    out_nhwc = jax.block_until_ready(
        mod(x_nhwc, row_tile=8, data_format="NHWC"))
    assert out_nhwc.shape == (B, 2 * H, 2 * W, C)
    err_nhwc = float(jnp.max(jnp.abs(
        jnp.transpose(out_nhwc, (0, 3, 1, 2)) - ref)))
    assert err_nhwc < 5e-3, f"NHWC max abs err {err_nhwc}"

    # --- with_conv=False: nearest only (plain XLA per perf review) ----------
    mod2 = Upsample(C, with_conv=False)
    out2 = jax.block_until_ready(mod2(x))
    x_up = jnp.repeat(jnp.repeat(x, 2, axis=2), 2, axis=3)
    assert out2.shape == (B, C, 2 * H, 2 * W)
    assert jnp.allclose(out2, x_up)

    print("KERNEL_OK")
</pallas_src>

<mosaic_0001>
module attributes {stable_mosaic.version = 11 : i64} {
  func.func @_upsample_conv_kernel(%arg0: i32, %arg1: i32, %arg2: memref<1x8x18x4xf32, #tpu.memory_space<vmem>>, %arg3: memref<1x2x18x4xf32, #tpu.memory_space<vmem>>, %arg4: memref<2x2x2x2x4x4xf32, #tpu.memory_space<vmem>>, %arg5: memref<1x4xf32, #tpu.memory_space<vmem>>, %arg6: memref<1x8x2x16x8xf32, #tpu.memory_space<vmem>>) attributes {dimension_semantics = [#tpu.dimension_semantics<parallel>, #tpu.dimension_semantics<parallel>], iteration_bounds = array<i64: 2, 2>, scalar_prefetch = 0 : i64, scratch_operands = 0 : i64, tpu.core_type = #tpu.core_type<tc>, window_params = [{transform_indices = @transform_0, window_bounds = array<i64: 1, 8, 18, 4>}, {transform_indices = @transform_1, window_bounds = array<i64: 1, 2, 18, 4>}, {pipeline_mode = #tpu.pipeline_mode<synchronous>, transform_indices = @transform_2, window_bounds = array<i64: 2, 2, 2, 2, 4, 4>}, {pipeline_mode = #tpu.pipeline_mode<synchronous>, transform_indices = @transform_3, window_bounds = array<i64: 1, 4>}, {transform_indices = @transform_4, window_bounds = array<i64: 1, 8, 2, 16, 8>}]} {
    %c0 = arith.constant 0 : index
    %c0_0 = arith.constant 0 : index
    %0 = vector.load %arg5[%c0, %c0_0] : memref<1x4xf32, #tpu.memory_space<vmem>>, vector<1x4xf32>
    %c0_1 = arith.constant 0 : index
    %c0_2 = arith.constant 0 : index
    %c0_3 = arith.constant 0 : index
    %c0_4 = arith.constant 0 : index
    %1 = vector.load %arg2[%c0_1, %c0_2, %c0_3, %c0_4] : memref<1x8x18x4xf32, #tpu.memory_space<vmem>>, vector<1x8x16x4xf32>
    %2 = vector.shape_cast %1 : vector<1x8x16x4xf32> to vector<8x16x4xf32>
    %3 = vector.shape_cast %2 : vector<8x16x4xf32> to vector<128x4xf32>
    %c0_5 = arith.constant 0 : index
    %c0_6 = arith.constant 0 : index
    %c0_7 = arith.constant 0 : index
    %c0_8 = arith.constant 0 : index
    %c0_9 = arith.constant 0 : index
    %c0_10 = arith.constant 0 : index
    %4 = vector.load %arg4[%c0_5, %c0_6, %c0_7, %c0_8, %c0_9, %c0_10] : memref<2x2x2x2x4x4xf32, #tpu.memory_space<vmem>>, vector<1x1x1x1x4x4xf32>
    %5 = vector.shape_cast %4 : vector<1x1x1x1x4x4xf32> to vector<4x4xf32>
    %cst = arith.constant dense<0.000000e+00> : vector<128x4xf32>
    %6 = tpu.matmul %3, %5, %cst {dimension_numbers = #tpu.dot_dimension_numbers<[1], [0], [0], [1], [0, 0, 1, 1], [], []>} : vector<128x4xf32>, vector<4x4xf32>, vector<128x4xf32> -> vector<128x4xf32>
    %c0_11 = arith.constant 0 : index
    %c0_12 = arith.constant 0 : index
    %c1 = arith.constant 1 : index
    %c0_13 = arith.constant 0 : index
    %7 = vector.load %arg2[%c0_11, %c0_12, %c1, %c0_13] : memref<1x8x18x4xf32, #tpu.memory_space<vmem>>, vector<1x8x16x4xf32>
    %8 = vector.shape_cast %7 : vector<1x8x16x4xf32> to vector<8x16x4xf32>
    %9 = vector.shape_cast %8 : vector<8x16x4xf32> to vector<128x4xf32>
    %c0_14 = arith.constant 0 : index
    %c0_15 = arith.constant 0 : index
    %c0_16 = arith.constant 0 : index
    %c1_17 = arith.constant 1 : index
    %c0_18 = arith.constant 0 : index
    %c0_19 = arith.constant 0 : index
    %10 = vector.load %arg4[%c0_14, %c0_15, %c0_16, %c1_17, %c0_18, %c0_19] : memref<2x2x2x2x4x4xf32, #tpu.memory_space<vmem>>, vector<1x1x1x1x4x4xf32>
    %11 = vector.shape_cast %10 : vector<1x1x1x1x4x4xf32> to vector<4x4xf32>
    %cst_20 = arith.constant dense<0.000000e+00> : vector<128x4xf32>
    %12 = tpu.matmul %9, %11, %cst_20 {dimension_numbers = #tpu.dot_dimension_numbers<[1], [0], [0], [1], [0, 0, 1, 1], [], []>} : vector<128x4xf32>, vector<4x4xf32>, vector<128x4xf32> -> vector<128x4xf32>
    %13 = arith.addf %6, %12 : vector<128x4xf32>
    %c0_21 = arith.constant 0 : index
    %c1_22 = arith.constant 1 : index
    %c0_23 = arith.constant 0 : index
    %c0_24 = arith.constant 0 : index
    %14 = vector.load %arg2[%c0_21, %c1_22, %c0_23, %c0_24] : memref<1x8x18x4xf32, #tpu.memory_space<vmem>>, vector<1x7x16x4xf32>
    %15 = vector.shape_cast %14 : vector<1x7x16x4xf32> to vector<7x16x4xf32>
    %c0_25 = arith.constant 0 : index
    %c0_26 = arith.constant 0 : index
    %c0_27 = arith.constant 0 : index
    %c0_28 = arith.constant 0 : index
    %16 = vector.load %arg3[%c0_25, %c0_26, %c0_27, %c0_28] : memref<1x2x18x4xf32, #tpu.memory_space<vmem>>, vector<1x1x16x4xf32>
    %17 = vector.shape_cast %16 : vector<1x1x16x4xf32> to vector<1x16x4xf32>
    %18 = tpu.concatenate %15, %17 in 0 : vector<7x16x4xf32>, vector<1x16x4xf32> -> vector<8x16x4xf32>
    %19 = vector.shape_cast %18 : vector<8x16x4xf32> to vector<128x4xf32>
    %c0_29 = arith.constant 0 : index
    %c0_30 = arith.constant 0 : index
    %c1_31 = arith.constant 1 : index
    %c0_32 = arith.constant 0 : index
    %c0_33 = arith.constant 0 : index
    %c0_34 = arith.constant 0 : index
    %20 = vector.load %arg4[%c0_29, %c0_30, %c1_31, %c0_32, %c0_33, %c0_34] : memref<2x2x2x2x4x4xf32, #tpu.memory_space<vmem>>, vector<1x1x1x1x4x4xf32>
    %21 = vector.shape_cast %20 : vector<1x1x1x1x4x4xf32> to vector<4x4xf32>
    %cst_35 = arith.constant dense<0.000000e+00> : vector<128x4xf32>
    %22 = tpu.matmul %19, %21, %cst_35 {dimension_numbers = #tpu.dot_dimension_numbers<[1], [0], [0], [1], [0, 0, 1, 1], [], []>} : vector<128x4xf32>, vector<4x4xf32>, vector<128x4xf32> -> vector<128x4xf32>
    %23 = arith.addf %13, %22 : vector<128x4xf32>
    %c0_36 = arith.constant 0 : index
    %c1_37 = arith.constant 1 : index
    %c1_38 = arith.constant 1 : index
    %c0_39 = arith.constant 0 : index
    %24 = vector.load %arg2[%c0_36, %c1_37, %c1_38, %c0_39] : memref<1x8x18x4xf32, #tpu.memory_space<vmem>>, vector<1x7x16x4xf32>
    %25 = vector.shape_cast %24 : vector<1x7x16x4xf32> to vector<7x16x4xf32>
    %c0_40 = arith.constant 0 : index
    %c0_41 = arith.constant 0 : index
    %c1_42 = arith.constant 1 : index
    %c0_43 = arith.constant 0 : index
    %26 = vector.load %arg3[%c0_40, %c0_41, %c1_42, %c0_43] : memref<1x2x18x4xf32, #tpu.memory_space<vmem>>, vector<1x1x16x4xf32>
    %27 = vector.shape_cast %26 : vector<1x1x16x4xf32> to vector<1x16x4xf32>
    %28 = tpu.concatenate %25, %27 in 0 : vector<7x16x4xf32>, vector<1x16x4xf32> -> vector<8x16x4xf32>
    %29 = vector.shape_cast %28 : vector<8x16x4xf32> to vector<128x4xf32>
    %c0_44 = arith.constant 0 : index
    %c0_45 = arith.constant 0 : index
    %c1_46 = arith.constant 1 : index
    %c1_47 = arith.constant 1 : index
    %c0_48 = arith.constant 0 : index
    %c0_49 = arith.constant 0 : index
    %30 = vector.load %arg4[%c0_44, %c0_45, %c1_46, %c1_47, %c0_48, %c0_49] : memref<2x2x2x2x4x4xf32, #tpu.memory_space<vmem>>, vector<1x1x1x1x4x4xf32>
    %31 = vector.shape_cast %30 : vector<1x1x1x1x4x4xf32> to vector<4x4xf32>
    %cst_50 = arith.constant dense<0.000000e+00> : vector<128x4xf32>
    %32 = tpu.matmul %29, %31, %cst_50 {dimension_numbers = #tpu.dot_dimension_numbers<[1], [0], [0], [1], [0, 0, 1, 1], [], []>} : vector<128x4xf32>, vector<4x4xf32>, vector<128x4xf32> -> vector<128x4xf32>
    %33 = arith.addf %23, %32 : vector<128x4xf32>
    %34 = vector.broadcast %0 : vector<1x4xf32> to vector<128x4xf32>
    %35 = arith.addf %33, %34 : vector<128x4xf32>
    %36 = vector.shape_cast %35 : vector<128x4xf32> to vector<8x16x4xf32>
    %c0_51 = arith.constant 0 : index
    %c0_52 = arith.constant 0 : index
    %c0_53 = arith.constant 0 : index
    %c0_54 = arith.constant 0 : index
    %c0_55 = arith.constant 0 : index
    %37 = vector.load %arg6[%c0_51, %c0_52, %c0_53, %c0_54, %c0_55] : memref<1x8x2x16x8xf32, #tpu.memory_space<vmem>>, vector<1x8x1x16x4xf32>
    %38 = vector.shape_cast %37 : vector<1x8x1x16x4xf32> to vector<8x16x4xf32>
    %39 = vector.shape_cast %36 : vector<8x16x4xf32> to vector<1x8x1x16x4xf32>
    tpu.vector_store %arg6[%c0_51, %c0_52, %c0_53, %c0_54, %c0_55], %39 {strides = array<i32>} : memref<1x8x2x16x8xf32, #tpu.memory_space<vmem>>, vector<1x8x1x16x4xf32>,
    %c0_56 = arith.constant 0 : index
    %c0_57 = arith.constant 0 : index
    %c1_58 = arith.constant 1 : index
    %c0_59 = arith.constant 0 : index
    %40 = vector.load %arg2[%c0_56, %c0_57, %c1_58, %c0_59] : memref<1x8x18x4xf32, #tpu.memory_space<vmem>>, vector<1x8x16x4xf32>
    %41 = vector.shape_cast %40 : vector<1x8x16x4xf32> to vector<8x16x4xf32>
    %42 = vector.shape_cast %41 : vector<8x16x4xf32> to vector<128x4xf32>
    %c0_60 = arith.constant 0 : index
    %c1_61 = arith.constant 1 : index
    %c0_62 = arith.constant 0 : index
    %c0_63 = arith.constant 0 : index
    %c0_64 = arith.constant 0 : index
    %c0_65 = arith.constant 0 : index
    %43 = vector.load %arg4[%c0_60, %c1_61, %c0_62, %c0_63, %c0_64, %c0_65] : memref<2x2x2x2x4x4xf32, #tpu.memory_space<vmem>>, vector<1x1x1x1x4x4xf32>
    %44 = vector.shape_cast %43 : vector<1x1x1x1x4x4xf32> to vector<4x4xf32>
    %cst_66 = arith.constant dense<0.000000e+00> : vector<128x4xf32>
    %45 = tpu.matmul %42, %44, %cst_66 {dimension_numbers = #tpu.dot_dimension_numbers<[1], [0], [0], [1], [0, 0, 1, 1], [], []>} : vector<128x4xf32>, vector<4x4xf32>, vector<128x4xf32> -> vector<128x4xf32>
    %c0_67 = arith.constant 0 : index
    %c0_68 = arith.constant 0 : index
    %c2 = arith.constant 2 : index
    %c0_69 = arith.constant 0 : index
    %46 = vector.load %arg2[%c0_67, %c0_68, %c2, %c0_69] : memref<1x8x18x4xf32, #tpu.memory_space<vmem>>, vector<1x8x16x4xf32>
    %47 = vector.shape_cast %46 : vector<1x8x16x4xf32> to vector<8x16x4xf32>
    %48 = vector.shape_cast %47 : vector<8x16x4xf32> to vector<128x4xf32>
    %c0_70 = arith.constant 0 : index
    %c1_71 = arith.constant 1 : index
    %c0_72 = arith.constant 0 : index
    %c1_73 = arith.constant 1 : index
    %c0_74 = arith.constant 0 : index
    %c0_75 = arith.constant 0 : index
    %49 = vector.load %arg4[%c0_70, %c1_71, %c0_72, %c1_73, %c0_74, %c0_75] : memref<2x2x2x2x4x4xf32, #tpu.memory_space<vmem>>, vector<1x1x1x1x4x4xf32>
    %50 = vector.shape_cast %49 : vector<1x1x1x1x4x4xf32> to vector<4x4xf32>
    %cst_76 = arith.constant dense<0.000000e+00> : vector<128x4xf32>
    %51 = tpu.matmul %48, %50, %cst_76 {dimension_numbers = #tpu.dot_dimension_numbers<[1], [0], [0], [1], [0, 0, 1, 1], [], []>} : vector<128x4xf32>, vector<4x4xf32>, vector<128x4xf32> -> vector<128x4xf32>
    %52 = arith.addf %45, %51 : vector<128x4xf32>
    %c0_77 = arith.constant 0 : index
    %c1_78 = arith.constant 1 : index
    %c1_79 = arith.constant 1 : index
    %c0_80 = arith.constant 0 : index
    %53 = vector.load %arg2[%c0_77, %c1_78, %c1_79, %c0_80] : memref<1x8x18x4xf32, #tpu.memory_space<vmem>>, vector<1x7x16x4xf32>
    %54 = vector.shape_cast %53 : vector<1x7x16x4xf32> to vector<7x16x4xf32>
    %c0_81 = arith.constant 0 : index
    %c0_82 = arith.constant 0 : index
    %c1_83 = arith.constant 1 : index
    %c0_84 = arith.constant 0 : index
    %55 = vector.load %arg3[%c0_81, %c0_82, %c1_83, %c0_84] : memref<1x2x18x4xf32, #tpu.memory_space<vmem>>, vector<1x1x16x4xf32>
    %56 = vector.shape_cast %55 : vector<1x1x16x4xf32> to vector<1x16x4xf32>
    %57 = tpu.concatenate %54, %56 in 0 : vector<7x16x4xf32>, vector<1x16x4xf32> -> vector<8x16x4xf32>
    %58 = vector.shape_cast %57 : vector<8x16x4xf32> to vector<128x4xf32>
    %c0_85 = arith.constant 0 : index
    %c1_86 = arith.constant 1 : index
    %c1_87 = arith.constant 1 : index
    %c0_88 = arith.constant 0 : index
    %c0_89 = arith.constant 0 : index
    %c0_90 = arith.constant 0 : index
    %59 = vector.load %arg4[%c0_85, %c1_86, %c1_87, %c0_88, %c0_89, %c0_90] : memref<2x2x2x2x4x4xf32, #tpu.memory_space<vmem>>, vector<1x1x1x1x4x4xf32>
    %60 = vector.shape_cast %59 : vector<1x1x1x1x4x4xf32> to vector<4x4xf32>
    %cst_91 = arith.constant dense<0.000000e+00> : vector<128x4xf32>
    %61 = tpu.matmul %58, %60, %cst_91 {dimension_numbers = #tpu.dot_dimension_numbers<[1], [0], [0], [1], [0, 0, 1, 1], [], []>} : vector<128x4xf32>, vector<4x4xf32>, vector<128x4xf32> -> vector<128x4xf32>
    %62 = arith.addf %52, %61 : vector<128x4xf32>
    %c0_92 = arith.constant 0 : index
    %c1_93 = arith.constant 1 : index
    %c2_94 = arith.constant 2 : index
    %c0_95 = arith.constant 0 : index
    %63 = vector.load %arg2[%c0_92, %c1_93, %c2_94, %c0_95] : memref<1x8x18x4xf32, #tpu.memory_space<vmem>>, vector<1x7x16x4xf32>
    %64 = vector.shape_cast %63 : vector<1x7x16x4xf32> to vector<7x16x4xf32>
    %c0_96 = arith.constant 0 : index
    %c0_97 = arith.constant 0 : index
    %c2_98 = arith.constant 2 : index
    %c0_99 = arith.constant 0 : index
    %65 = vector.load %arg3[%c0_96, %c0_97, %c2_98, %c0_99] : memref<1x2x18x4xf32, #tpu.memory_space<vmem>>, vector<1x1x16x4xf32>
    %66 = vector.shape_cast %65 : vector<1x1x16x4xf32> to vector<1x16x4xf32>
    %67 = tpu.concatenate %64, %66 in 0 : vector<7x16x4xf32>, vector<1x16x4xf32> -> vector<8x16x4xf32>
    %68 = vector.shape_cast %67 : vector<8x16x4xf32> to vector<128x4xf32>
    %c0_100 = arith.constant 0 : index
    %c1_101 = arith.constant 1 : index
    %c1_102 = arith.constant 1 : index
    %c1_103 = arith.constant 1 : index
    %c0_104 = arith.constant 0 : index
    %c0_105 = arith.constant 0 : index
    %69 = vector.load %arg4[%c0_100, %c1_101, %c1_102, %c1_103, %c0_104, %c0_105] : memref<2x2x2x2x4x4xf32, #tpu.memory_space<vmem>>, vector<1x1x1x1x4x4xf32>
    %70 = vector.shape_cast %69 : vector<1x1x1x1x4x4xf32> to vector<4x4xf32>
    %cst_106 = arith.constant dense<0.000000e+00> : vector<128x4xf32>
    %71 = tpu.matmul %68, %70, %cst_106 {dimension_numbers = #tpu.dot_dimension_numbers<[1], [0], [0], [1], [0, 0, 1, 1], [], []>} : vector<128x4xf32>, vector<4x4xf32>, vector<128x4xf32> -> vector<128x4xf32>
    %72 = arith.addf %62, %71 : vector<128x4xf32>
    %73 = vector.broadcast %0 : vector<1x4xf32> to vector<128x4xf32>
    %74 = arith.addf %72, %73 : vector<128x4xf32>
    %75 = vector.shape_cast %74 : vector<128x4xf32> to vector<8x16x4xf32>
    %c0_107 = arith.constant 0 : index
    %c0_108 = arith.constant 0 : index
    %c0_109 = arith.constant 0 : index
    %c0_110 = arith.constant 0 : index
    %c4 = arith.constant 4 : index
    %76 = vector.load %arg6[%c0_107, %c0_108, %c0_109, %c0_110, %c4] : memref<1x8x2x16x8xf32, #tpu.memory_space<vmem>>, vector<1x8x1x16x4xf32>
    %77 = vector.shape_cast %76 : vector<1x8x1x16x4xf32> to vector<8x16x4xf32>
    %78 = vector.shape_cast %75 : vector<8x16x4xf32> to vector<1x8x1x16x4xf32>
    tpu.vector_store %arg6[%c0_107, %c0_108, %c0_109, %c0_110, %c4], %78 {strides = array<i32>} : memref<1x8x2x16x8xf32, #tpu.memory_space<vmem>>, vector<1x8x1x16x4xf32>,
    %c0_111 = arith.constant 0 : index
    %c1_112 = arith.constant 1 : index
    %c0_113 = arith.constant 0 : index
    %c0_114 = arith.constant 0 : index
    %79 = vector.load %arg2[%c0_111, %c1_112, %c0_113, %c0_114] : memref<1x8x18x4xf32, #tpu.memory_space<vmem>>, vector<1x7x16x4xf32>
    %80 = vector.shape_cast %79 : vector<1x7x16x4xf32> to vector<7x16x4xf32>
    %c0_115 = arith.constant 0 : index
    %c0_116 = arith.constant 0 : index
    %c0_117 = arith.constant 0 : index
    %c0_118 = arith.constant 0 : index
    %81 = vector.load %arg3[%c0_115, %c0_116, %c0_117, %c0_118] : memref<1x2x18x4xf32, #tpu.memory_space<vmem>>, vector<1x1x16x4xf32>
    %82 = vector.shape_cast %81 : vector<1x1x16x4xf32> to vector<1x16x4xf32>
    %83 = tpu.concatenate %80, %82 in 0 : vector<7x16x4xf32>, vector<1x16x4xf32> -> vector<8x16x4xf32>
    %84 = vector.shape_cast %83 : vector<8x16x4xf32> to vector<128x4xf32>
    %c1_119 = arith.constant 1 : index
    %c0_120 = arith.constant 0 : index
    %c0_121 = arith.constant 0 : index
    %c0_122 = arith.constant 0 : index
    %c0_123 = arith.constant 0 : index
    %c0_124 = arith.constant 0 : index
    %85 = vector.load %arg4[%c1_119, %c0_120, %c0_121, %c0_122, %c0_123, %c0_124] : memref<2x2x2x2x4x4xf32, #tpu.memory_space<vmem>>, vector<1x1x1x1x4x4xf32>
    %86 = vector.shape_cast %85 : vector<1x1x1x1x4x4xf32> to vector<4x4xf32>
    %cst_125 = arith.constant dense<0.000000e+00> : vector<128x4xf32>
    %87 = tpu.matmul %84, %86, %cst_125 {dimension_numbers = #tpu.dot_dimension_numbers<[1], [0], [0], [1], [0, 0, 1, 1], [], []>} : vector<128x4xf32>, vector<4x4xf32>, vector<128x4xf32> -> vector<128x4xf32>
    %c0_126 = arith.constant 0 : index
    %c1_127 = arith.constant 1 : index
    %c1_128 = arith.constant 1 : index
    %c0_129 = arith.constant 0 : index
    %88 = vector.load %arg2[%c0_126, %c1_127, %c1_128, %c0_129] : memref<1x8x18x4xf32, #tpu.memory_space<vmem>>, vector<1x7x16x4xf32>
    %89 = vector.shape_cast %88 : vector<1x7x16x4xf32> to vector<7x16x4xf32>
    %c0_130 = arith.constant 0 : index
    %c0_131 = arith.constant 0 : index
    %c1_132 = arith.constant 1 : index
    %c0_133 = arith.constant 0 : index
    %90 = vector.load %arg3[%c0_130, %c0_131, %c1_132, %c0_133] : memref<1x2x18x4xf32, #tpu.memory_space<vmem>>, vector<1x1x16x4xf32>
    %91 = vector.shape_cast %90 : vector<1x1x16x4xf32> to vector<1x16x4xf32>
    %92 = tpu.concatenate %89, %91 in 0 : vector<7x16x4xf32>, vector<1x16x4xf32> -> vector<8x16x4xf32>
    %93 = vector.shape_cast %92 : vector<8x16x4xf32> to vector<128x4xf32>
    %c1_134 = arith.constant 1 : index
    %c0_135 = arith.constant 0 : index
    %c0_136 = arith.constant 0 : index
    %c1_137 = arith.constant 1 : index
    %c0_138 = arith.constant 0 : index
    %c0_139 = arith.constant 0 : index
    %94 = vector.load %arg4[%c1_134, %c0_135, %c0_136, %c1_137, %c0_138, %c0_139] : memref<2x2x2x2x4x4xf32, #tpu.memory_space<vmem>>, vector<1x1x1x1x4x4xf32>
    %95 = vector.shape_cast %94 : vector<1x1x1x1x4x4xf32> to vector<4x4xf32>
    %cst_140 = arith.constant dense<0.000000e+00> : vector<128x4xf32>
    %96 = tpu.matmul %93, %95, %cst_140 {dimension_numbers = #tpu.dot_dimension_numbers<[1], [0], [0], [1], [0, 0, 1, 1], [], []>} : vector<128x4xf32>, vector<4x4xf32>, vector<128x4xf32> -> vector<128x4xf32>
    %97 = arith.addf %87, %96 : vector<128x4xf32>
    %c0_141 = arith.constant 0 : index
    %c2_142 = arith.constant 2 : index
    %c0_143 = arith.constant 0 : index
    %c0_144 = arith.constant 0 : index
    %98 = vector.load %arg2[%c0_141, %c2_142, %c0_143, %c0_144] : memref<1x8x18x4xf32, #tpu.memory_space<vmem>>, vector<1x6x16x4xf32>
    %99 = vector.shape_cast %98 : vector<1x6x16x4xf32> to vector<6x16x4xf32>
    %c0_145 = arith.constant 0 : index
    %c0_146 = arith.constant 0 : index
    %c0_147 = arith.constant 0 : index
    %c0_148 = arith.constant 0 : index
    %100 = vector.load %arg3[%c0_145, %c0_146, %c0_147, %c0_148] : memref<1x2x18x4xf32, #tpu.memory_space<vmem>>, vector<1x2x16x4xf32>
    %101 = vector.shape_cast %100 : vector<1x2x16x4xf32> to vector<2x16x4xf32>
    %102 = tpu.concatenate %99, %101 in 0 : vector<6x16x4xf32>, vector<2x16x4xf32> -> vector<8x16x4xf32>
    %103 = vector.shape_cast %102 : vector<8x16x4xf32> to vector<128x4xf32>
    %c1_149 = arith.constant 1 : index
    %c0_150 = arith.constant 0 : index
    %c1_151 = arith.constant 1 : index
    %c0_152 = arith.constant 0 : index
    %c0_153 = arith.constant 0 : index
    %c0_154 = arith.constant 0 : index
    %104 = vector.load %arg4[%c1_149, %c0_150, %c1_151, %c0_152, %c0_153, %c0_154] : memref<2x2x2x2x4x4xf32, #tpu.memory_space<vmem>>, vector<1x1x1x1x4x4xf32>
    %105 = vector.shape_cast %104 : vector<1x1x1x1x4x4xf32> to vector<4x4xf32>
    %cst_155 = arith.constant dense<0.000000e+00> : vector<128x4xf32>
    %106 = tpu.matmul %103, %105, %cst_155 {dimension_numbers = #tpu.dot_dimension_numbers<[1], [0], [0], [1], [0, 0, 1, 1], [], []>} : vector<128x4xf32>, vector<4x4xf32>, vector<128x4xf32> -> vector<128x4xf32>
    %107 = arith.addf %97, %106 : vector<128x4xf32>
    %c0_156 = arith.constant 0 : index
    %c2_157 = arith.constant 2 : index
    %c1_158 = arith.constant 1 : index
    %c0_159 = arith.constant 0 : index
    %108 = vector.load %arg2[%c0_156, %c2_157, %c1_158, %c0_159] : memref<1x8x18x4xf32, #tpu.memory_space<vmem>>, vector<1x6x16x4xf32>
    %109 = vector.shape_cast %108 : vector<1x6x16x4xf32> to vector<6x16x4xf32>
    %c0_160 = arith.constant 0 : index
    %c0_161 = arith.constant 0 : index
    %c1_162 = arith.constant 1 : index
    %c0_163 = arith.constant 0 : index
    %110 = vector.load %arg3[%c0_160, %c0_161, %c1_162, %c0_163] : memref<1x2x18x4xf32, #tpu.memory_space<vmem>>, vector<1x2x16x4xf32>
    %111 = vector.shape_cast %110 : vector<1x2x16x4xf32> to vector<2x16x4xf32>
    %112 = tpu.concatenate %109, %111 in 0 : vector<6x16x4xf32>, vector<2x16x4xf32> -> vector<8x16x4xf32>
    %113 = vector.shape_cast %112 : vector<8x16x4xf32> to vector<128x4xf32>
    %c1_164 = arith.constant 1 : index
    %c0_165 = arith.constant 0 : index
    %c1_166 = arith.constant 1 : index
    %c1_167 = arith.constant 1 : index
    %c0_168 = arith.constant 0 : index
    %c0_169 = arith.constant 0 : index
    %114 = vector.load %arg4[%c1_164, %c0_165, %c1_166, %c1_167, %c0_168, %c0_169] : memref<2x2x2x2x4x4xf32, #tpu.memory_space<vmem>>, vector<1x1x1x1x4x4xf32>
    %115 = vector.shape_cast %114 : vector<1x1x1x1x4x4xf32> to vector<4x4xf32>
    %cst_170 = arith.constant dense<0.000000e+00> : vector<128x4xf32>
    %116 = tpu.matmul %113, %115, %cst_170 {dimension_numbers = #tpu.dot_dimension_numbers<[1], [0], [0], [1], [0, 0, 1, 1], [], []>} : vector<128x4xf32>, vector<4x4xf32>, vector<128x4xf32> -> vector<128x4xf32>
    %117 = arith.addf %107, %116 : vector<128x4xf32>
    %118 = vector.broadcast %0 : vector<1x4xf32> to vector<128x4xf32>
    %119 = arith.addf %117, %118 : vector<128x4xf32>
    %120 = vector.shape_cast %119 : vector<128x4xf32> to vector<8x16x4xf32>
    %c0_171 = arith.constant 0 : index
    %c0_172 = arith.constant 0 : index
    %c1_173 = arith.constant 1 : index
    %c0_174 = arith.constant 0 : index
    %c0_175 = arith.constant 0 : index
    %121 = vector.load %arg6[%c0_171, %c0_172, %c1_173, %c0_174, %c0_175] : memref<1x8x2x16x8xf32, #tpu.memory_space<vmem>>, vector<1x8x1x16x4xf32>
    %122 = vector.shape_cast %121 : vector<1x8x1x16x4xf32> to vector<8x16x4xf32>
    %123 = vector.shape_cast %120 : vector<8x16x4xf32> to vector<1x8x1x16x4xf32>
    tpu.vector_store %arg6[%c0_171, %c0_172, %c1_173, %c0_174, %c0_175], %123 {strides = array<i32>} : memref<1x8x2x16x8xf32, #tpu.memory_space<vmem>>, vector<1x8x1x16x4xf32>,
    %c0_176 = arith.constant 0 : index
    %c1_177 = arith.constant 1 : index
    %c1_178 = arith.constant 1 : index
    %c0_179 = arith.constant 0 : index
    %124 = vector.load %arg2[%c0_176, %c1_177, %c1_178, %c0_179] : memref<1x8x18x4xf32, #tpu.memory_space<vmem>>, vector<1x7x16x4xf32>
    %125 = vector.shape_cast %124 : vector<1x7x16x4xf32> to vector<7x16x4xf32>
    %c0_180 = arith.constant 0 : index
    %c0_181 = arith.constant 0 : index
    %c1_182 = arith.constant 1 : index
    %c0_183 = arith.constant 0 : index
    %126 = vector.load %arg3[%c0_180, %c0_181, %c1_182, %c0_183] : memref<1x2x18x4xf32, #tpu.memory_space<vmem>>, vector<1x1x16x4xf32>
    %127 = vector.shape_cast %126 : vector<1x1x16x4xf32> to vector<1x16x4xf32>
    %128 = tpu.concatenate %125, %127 in 0 : vector<7x16x4xf32>, vector<1x16x4xf32> -> vector<8x16x4xf32>
    %129 = vector.shape_cast %128 : vector<8x16x4xf32> to vector<128x4xf32>
    %c1_184 = arith.constant 1 : index
    %c1_185 = arith.constant 1 : index
    %c0_186 = arith.constant 0 : index
    %c0_187 = arith.constant 0 : index
    %c0_188 = arith.constant 0 : index
    %c0_189 = arith.constant 0 : index
    %130 = vector.load %arg4[%c1_184, %c1_185, %c0_186, %c0_187, %c0_188, %c0_189] : memref<2x2x2x2x4x4xf32, #tpu.memory_space<vmem>>, vector<1x1x1x1x4x4xf32>
    %131 = vector.shape_cast %130 : vector<1x1x1x1x4x4xf32> to vector<4x4xf32>
    %cst_190 = arith.constant dense<0.000000e+00> : vector<128x4xf32>
    %132 = tpu.matmul %129, %131, %cst_190 {dimension_numbers = #tpu.dot_dimension_numbers<[1], [0], [0], [1], [0, 0, 1, 1], [], []>} : vector<128x4xf32>, vector<4x4xf32>, vector<128x4xf32> -> vector<128x4xf32>
    %c0_191 = arith.constant 0 : index
    %c1_192 = arith.constant 1 : index
    %c2_193 = arith.constant 2 : index
    %c0_194 = arith.constant 0 : index
    %133 = vector.load %arg2[%c0_191, %c1_192, %c2_193, %c0_194] : memref<1x8x18x4xf32, #tpu.memory_space<vmem>>, vector<1x7x16x4xf32>
    %134 = vector.shape_cast %133 : vector<1x7x16x4xf32> to vector<7x16x4xf32>
    %c0_195 = arith.constant 0 : index
    %c0_196 = arith.constant 0 : index
    %c2_197 = arith.constant 2 : index
    %c0_198 = arith.constant 0 : index
    %135 = vector.load %arg3[%c0_195, %c0_196, %c2_197, %c0_198] : memref<1x2x18x4xf32, #tpu.memory_space<vmem>>, vector<1x1x16x4xf32>
    %136 = vector.shape_cast %135 : vector<1x1x16x4xf32> to vector<1x16x4xf32>
    %137 = tpu.concatenate %134, %136 in 0 : vector<7x16x4xf32>, vector<1x16x4xf32> -> vector<8x16x4xf32>
    %138 = vector.shape_cast %137 : vector<8x16x4xf32> to vector<128x4xf32>
    %c1_199 = arith.constant 1 : index
    %c1_200 = arith.constant 1 : index
    %c0_201 = arith.constant 0 : index
    %c1_202 = arith.constant 1 : index
    %c0_203 = arith.constant 0 : index
    %c0_204 = arith.constant 0 : index
    %139 = vector.load %arg4[%c1_199, %c1_200, %c0_201, %c1_202, %c0_203, %c0_204] : memref<2x2x2x2x4x4xf32, #tpu.memory_space<vmem>>, vector<1x1x1x1x4x4xf32>
    %140 = vector.shape_cast %139 : vector<1x1x1x1x4x4xf32> to vector<4x4xf32>
    %cst_205 = arith.constant dense<0.000000e+00> : vector<128x4xf32>
    %141 = tpu.matmul %138, %140, %cst_205 {dimension_numbers = #tpu.dot_dimension_numbers<[1], [0], [0], [1], [0, 0, 1, 1], [], []>} : vector<128x4xf32>, vector<4x4xf32>, vector<128x4xf32> -> vector<128x4xf32>
    %142 = arith.addf %132, %141 : vector<128x4xf32>
    %c0_206 = arith.constant 0 : index
    %c2_207 = arith.constant 2 : index
    %c1_208 = arith.constant 1 : index
    %c0_209 = arith.constant 0 : index
    %143 = vector.load %arg2[%c0_206, %c2_207, %c1_208, %c0_209] : memref<1x8x18x4xf32, #tpu.memory_space<vmem>>, vector<1x6x16x4xf32>
    %144 = vector.shape_cast %143 : vector<1x6x16x4xf32> to vector<6x16x4xf32>
    %c0_210 = arith.constant 0 : index
    %c0_211 = arith.constant 0 : index
    %c1_212 = arith.constant 1 : index
    %c0_213 = arith.constant 0 : index
    %145 = vector.load %arg3[%c0_210, %c0_211, %c1_212, %c0_213] : memref<1x2x18x4xf32, #tpu.memory_space<vmem>>, vector<1x2x16x4xf32>
    %146 = vector.shape_cast %145 : vector<1x2x16x4xf32> to vector<2x16x4xf32>
    %147 = tpu.concatenate %144, %146 in 0 : vector<6x16x4xf32>, vector<2x16x4xf32> -> vector<8x16x4xf32>
    %148 = vector.shape_cast %147 : vector<8x16x4xf32> to vector<128x4xf32>
    %c1_214 = arith.constant 1 : index
    %c1_215 = arith.constant 1 : index
    %c1_216 = arith.constant 1 : index
    %c0_217 = arith.constant 0 : index
    %c0_218 = arith.constant 0 : index
    %c0_219 = arith.constant 0 : index
    %149 = vector.load %arg4[%c1_214, %c1_215, %c1_216, %c0_217, %c0_218, %c0_219] : memref<2x2x2x2x4x4xf32, #tpu.memory_space<vmem>>, vector<1x1x1x1x4x4xf32>
    %150 = vector.shape_cast %149 : vector<1x1x1x1x4x4xf32> to vector<4x4xf32>
    %cst_220 = arith.constant dense<0.000000e+00> : vector<128x4xf32>
    %151 = tpu.matmul %148, %150, %cst_220 {dimension_numbers = #tpu.dot_dimension_numbers<[1], [0], [0], [1], [0, 0, 1, 1], [], []>} : vector<128x4xf32>, vector<4x4xf32>, vector<128x4xf32> -> vector<128x4xf32>
    %152 = arith.addf %142, %151 : vector<128x4xf32>
    %c0_221 = arith.constant 0 : index
    %c2_222 = arith.constant 2 : index
    %c2_223 = arith.constant 2 : index
    %c0_224 = arith.constant 0 : index
    %153 = vector.load %arg2[%c0_221, %c2_222, %c2_223, %c0_224] : memref<1x8x18x4xf32, #tpu.memory_space<vmem>>, vector<1x6x16x4xf32>
    %154 = vector.shape_cast %153 : vector<1x6x16x4xf32> to vector<6x16x4xf32>
    %c0_225 = arith.constant 0 : index
    %c0_226 = arith.constant 0 : index
    %c2_227 = arith.constant 2 : index
    %c0_228 = arith.constant 0 : index
    %155 = vector.load %arg3[%c0_225, %c0_226, %c2_227, %c0_228] : memref<1x2x18x4xf32, #tpu.memory_space<vmem>>, vector<1x2x16x4xf32>
    %156 = vector.shape_cast %155 : vector<1x2x16x4xf32> to vector<2x16x4xf32>
    %157 = tpu.concatenate %154, %156 in 0 : vector<6x16x4xf32>, vector<2x16x4xf32> -> vector<8x16x4xf32>
    %158 = vector.shape_cast %157 : vector<8x16x4xf32> to vector<128x4xf32>
    %c1_229 = arith.constant 1 : index
    %c1_230 = arith.constant 1 : index
    %c1_231 = arith.constant 1 : index
    %c1_232 = arith.constant 1 : index
    %c0_233 = arith.constant 0 : index
    %c0_234 = arith.constant 0 : index
    %159 = vector.load %arg4[%c1_229, %c1_230, %c1_231, %c1_232, %c0_233, %c0_234] : memref<2x2x2x2x4x4xf32, #tpu.memory_space<vmem>>, vector<1x1x1x1x4x4xf32>
    %160 = vector.shape_cast %159 : vector<1x1x1x1x4x4xf32> to vector<4x4xf32>
    %cst_235 = arith.constant dense<0.000000e+00> : vector<128x4xf32>
    %161 = tpu.matmul %158, %160, %cst_235 {dimension_numbers = #tpu.dot_dimension_numbers<[1], [0], [0], [1], [0, 0, 1, 1], [], []>} : vector<128x4xf32>, vector<4x4xf32>, vector<128x4xf32> -> vector<128x4xf32>
    %162 = arith.addf %152, %161 : vector<128x4xf32>
    %163 = vector.broadcast %0 : vector<1x4xf32> to vector<128x4xf32>
    %164 = arith.addf %162, %163 : vector<128x4xf32>
    %165 = vector.shape_cast %164 : vector<128x4xf32> to vector<8x16x4xf32>
    %c0_236 = arith.constant 0 : index
    %c0_237 = arith.constant 0 : index
    %c1_238 = arith.constant 1 : index
    %c0_239 = arith.constant 0 : index
    %c4_240 = arith.constant 4 : index
    %166 = vector.load %arg6[%c0_236, %c0_237, %c1_238, %c0_239, %c4_240] : memref<1x8x2x16x8xf32, #tpu.memory_space<vmem>>, vector<1x8x1x16x4xf32>
    %167 = vector.shape_cast %166 : vector<1x8x1x16x4xf32> to vector<8x16x4xf32>
    %168 = vector.shape_cast %165 : vector<8x16x4xf32> to vector<1x8x1x16x4xf32>
    tpu.vector_store %arg6[%c0_236, %c0_237, %c1_238, %c0_239, %c4_240], %168 {strides = array<i32>} : memref<1x8x2x16x8xf32, #tpu.memory_space<vmem>>, vector<1x8x1x16x4xf32>,
    return
  }
  func.func @transform_0(%arg0: i32, %arg1: i32) -> (i32, i32, i32, i32) {
    %c0_i32 = arith.constant 0 : i32
    %c0_i32_0 = arith.constant 0 : i32
    %c0_i32_1 = arith.constant 0 : i32
    return %arg0, %arg1, %c0_i32, %c0_i32_0 : i32, i32, i32, i32
  }
  func.func @transform_1(%arg0: i32, %arg1: i32) -> (i32, i32, i32, i32) {
    %c1_i32 = arith.constant 1 : i32
    %0 = arith.addi %arg1, %c1_i32 : i32
    %c4_i32 = arith.constant 4 : i32
    %1 = arith.muli %0, %c4_i32 : i32
    %c0_i32 = arith.constant 0 : i32
    %c0_i32_0 = arith.constant 0 : i32
    %c0_i32_1 = arith.constant 0 : i32
    return %arg0, %1, %c0_i32, %c0_i32_0 : i32, i32, i32, i32
  }
  func.func @transform_2(%arg0: i32, %arg1: i32) -> (i32, i32, i32, i32, i32, i32) {
    %c0_i32 = arith.constant 0 : i32
    %c0_i32_0 = arith.constant 0 : i32
    %c0_i32_1 = arith.constant 0 : i32
    %c0_i32_2 = arith.constant 0 : i32
    %c0_i32_3 = arith.constant 0 : i32
    %c0_i32_4 = arith.constant 0 : i32
    %c0_i32_5 = arith.constant 0 : i32
    return %c0_i32, %c0_i32_0, %c0_i32_1, %c0_i32_2, %c0_i32_3, %c0_i32_4 : i32, i32, i32, i32, i32, i32
  }
  func.func @transform_3(%arg0: i32, %arg1: i32) -> (i32, i32) {
    %c0_i32 = arith.constant 0 : i32
    %c0_i32_0 = arith.constant 0 : i32
    %c0_i32_1 = arith.constant 0 : i32
    return %c0_i32, %c0_i32_0 : i32, i32
  }
  func.func @transform_4(%arg0: i32, %arg1: i32) -> (i32, i32, i32, i32, i32) {
    %c0_i32 = arith.constant 0 : i32
    %c0_i32_0 = arith.constant 0 : i32
    %c0_i32_1 = arith.constant 0 : i32
    %c0_i32_2 = arith.constant 0 : i32
    return %arg0, %arg1, %c0_i32, %c0_i32_0, %c0_i32_1 : i32, i32, i32, i32, i32
  }
}

module attributes {stable_mosaic.version = 11 : i64} {
  func.func @_upsample_conv_kernel(%arg0: i32, %arg1: i32, %arg2: memref<1x8x18x4xf32, #tpu.memory_space<vmem>>, %arg3: memref<1x2x18x4xf32, #tpu.memory_space<vmem>>, %arg4: memref<2x2x2x2x4x4xf32, #tpu.memory_space<vmem>>, %arg5: memref<1x4xf32, #tpu.memory_space<vmem>>, %arg6: memref<1x8x2x16x8xf32, #tpu.memory_space<vmem>>) attributes {dimension_semantics = [#tpu.dimension_semantics<parallel>, #tpu.dimension_semantics<parallel>], iteration_bounds = array<i64: 2, 2>, scalar_prefetch = 0 : i64, scratch_operands = 0 : i64, tpu.core_type = #tpu.core_type<tc>, window_params = [{transform_indices = @transform_0, window_bounds = array<i64: 1, 8, 18, 4>}, {transform_indices = @transform_1, window_bounds = array<i64: 1, 2, 18, 4>}, {pipeline_mode = #tpu.pipeline_mode<synchronous>, transform_indices = @transform_2, window_bounds = array<i64: 2, 2, 2, 2, 4, 4>}, {pipeline_mode = #tpu.pipeline_mode<synchronous>, transform_indices = @transform_3, window_bounds = array<i64: 1, 4>}, {transform_indices = @transform_4, window_bounds = array<i64: 1, 8, 2, 16, 8>}]} {
    %c0 = arith.constant 0 : index
    %c0_0 = arith.constant 0 : index
    %0 = vector.load %arg5[%c0, %c0_0] : memref<1x4xf32, #tpu.memory_space<vmem>>, vector<1x4xf32>
    %c0_1 = arith.constant 0 : index
    %c0_2 = arith.constant 0 : index
    %c0_3 = arith.constant 0 : index
    %c0_4 = arith.constant 0 : index
    %1 = vector.load %arg2[%c0_1, %c0_2, %c0_3, %c0_4] : memref<1x8x18x4xf32, #tpu.memory_space<vmem>>, vector<1x8x16x4xf32>
    %2 = vector.shape_cast %1 : vector<1x8x16x4xf32> to vector<8x16x4xf32>
    %3 = vector.shape_cast %2 : vector<8x16x4xf32> to vector<128x4xf32>
    %c0_5 = arith.constant 0 : index
    %c0_6 = arith.constant 0 : index
    %c0_7 = arith.constant 0 : index
    %c0_8 = arith.constant 0 : index
    %c0_9 = arith.constant 0 : index
    %c0_10 = arith.constant 0 : index
    %4 = vector.load %arg4[%c0_5, %c0_6, %c0_7, %c0_8, %c0_9, %c0_10] : memref<2x2x2x2x4x4xf32, #tpu.memory_space<vmem>>, vector<1x1x1x1x4x4xf32>
    %5 = vector.shape_cast %4 : vector<1x1x1x1x4x4xf32> to vector<4x4xf32>
    %cst = arith.constant dense<0.000000e+00> : vector<128x4xf32>
    %6 = tpu.matmul %3, %5, %cst {dimension_numbers = #tpu.dot_dimension_numbers<[1], [0], [0], [1], [0, 0, 1, 1], [], []>} : vector<128x4xf32>, vector<4x4xf32>, vector<128x4xf32> -> vector<128x4xf32>
    %c0_11 = arith.constant 0 : index
    %c0_12 = arith.constant 0 : index
    %c1 = arith.constant 1 : index
    %c0_13 = arith.constant 0 : index
    %7 = vector.load %arg2[%c0_11, %c0_12, %c1, %c0_13] : memref<1x8x18x4xf32, #tpu.memory_space<vmem>>, vector<1x8x16x4xf32>
    %8 = vector.shape_cast %7 : vector<1x8x16x4xf32> to vector<8x16x4xf32>
    %9 = vector.shape_cast %8 : vector<8x16x4xf32> to vector<128x4xf32>
    %c0_14 = arith.constant 0 : index
    %c0_15 = arith.constant 0 : index
    %c0_16 = arith.constant 0 : index
    %c1_17 = arith.constant 1 : index
    %c0_18 = arith.constant 0 : index
    %c0_19 = arith.constant 0 : index
    %10 = vector.load %arg4[%c0_14, %c0_15, %c0_16, %c1_17, %c0_18, %c0_19] : memref<2x2x2x2x4x4xf32, #tpu.memory_space<vmem>>, vector<1x1x1x1x4x4xf32>
    %11 = vector.shape_cast %10 : vector<1x1x1x1x4x4xf32> to vector<4x4xf32>
    %cst_20 = arith.constant dense<0.000000e+00> : vector<128x4xf32>
    %12 = tpu.matmul %9, %11, %cst_20 {dimension_numbers = #tpu.dot_dimension_numbers<[1], [0], [0], [1], [0, 0, 1, 1], [], []>} : vector<128x4xf32>, vector<4x4xf32>, vector<128x4xf32> -> vector<128x4xf32>
    %13 = arith.addf %6, %12 : vector<128x4xf32>
    %c0_21 = arith.constant 0 : index
    %c1_22 = arith.constant 1 : index
    %c0_23 = arith.constant 0 : index
    %c0_24 = arith.constant 0 : index
    %14 = vector.load %arg2[%c0_21, %c1_22, %c0_23, %c0_24] : memref<1x8x18x4xf32, #tpu.memory_space<vmem>>, vector<1x7x16x4xf32>
    %15 = vector.shape_cast %14 : vector<1x7x16x4xf32> to vector<7x16x4xf32>
    %c0_25 = arith.constant 0 : index
    %c0_26 = arith.constant 0 : index
    %c0_27 = arith.constant 0 : index
    %c0_28 = arith.constant 0 : index
    %16 = vector.load %arg3[%c0_25, %c0_26, %c0_27, %c0_28] : memref<1x2x18x4xf32, #tpu.memory_space<vmem>>, vector<1x1x16x4xf32>
    %17 = vector.shape_cast %16 : vector<1x1x16x4xf32> to vector<1x16x4xf32>
    %18 = tpu.concatenate %15, %17 in 0 : vector<7x16x4xf32>, vector<1x16x4xf32> -> vector<8x16x4xf32>
    %19 = vector.shape_cast %18 : vector<8x16x4xf32> to vector<128x4xf32>
    %c0_29 = arith.constant 0 : index
    %c0_30 = arith.constant 0 : index
    %c1_31 = arith.constant 1 : index
    %c0_32 = arith.constant 0 : index
    %c0_33 = arith.constant 0 : index
    %c0_34 = arith.constant 0 : index
    %20 = vector.load %arg4[%c0_29, %c0_30, %c1_31, %c0_32, %c0_33, %c0_34] : memref<2x2x2x2x4x4xf32, #tpu.memory_space<vmem>>, vector<1x1x1x1x4x4xf32>
    %21 = vector.shape_cast %20 : vector<1x1x1x1x4x4xf32> to vector<4x4xf32>
    %cst_35 = arith.constant dense<0.000000e+00> : vector<128x4xf32>
    %22 = tpu.matmul %19, %21, %cst_35 {dimension_numbers = #tpu.dot_dimension_numbers<[1], [0], [0], [1], [0, 0, 1, 1], [], []>} : vector<128x4xf32>, vector<4x4xf32>, vector<128x4xf32> -> vector<128x4xf32>
    %23 = arith.addf %13, %22 : vector<128x4xf32>
    %c0_36 = arith.constant 0 : index
    %c1_37 = arith.constant 1 : index
    %c1_38 = arith.constant 1 : index
    %c0_39 = arith.constant 0 : index
    %24 = vector.load %arg2[%c0_36, %c1_37, %c1_38, %c0_39] : memref<1x8x18x4xf32, #tpu.memory_space<vmem>>, vector<1x7x16x4xf32>
    %25 = vector.shape_cast %24 : vector<1x7x16x4xf32> to vector<7x16x4xf32>
    %c0_40 = arith.constant 0 : index
    %c0_41 = arith.constant 0 : index
    %c1_42 = arith.constant 1 : index
    %c0_43 = arith.constant 0 : index
    %26 = vector.load %arg3[%c0_40, %c0_41, %c1_42, %c0_43] : memref<1x2x18x4xf32, #tpu.memory_space<vmem>>, vector<1x1x16x4xf32>
    %27 = vector.shape_cast %26 : vector<1x1x16x4xf32> to vector<1x16x4xf32>
    %28 = tpu.concatenate %25, %27 in 0 : vector<7x16x4xf32>, vector<1x16x4xf32> -> vector<8x16x4xf32>
    %29 = vector.shape_cast %28 : vector<8x16x4xf32> to vector<128x4xf32>
    %c0_44 = arith.constant 0 : index
    %c0_45 = arith.constant 0 : index
    %c1_46 = arith.constant 1 : index
    %c1_47 = arith.constant 1 : index
    %c0_48 = arith.constant 0 : index
    %c0_49 = arith.constant 0 : index
    %30 = vector.load %arg4[%c0_44, %c0_45, %c1_46, %c1_47, %c0_48, %c0_49] : memref<2x2x2x2x4x4xf32, #tpu.memory_space<vmem>>, vector<1x1x1x1x4x4xf32>
    %31 = vector.shape_cast %30 : vector<1x1x1x1x4x4xf32> to vector<4x4xf32>
    %cst_50 = arith.constant dense<0.000000e+00> : vector<128x4xf32>
    %32 = tpu.matmul %29, %31, %cst_50 {dimension_numbers = #tpu.dot_dimension_numbers<[1], [0], [0], [1], [0, 0, 1, 1], [], []>} : vector<128x4xf32>, vector<4x4xf32>, vector<128x4xf32> -> vector<128x4xf32>
    %33 = arith.addf %23, %32 : vector<128x4xf32>
    %34 = vector.broadcast %0 : vector<1x4xf32> to vector<128x4xf32>
    %35 = arith.addf %33, %34 : vector<128x4xf32>
    %36 = vector.shape_cast %35 : vector<128x4xf32> to vector<8x16x4xf32>
    %c0_51 = arith.constant 0 : index
    %c0_52 = arith.constant 0 : index
    %c0_53 = arith.constant 0 : index
    %c0_54 = arith.constant 0 : index
    %c0_55 = arith.constant 0 : index
    %37 = vector.load %arg6[%c0_51, %c0_52, %c0_53, %c0_54, %c0_55] : memref<1x8x2x16x8xf32, #tpu.memory_space<vmem>>, vector<1x8x1x16x4xf32>
    %38 = vector.shape_cast %37 : vector<1x8x1x16x4xf32> to vector<8x16x4xf32>
    %39 = vector.shape_cast %36 : vector<8x16x4xf32> to vector<1x8x1x16x4xf32>
    tpu.vector_store %arg6[%c0_51, %c0_52, %c0_53, %c0_54, %c0_55], %39 {strides = array<i32>} : memref<1x8x2x16x8xf32, #tpu.memory_space<vmem>>, vector<1x8x1x16x4xf32>,
    %c0_56 = arith.constant 0 : index
    %c0_57 = arith.constant 0 : index
    %c1_58 = arith.constant 1 : index
    %c0_59 = arith.constant 0 : index
    %40 = vector.load %arg2[%c0_56, %c0_57, %c1_58, %c0_59] : memref<1x8x18x4xf32, #tpu.memory_space<vmem>>, vector<1x8x16x4xf32>
    %41 = vector.shape_cast %40 : vector<1x8x16x4xf32> to vector<8x16x4xf32>
    %42 = vector.shape_cast %41 : vector<8x16x4xf32> to vector<128x4xf32>
    %c0_60 = arith.constant 0 : index
    %c1_61 = arith.constant 1 : index
    %c0_62 = arith.constant 0 : index
    %c0_63 = arith.constant 0 : index
    %c0_64 = arith.constant 0 : index
    %c0_65 = arith.constant 0 : index
    %43 = vector.load %arg4[%c0_60, %c1_61, %c0_62, %c0_63, %c0_64, %c0_65] : memref<2x2x2x2x4x4xf32, #tpu.memory_space<vmem>>, vector<1x1x1x1x4x4xf32>
    %44 = vector.shape_cast %43 : vector<1x1x1x1x4x4xf32> to vector<4x4xf32>
    %cst_66 = arith.constant dense<0.000000e+00> : vector<128x4xf32>
    %45 = tpu.matmul %42, %44, %cst_66 {dimension_numbers = #tpu.dot_dimension_numbers<[1], [0], [0], [1], [0, 0, 1, 1], [], []>} : vector<128x4xf32>, vector<4x4xf32>, vector<128x4xf32> -> vector<128x4xf32>
    %c0_67 = arith.constant 0 : index
    %c0_68 = arith.constant 0 : index
    %c2 = arith.constant 2 : index
    %c0_69 = arith.constant 0 : index
    %46 = vector.load %arg2[%c0_67, %c0_68, %c2, %c0_69] : memref<1x8x18x4xf32, #tpu.memory_space<vmem>>, vector<1x8x16x4xf32>
    %47 = vector.shape_cast %46 : vector<1x8x16x4xf32> to vector<8x16x4xf32>
    %48 = vector.shape_cast %47 : vector<8x16x4xf32> to vector<128x4xf32>
    %c0_70 = arith.constant 0 : index
    %c1_71 = arith.constant 1 : index
    %c0_72 = arith.constant 0 : index
    %c1_73 = arith.constant 1 : index
    %c0_74 = arith.constant 0 : index
    %c0_75 = arith.constant 0 : index
    %49 = vector.load %arg4[%c0_70, %c1_71, %c0_72, %c1_73, %c0_74, %c0_75] : memref<2x2x2x2x4x4xf32, #tpu.memory_space<vmem>>, vector<1x1x1x1x4x4xf32>
    %50 = vector.shape_cast %49 : vector<1x1x1x1x4x4xf32> to vector<4x4xf32>
    %cst_76 = arith.constant dense<0.000000e+00> : vector<128x4xf32>
    %51 = tpu.matmul %48, %50, %cst_76 {dimension_numbers = #tpu.dot_dimension_numbers<[1], [0], [0], [1], [0, 0, 1, 1], [], []>} : vector<128x4xf32>, vector<4x4xf32>, vector<128x4xf32> -> vector<128x4xf32>
    %52 = arith.addf %45, %51 : vector<128x4xf32>
    %c0_77 = arith.constant 0 : index
    %c1_78 = arith.constant 1 : index
    %c1_79 = arith.constant 1 : index
    %c0_80 = arith.constant 0 : index
    %53 = vector.load %arg2[%c0_77, %c1_78, %c1_79, %c0_80] : memref<1x8x18x4xf32, #tpu.memory_space<vmem>>, vector<1x7x16x4xf32>
    %54 = vector.shape_cast %53 : vector<1x7x16x4xf32> to vector<7x16x4xf32>
    %c0_81 = arith.constant 0 : index
    %c0_82 = arith.constant 0 : index
    %c1_83 = arith.constant 1 : index
    %c0_84 = arith.constant 0 : index
    %55 = vector.load %arg3[%c0_81, %c0_82, %c1_83, %c0_84] : memref<1x2x18x4xf32, #tpu.memory_space<vmem>>, vector<1x1x16x4xf32>
    %56 = vector.shape_cast %55 : vector<1x1x16x4xf32> to vector<1x16x4xf32>
    %57 = tpu.concatenate %54, %56 in 0 : vector<7x16x4xf32>, vector<1x16x4xf32> -> vector<8x16x4xf32>
    %58 = vector.shape_cast %57 : vector<8x16x4xf32> to vector<128x4xf32>
    %c0_85 = arith.constant 0 : index
    %c1_86 = arith.constant 1 : index
    %c1_87 = arith.constant 1 : index
    %c0_88 = arith.constant 0 : index
    %c0_89 = arith.constant 0 : index
    %c0_90 = arith.constant 0 : index
    %59 = vector.load %arg4[%c0_85, %c1_86, %c1_87, %c0_88, %c0_89, %c0_90] : memref<2x2x2x2x4x4xf32, #tpu.memory_space<vmem>>, vector<1x1x1x1x4x4xf32>
    %60 = vector.shape_cast %59 : vector<1x1x1x1x4x4xf32> to vector<4x4xf32>
    %cst_91 = arith.constant dense<0.000000e+00> : vector<128x4xf32>
    %61 = tpu.matmul %58, %60, %cst_91 {dimension_numbers = #tpu.dot_dimension_numbers<[1], [0], [0], [1], [0, 0, 1, 1], [], []>} : vector<128x4xf32>, vector<4x4xf32>, vector<128x4xf32> -> vector<128x4xf32>
    %62 = arith.addf %52, %61 : vector<128x4xf32>
    %c0_92 = arith.constant 0 : index
    %c1_93 = arith.constant 1 : index
    %c2_94 = arith.constant 2 : index
    %c0_95 = arith.constant 0 : index
    %63 = vector.load %arg2[%c0_92, %c1_93, %c2_94, %c0_95] : memref<1x8x18x4xf32, #tpu.memory_space<vmem>>, vector<1x7x16x4xf32>
    %64 = vector.shape_cast %63 : vector<1x7x16x4xf32> to vector<7x16x4xf32>
    %c0_96 = arith.constant 0 : index
    %c0_97 = arith.constant 0 : index
    %c2_98 = arith.constant 2 : index
    %c0_99 = arith.constant 0 : index
    %65 = vector.load %arg3[%c0_96, %c0_97, %c2_98, %c0_99] : memref<1x2x18x4xf32, #tpu.memory_space<vmem>>, vector<1x1x16x4xf32>
    %66 = vector.shape_cast %65 : vector<1x1x16x4xf32> to vector<1x16x4xf32>
    %67 = tpu.concatenate %64, %66 in 0 : vector<7x16x4xf32>, vector<1x16x4xf32> -> vector<8x16x4xf32>
    %68 = vector.shape_cast %67 : vector<8x16x4xf32> to vector<128x4xf32>
    %c0_100 = arith.constant 0 : index
    %c1_101 = arith.constant 1 : index
    %c1_102 = arith.constant 1 : index
    %c1_103 = arith.constant 1 : index
    %c0_104 = arith.constant 0 : index
    %c0_105 = arith.constant 0 : index
    %69 = vector.load %arg4[%c0_100, %c1_101, %c1_102, %c1_103, %c0_104, %c0_105] : memref<2x2x2x2x4x4xf32, #tpu.memory_space<vmem>>, vector<1x1x1x1x4x4xf32>
    %70 = vector.shape_cast %69 : vector<1x1x1x1x4x4xf32> to vector<4x4xf32>
    %cst_106 = arith.constant dense<0.000000e+00> : vector<128x4xf32>
    %71 = tpu.matmul %68, %70, %cst_106 {dimension_numbers = #tpu.dot_dimension_numbers<[1], [0], [0], [1], [0, 0, 1, 1], [], []>} : vector<128x4xf32>, vector<4x4xf32>, vector<128x4xf32> -> vector<128x4xf32>
    %72 = arith.addf %62, %71 : vector<128x4xf32>
    %73 = vector.broadcast %0 : vector<1x4xf32> to vector<128x4xf32>
    %74 = arith.addf %72, %73 : vector<128x4xf32>
    %75 = vector.shape_cast %74 : vector<128x4xf32> to vector<8x16x4xf32>
    %c0_107 = arith.constant 0 : index
    %c0_108 = arith.constant 0 : index
    %c0_109 = arith.constant 0 : index
    %c0_110 = arith.constant 0 : index
    %c4 = arith.constant 4 : index
    %76 = vector.load %arg6[%c0_107, %c0_108, %c0_109, %c0_110, %c4] : memref<1x8x2x16x8xf32, #tpu.memory_space<vmem>>, vector<1x8x1x16x4xf32>
    %77 = vector.shape_cast %76 : vector<1x8x1x16x4xf32> to vector<8x16x4xf32>
    %78 = vector.shape_cast %75 : vector<8x16x4xf32> to vector<1x8x1x16x4xf32>
    tpu.vector_store %arg6[%c0_107, %c0_108, %c0_109, %c0_110, %c4], %78 {strides = array<i32>} : memref<1x8x2x16x8xf32, #tpu.memory_space<vmem>>, vector<1x8x1x16x4xf32>,
    %c0_111 = arith.constant 0 : index
    %c1_112 = arith.constant 1 : index
    %c0_113 = arith.constant 0 : index
    %c0_114 = arith.constant 0 : index
    %79 = vector.load %arg2[%c0_111, %c1_112, %c0_113, %c0_114] : memref<1x8x18x4xf32, #tpu.memory_space<vmem>>, vector<1x7x16x4xf32>
    %80 = vector.shape_cast %79 : vector<1x7x16x4xf32> to vector<7x16x4xf32>
    %c0_115 = arith.constant 0 : index
    %c0_116 = arith.constant 0 : index
    %c0_117 = arith.constant 0 : index
    %c0_118 = arith.constant 0 : index
    %81 = vector.load %arg3[%c0_115, %c0_116, %c0_117, %c0_118] : memref<1x2x18x4xf32, #tpu.memory_space<vmem>>, vector<1x1x16x4xf32>
    %82 = vector.shape_cast %81 : vector<1x1x16x4xf32> to vector<1x16x4xf32>
    %83 = tpu.concatenate %80, %82 in 0 : vector<7x16x4xf32>, vector<1x16x4xf32> -> vector<8x16x4xf32>
    %84 = vector.shape_cast %83 : vector<8x16x4xf32> to vector<128x4xf32>
    %c1_119 = arith.constant 1 : index
    %c0_120 = arith.constant 0 : index
    %c0_121 = arith.constant 0 : index
    %c0_122 = arith.constant 0 : index
    %c0_123 = arith.constant 0 : index
    %c0_124 = arith.constant 0 : index
    %85 = vector.load %arg4[%c1_119, %c0_120, %c0_121, %c0_122, %c0_123, %c0_124] : memref<2x2x2x2x4x4xf32, #tpu.memory_space<vmem>>, vector<1x1x1x1x4x4xf32>
    %86 = vector.shape_cast %85 : vector<1x1x1x1x4x4xf32> to vector<4x4xf32>
    %cst_125 = arith.constant dense<0.000000e+00> : vector<128x4xf32>
    %87 = tpu.matmul %84, %86, %cst_125 {dimension_numbers = #tpu.dot_dimension_numbers<[1], [0], [0], [1], [0, 0, 1, 1], [], []>} : vector<128x4xf32>, vector<4x4xf32>, vector<128x4xf32> -> vector<128x4xf32>
    %c0_126 = arith.constant 0 : index
    %c1_127 = arith.constant 1 : index
    %c1_128 = arith.constant 1 : index
    %c0_129 = arith.constant 0 : index
    %88 = vector.load %arg2[%c0_126, %c1_127, %c1_128, %c0_129] : memref<1x8x18x4xf32, #tpu.memory_space<vmem>>, vector<1x7x16x4xf32>
    %89 = vector.shape_cast %88 : vector<1x7x16x4xf32> to vector<7x16x4xf32>
    %c0_130 = arith.constant 0 : index
    %c0_131 = arith.constant 0 : index
    %c1_132 = arith.constant 1 : index
    %c0_133 = arith.constant 0 : index
    %90 = vector.load %arg3[%c0_130, %c0_131, %c1_132, %c0_133] : memref<1x2x18x4xf32, #tpu.memory_space<vmem>>, vector<1x1x16x4xf32>
    %91 = vector.shape_cast %90 : vector<1x1x16x4xf32> to vector<1x16x4xf32>
    %92 = tpu.concatenate %89, %91 in 0 : vector<7x16x4xf32>, vector<1x16x4xf32> -> vector<8x16x4xf32>
    %93 = vector.shape_cast %92 : vector<8x16x4xf32> to vector<128x4xf32>
    %c1_134 = arith.constant 1 : index
    %c0_135 = arith.constant 0 : index
    %c0_136 = arith.constant 0 : index
    %c1_137 = arith.constant 1 : index
    %c0_138 = arith.constant 0 : index
    %c0_139 = arith.constant 0 : index
    %94 = vector.load %arg4[%c1_134, %c0_135, %c0_136, %c1_137, %c0_138, %c0_139] : memref<2x2x2x2x4x4xf32, #tpu.memory_space<vmem>>, vector<1x1x1x1x4x4xf32>
    %95 = vector.shape_cast %94 : vector<1x1x1x1x4x4xf32> to vector<4x4xf32>
    %cst_140 = arith.constant dense<0.000000e+00> : vector<128x4xf32>
    %96 = tpu.matmul %93, %95, %cst_140 {dimension_numbers = #tpu.dot_dimension_numbers<[1], [0], [0], [1], [0, 0, 1, 1], [], []>} : vector<128x4xf32>, vector<4x4xf32>, vector<128x4xf32> -> vector<128x4xf32>
    %97 = arith.addf %87, %96 : vector<128x4xf32>
    %c0_141 = arith.constant 0 : index
    %c2_142 = arith.constant 2 : index
    %c0_143 = arith.constant 0 : index
    %c0_144 = arith.constant 0 : index
    %98 = vector.load %arg2[%c0_141, %c2_142, %c0_143, %c0_144] : memref<1x8x18x4xf32, #tpu.memory_space<vmem>>, vector<1x6x16x4xf32>
    %99 = vector.shape_cast %98 : vector<1x6x16x4xf32> to vector<6x16x4xf32>
    %c0_145 = arith.constant 0 : index
    %c0_146 = arith.constant 0 : index
    %c0_147 = arith.constant 0 : index
    %c0_148 = arith.constant 0 : index
    %100 = vector.load %arg3[%c0_145, %c0_146, %c0_147, %c0_148] : memref<1x2x18x4xf32, #tpu.memory_space<vmem>>, vector<1x2x16x4xf32>
    %101 = vector.shape_cast %100 : vector<1x2x16x4xf32> to vector<2x16x4xf32>
    %102 = tpu.concatenate %99, %101 in 0 : vector<6x16x4xf32>, vector<2x16x4xf32> -> vector<8x16x4xf32>
    %103 = vector.shape_cast %102 : vector<8x16x4xf32> to vector<128x4xf32>
    %c1_149 = arith.constant 1 : index
    %c0_150 = arith.constant 0 : index
    %c1_151 = arith.constant 1 : index
    %c0_152 = arith.constant 0 : index
    %c0_153 = arith.constant 0 : index
    %c0_154 = arith.constant 0 : index
    %104 = vector.load %arg4[%c1_149, %c0_150, %c1_151, %c0_152, %c0_153, %c0_154] : memref<2x2x2x2x4x4xf32, #tpu.memory_space<vmem>>, vector<1x1x1x1x4x4xf32>
    %105 = vector.shape_cast %104 : vector<1x1x1x1x4x4xf32> to vector<4x4xf32>
    %cst_155 = arith.constant dense<0.000000e+00> : vector<128x4xf32>
    %106 = tpu.matmul %103, %105, %cst_155 {dimension_numbers = #tpu.dot_dimension_numbers<[1], [0], [0], [1], [0, 0, 1, 1], [], []>} : vector<128x4xf32>, vector<4x4xf32>, vector<128x4xf32> -> vector<128x4xf32>
    %107 = arith.addf %97, %106 : vector<128x4xf32>
    %c0_156 = arith.constant 0 : index
    %c2_157 = arith.constant 2 : index
    %c1_158 = arith.constant 1 : index
    %c0_159 = arith.constant 0 : index
    %108 = vector.load %arg2[%c0_156, %c2_157, %c1_158, %c0_159] : memref<1x8x18x4xf32, #tpu.memory_space<vmem>>, vector<1x6x16x4xf32>
    %109 = vector.shape_cast %108 : vector<1x6x16x4xf32> to vector<6x16x4xf32>
    %c0_160 = arith.constant 0 : index
    %c0_161 = arith.constant 0 : index
    %c1_162 = arith.constant 1 : index
    %c0_163 = arith.constant 0 : index
    %110 = vector.load %arg3[%c0_160, %c0_161, %c1_162, %c0_163] : memref<1x2x18x4xf32, #tpu.memory_space<vmem>>, vector<1x2x16x4xf32>
    %111 = vector.shape_cast %110 : vector<1x2x16x4xf32> to vector<2x16x4xf32>
    %112 = tpu.concatenate %109, %111 in 0 : vector<6x16x4xf32>, vector<2x16x4xf32> -> vector<8x16x4xf32>
    %113 = vector.shape_cast %112 : vector<8x16x4xf32> to vector<128x4xf32>
    %c1_164 = arith.constant 1 : index
    %c0_165 = arith.constant 0 : index
    %c1_166 = arith.constant 1 : index
    %c1_167 = arith.constant 1 : index
    %c0_168 = arith.constant 0 : index
    %c0_169 = arith.constant 0 : index
    %114 = vector.load %arg4[%c1_164, %c0_165, %c1_166, %c1_167, %c0_168, %c0_169] : memref<2x2x2x2x4x4xf32, #tpu.memory_space<vmem>>, vector<1x1x1x1x4x4xf32>
    %115 = vector.shape_cast %114 : vector<1x1x1x1x4x4xf32> to vector<4x4xf32>
    %cst_170 = arith.constant dense<0.000000e+00> : vector<128x4xf32>
    %116 = tpu.matmul %113, %115, %cst_170 {dimension_numbers = #tpu.dot_dimension_numbers<[1], [0], [0], [1], [0, 0, 1, 1], [], []>} : vector<128x4xf32>, vector<4x4xf32>, vector<128x4xf32> -> vector<128x4xf32>
    %117 = arith.addf %107, %116 : vector<128x4xf32>
    %118 = vector.broadcast %0 : vector<1x4xf32> to vector<128x4xf32>
    %119 = arith.addf %117, %118 : vector<128x4xf32>
    %120 = vector.shape_cast %119 : vector<128x4xf32> to vector<8x16x4xf32>
    %c0_171 = arith.constant 0 : index
    %c0_172 = arith.constant 0 : index
    %c1_173 = arith.constant 1 : index
    %c0_174 = arith.constant 0 : index
    %c0_175 = arith.constant 0 : index
    %121 = vector.load %arg6[%c0_171, %c0_172, %c1_173, %c0_174, %c0_175] : memref<1x8x2x16x8xf32, #tpu.memory_space<vmem>>, vector<1x8x1x16x4xf32>
    %122 = vector.shape_cast %121 : vector<1x8x1x16x4xf32> to vector<8x16x4xf32>
    %123 = vector.shape_cast %120 : vector<8x16x4xf32> to vector<1x8x1x16x4xf32>
    tpu.vector_store %arg6[%c0_171, %c0_172, %c1_173, %c0_174, %c0_175], %123 {strides = array<i32>} : memref<1x8x2x16x8xf32, #tpu.memory_space<vmem>>, vector<1x8x1x16x4xf32>,
    %c0_176 = arith.constant 0 : index
    %c1_177 = arith.constant 1 : index
    %c1_178 = arith.constant 1 : index
    %c0_179 = arith.constant 0 : index
    %124 = vector.load %arg2[%c0_176, %c1_177, %c1_178, %c0_179] : memref<1x8x18x4xf32, #tpu.memory_space<vmem>>, vector<1x7x16x4xf32>
    %125 = vector.shape_cast %124 : vector<1x7x16x4xf32> to vector<7x16x4xf32>
    %c0_180 = arith.constant 0 : index
    %c0_181 = arith.constant 0 : index
    %c1_182 = arith.constant 1 : index
    %c0_183 = arith.constant 0 : index
    %126 = vector.load %arg3[%c0_180, %c0_181, %c1_182, %c0_183] : memref<1x2x18x4xf32, #tpu.memory_space<vmem>>, vector<1x1x16x4xf32>
    %127 = vector.shape_cast %126 : vector<1x1x16x4xf32> to vector<1x16x4xf32>
    %128 = tpu.concatenate %125, %127 in 0 : vector<7x16x4xf32>, vector<1x16x4xf32> -> vector<8x16x4xf32>
    %129 = vector.shape_cast %128 : vector<8x16x4xf32> to vector<128x4xf32>
    %c1_184 = arith.constant 1 : index
    %c1_185 = arith.constant 1 : index
    %c0_186 = arith.constant 0 : index
    %c0_187 = arith.constant 0 : index
    %c0_188 = arith.constant 0 : index
    %c0_189 = arith.constant 0 : index
    %130 = vector.load %arg4[%c1_184, %c1_185, %c0_186, %c0_187, %c0_188, %c0_189] : memref<2x2x2x2x4x4xf32, #tpu.memory_space<vmem>>, vector<1x1x1x1x4x4xf32>
    %131 = vector.shape_cast %130 : vector<1x1x1x1x4x4xf32> to vector<4x4xf32>
    %cst_190 = arith.constant dense<0.000000e+00> : vector<128x4xf32>
    %132 = tpu.matmul %129, %131, %cst_190 {dimension_numbers = #tpu.dot_dimension_numbers<[1], [0], [0], [1], [0, 0, 1, 1], [], []>} : vector<128x4xf32>, vector<4x4xf32>, vector<128x4xf32> -> vector<128x4xf32>
    %c0_191 = arith.constant 0 : index
    %c1_192 = arith.constant 1 : index
    %c2_193 = arith.constant 2 : index
    %c0_194 = arith.constant 0 : index
    %133 = vector.load %arg2[%c0_191, %c1_192, %c2_193, %c0_194] : memref<1x8x18x4xf32, #tpu.memory_space<vmem>>, vector<1x7x16x4xf32>
    %134 = vector.shape_cast %133 : vector<1x7x16x4xf32> to vector<7x16x4xf32>
    %c0_195 = arith.constant 0 : index
    %c0_196 = arith.constant 0 : index
    %c2_197 = arith.constant 2 : index
    %c0_198 = arith.constant 0 : index
    %135 = vector.load %arg3[%c0_195, %c0_196, %c2_197, %c0_198] : memref<1x2x18x4xf32, #tpu.memory_space<vmem>>, vector<1x1x16x4xf32>
    %136 = vector.shape_cast %135 : vector<1x1x16x4xf32> to vector<1x16x4xf32>
    %137 = tpu.concatenate %134, %136 in 0 : vector<7x16x4xf32>, vector<1x16x4xf32> -> vector<8x16x4xf32>
    %138 = vector.shape_cast %137 : vector<8x16x4xf32> to vector<128x4xf32>
    %c1_199 = arith.constant 1 : index
    %c1_200 = arith.constant 1 : index
    %c0_201 = arith.constant 0 : index
    %c1_202 = arith.constant 1 : index
    %c0_203 = arith.constant 0 : index
    %c0_204 = arith.constant 0 : index
    %139 = vector.load %arg4[%c1_199, %c1_200, %c0_201, %c1_202, %c0_203, %c0_204] : memref<2x2x2x2x4x4xf32, #tpu.memory_space<vmem>>, vector<1x1x1x1x4x4xf32>
    %140 = vector.shape_cast %139 : vector<1x1x1x1x4x4xf32> to vector<4x4xf32>
    %cst_205 = arith.constant dense<0.000000e+00> : vector<128x4xf32>
    %141 = tpu.matmul %138, %140, %cst_205 {dimension_numbers = #tpu.dot_dimension_numbers<[1], [0], [0], [1], [0, 0, 1, 1], [], []>} : vector<128x4xf32>, vector<4x4xf32>, vector<128x4xf32> -> vector<128x4xf32>
    %142 = arith.addf %132, %141 : vector<128x4xf32>
    %c0_206 = arith.constant 0 : index
    %c2_207 = arith.constant 2 : index
    %c1_208 = arith.constant 1 : index
    %c0_209 = arith.constant 0 : index
    %143 = vector.load %arg2[%c0_206, %c2_207, %c1_208, %c0_209] : memref<1x8x18x4xf32, #tpu.memory_space<vmem>>, vector<1x6x16x4xf32>
    %144 = vector.shape_cast %143 : vector<1x6x16x4xf32> to vector<6x16x4xf32>
    %c0_210 = arith.constant 0 : index
    %c0_211 = arith.constant 0 : index
    %c1_212 = arith.constant 1 : index
    %c0_213 = arith.constant 0 : index
    %145 = vector.load %arg3[%c0_210, %c0_211, %c1_212, %c0_213] : memref<1x2x18x4xf32, #tpu.memory_space<vmem>>, vector<1x2x16x4xf32>
    %146 = vector.shape_cast %145 : vector<1x2x16x4xf32> to vector<2x16x4xf32>
    %147 = tpu.concatenate %144, %146 in 0 : vector<6x16x4xf32>, vector<2x16x4xf32> -> vector<8x16x4xf32>
    %148 = vector.shape_cast %147 : vector<8x16x4xf32> to vector<128x4xf32>
    %c1_214 = arith.constant 1 : index
    %c1_215 = arith.constant 1 : index
    %c1_216 = arith.constant 1 : index
    %c0_217 = arith.constant 0 : index
    %c0_218 = arith.constant 0 : index
    %c0_219 = arith.constant 0 : index
    %149 = vector.load %arg4[%c1_214, %c1_215, %c1_216, %c0_217, %c0_218, %c0_219] : memref<2x2x2x2x4x4xf32, #tpu.memory_space<vmem>>, vector<1x1x1x1x4x4xf32>
    %150 = vector.shape_cast %149 : vector<1x1x1x1x4x4xf32> to vector<4x4xf32>
    %cst_220 = arith.constant dense<0.000000e+00> : vector<128x4xf32>
    %151 = tpu.matmul %148, %150, %cst_220 {dimension_numbers = #tpu.dot_dimension_numbers<[1], [0], [0], [1], [0, 0, 1, 1], [], []>} : vector<128x4xf32>, vector<4x4xf32>, vector<128x4xf32> -> vector<128x4xf32>
    %152 = arith.addf %142, %151 : vector<128x4xf32>
    %c0_221 = arith.constant 0 : index
    %c2_222 = arith.constant 2 : index
    %c2_223 = arith.constant 2 : index
    %c0_224 = arith.constant 0 : index
    %153 = vector.load %arg2[%c0_221, %c2_222, %c2_223, %c0_224] : memref<1x8x18x4xf32, #tpu.memory_space<vmem>>, vector<1x6x16x4xf32>
    %154 = vector.shape_cast %153 : vector<1x6x16x4xf32> to vector<6x16x4xf32>
    %c0_225 = arith.constant 0 : index
    %c0_226 = arith.constant 0 : index
    %c2_227 = arith.constant 2 : index
    %c0_228 = arith.constant 0 : index
    %155 = vector.load %arg3[%c0_225, %c0_226, %c2_227, %c0_228] : memref<1x2x18x4xf32, #tpu.memory_space<vmem>>, vector<1x2x16x4xf32>
    %156 = vector.shape_cast %155 : vector<1x2x16x4xf32> to vector<2x16x4xf32>
    %157 = tpu.concatenate %154, %156 in 0 : vector<6x16x4xf32>, vector<2x16x4xf32> -> vector<8x16x4xf32>
    %158 = vector.shape_cast %157 : vector<8x16x4xf32> to vector<128x4xf32>
    %c1_229 = arith.constant 1 : index
    %c1_230 = arith.constant 1 : index
    %c1_231 = arith.constant 1 : index
    %c1_232 = arith.constant 1 : index
    %c0_233 = arith.constant 0 : index
    %c0_234 = arith.constant 0 : index
    %159 = vector.load %arg4[%c1_229, %c1_230, %c1_231, %c1_232, %c0_233, %c0_234] : memref<2x2x2x2x4x4xf32, #tpu.memory_space<vmem>>, vector<1x1x1x1x4x4xf32>
    %160 = vector.shape_cast %159 : vector<1x1x1x1x4x4xf32> to vector<4x4xf32>
    %cst_235 = arith.constant dense<0.000000e+00> : vector<128x4xf32>
    %161 = tpu.matmul %158, %160, %cst_235 {dimension_numbers = #tpu.dot_dimension_numbers<[1], [0], [0], [1], [0, 0, 1, 1], [], []>} : vector<128x4xf32>, vector<4x4xf32>, vector<128x4xf32> -> vector<128x4xf32>
    %162 = arith.addf %152, %161 : vector<128x4xf32>
    %163 = vector.broadcast %0 : vector<1x4xf32> to vector<128x4xf32>
    %164 = arith.addf %162, %163 : vector<128x4xf32>
    %165 = vector.shape_cast %164 : vector<128x4xf32> to vector<8x16x4xf32>
    %c0_236 = arith.constant 0 : index
    %c0_237 = arith.constant 0 : index
    %c1_238 = arith.constant 1 : index
    %c0_239 = arith.constant 0 : index
    %c4_240 = arith.constant 4 : index
    %166 = vector.load %arg6[%c0_236, %c0_237, %c1_238, %c0_239, %c4_240] : memref<1x8x2x16x8xf32, #tpu.memory_space<vmem>>, vector<1x8x1x16x4xf32>
    %167 = vector.shape_cast %166 : vector<1x8x1x16x4xf32> to vector<8x16x4xf32>
    %168 = vector.shape_cast %165 : vector<8x16x4xf32> to vector<1x8x1x16x4xf32>
    tpu.vector_store %arg6[%c0_236, %c0_237, %c1_238, %c0_239, %c4_240], %168 {strides = array<i32>} : memref<1x8x2x16x8xf32, #tpu.memory_space<vmem>>, vector<1x8x1x16x4xf32>,
    return
  }
  func.func @transform_0(%arg0: i32, %arg1: i32) -> (i32, i32, i32, i32) {
    %c0_i32 = arith.constant 0 : i32
    %c0_i32_0 = arith.constant 0 : i32
    %c0_i32_1 = arith.constant 0 : i32
    return %arg0, %arg1, %c0_i32, %c0_i32_0 : i32, i32, i32, i32
  }
  func.func @transform_1(%arg0: i32, %arg1: i32) -> (i32, i32, i32, i32) {
    %c1_i32 = arith.constant 1 : i32
    %0 = arith.addi %arg1, %c1_i32 : i32
    %c4_i32 = arith.constant 4 : i32
    %1 = arith.muli %0, %c4_i32 : i32
    %c0_i32 = arith.constant 0 : i32
    %c0_i32_0 = arith.constant 0 : i32
    %c0_i32_1 = arith.constant 0 : i32
    return %arg0, %1, %c0_i32, %c0_i32_0 : i32, i32, i32, i32
  }
  func.func @transform_2(%arg0: i32, %arg1: i32) -> (i32, i32, i32, i32, i32, i32) {
    %c0_i32 = arith.constant 0 : i32
    %c0_i32_0 = arith.constant 0 : i32
    %c0_i32_1 = arith.constant 0 : i32
    %c0_i32_2 = arith.constant 0 : i32
    %c0_i32_3 = arith.constant 0 : i32
    %c0_i32_4 = arith.constant 0 : i32
    %c0_i32_5 = arith.constant 0 : i32
    return %c0_i32, %c0_i32_0, %c0_i32_1, %c0_i32_2, %c0_i32_3, %c0_i32_4 : i32, i32, i32, i32, i32, i32
  }
  func.func @transform_3(%arg0: i32, %arg1: i32) -> (i32, i32) {
    %c0_i32 = arith.constant 0 : i32
    %c0_i32_0 = arith.constant 0 : i32
    %c0_i32_1 = arith.constant 0 : i32
    return %c0_i32, %c0_i32_0 : i32, i32
  }
  func.func @transform_4(%arg0: i32, %arg1: i32) -> (i32, i32, i32, i32, i32) {
    %c0_i32 = arith.constant 0 : i32
    %c0_i32_0 = arith.constant 0 : i32
    %c0_i32_1 = arith.constant 0 : i32
    %c0_i32_2 = arith.constant 0 : i32
    return %arg0, %arg1, %c0_i32, %c0_i32_0, %c0_i32_1 : i32, i32, i32, i32, i32
  }
}

</mosaic_0001>

<bundles_post_ra>
// kernel: tpu_custom_call.1
= control target key start
LH: loop header
LB: loop body
LE: loop exit
PB: predicated region body
PF: predicated region fallthrough
CT: control target
= control target key end

     0   :  { %s5757_s15 = smov 0   ;;  %s5759_s16 = smov 0   ;;  %s6805_s0 = inlined_call_operand.vmem [shape: f32[2,18,18,4], index: 0, kind: input, shape index: {}]   ;;  %s6806_s1 = inlined_call_operand.vmem [shape: f32[2,18,18,4], index: 1, kind: input, shape index: {}]   ;;  %s6807_s2 = inlined_call_operand.vmem [shape: f32[2,2,2,2,4,4], index: 2, kind: input, shape index: {}]   ;;  %s6808_s3 = inlined_call_operand.vmem [shape: f32[1,4], index: 3, kind: input, shape index: {}]   ;;  %s6809_s4 = inlined_call_operand.vmem [shape: f32[2,16,2,16,8], index: 4, kind: output, shape index: {}]  }
   0x1   :  { %s5761_s17 = smov 0   ;;  %s5763_s18 = smov 0  }
   0x2   :  { %s5765_s19 = smov 0  }
   0x3 LB: > { %s23_s20 = sadd.s32 1, %s5721_s17  ;;  %s26_s21 = sadd.s32 1, %s5725_s18  ;;  %s5729_s19 = sphi %s5765_s19, %s14_s19   ;;  %s5725_s18 = sphi %s5763_s18, %s6813_s18   ;;  %s5721_s17 = sphi %s5761_s17, %s6812_s17   ;;  %s5717_s16 = sphi %s5759_s16, %s6811_s16   ;;  %s5713_s15 = sphi %s5757_s15, %s6810_s15  }
   0x4   : > { %p24_p0 = scmp.ge.s32.totalorder %s23_s20, 2  ;;  %p4266_p1 = scmp.ge.s32.totalorder %s5729_s19, 1 }
   0x5   : > { %p220_p2 = scmp.lt.s32.totalorder %s5729_s19, 5 }
   0x6   : > { %s6815_s20 = smov (%p24_p0, %s23_s20), 0  ;;  %s6817_s21 = smov (!%p24_p0, %s26_s21), %s5725_s18 }
   0x7   : > { %p221_p3 = pnand %p4266_p1, %p220_p2  ;;  %p28_p4 = scmp.ge.s32.totalorder %s6817_s21, 2 }
   0x8   : > { %vm405_vm0 = vcmask (!%p221_p3), 1043456   ;;  %v4377_v0 = vld [vmem:[%s6807_s2 + $0x14] sm:$0xf] (!%p221_p3)  ;;  %s5790_s24 = sshll.u32 (!%p221_p3), %s5713_s15, 3  ;;  %p279_p5 = scmp.lt.s32.totalorder (!%p221_p3), %s5717_s16, 1  ;;  %vm356_vm1 = vcmask (!%p221_p3), 31744  }
   0x9   : > { %s6819_s21 = smov (%p28_p4, %s6817_s21), 0  ;;  %224 = sbr.rel (%p221_p3) target bundleno = 609 (0x261), region = 36 }
   0xa   : > { %5143 = vmatprep.subr.msk.mxu1 (!%p221_p3), %vm405_vm0, %v4377_v0  ;;  %p281_p6 = scmp.lt.s32.totalorder (!%p221_p3), %s5790_s24, 17  ;;  %v4376_v1 = vld [vmem:[%s6807_s2 + $0x10] sm:$0xf] (!%p221_p3)  ;;  %v4276_v2 = vld [vmem:[%s6807_s2 + $0x4] sm:$0xf] (!%p221_p3)  ;;  %s4766_s28 = sadd.s32 (!%p221_p3), 8, %s5790_s24 }
   0xb   : > { %5144 = vmatpush3.msk.msra.mxu1 (!%p221_p3), %vm405_vm0, %v4377_v0  ;;  %5039 = vmatprep.subr.msk.mxu0 (!%p221_p3), %vm405_vm0, %v4276_v2  ;;  %v337_v3 = vld [vmem:[%s6807_s2] sm:$0xf] (!%p221_p3)  ;;  %v5828_v7 = vld [vmem:[%s6807_s2 + $0x18] sm:$0xf] (!%p221_p3)  ;;  %v5855_v13 = vld [vmem:[%s6807_s2 + $0x8] sm:$0xf] (!%p221_p3) }
   0xc   : > { %5169 = vmatprep.subr.msk.mxu1 (!%p221_p3), %vm405_vm0, %v4376_v1  ;;  %5040 = vmatpush3.msk.msra.mxu0 (!%p221_p3), %vm405_vm0, %v4276_v2  ;;  %v4458_v39 = vld [vmem:[%s6807_s2 + $0x1c] sm:$0xf] (!%p221_p3)  ;;  %v4357_v42 = vld [vmem:[%s6807_s2 + $0xc] sm:$0xf] (!%p221_p3)  ;;  %v4645_v56 = vld [vmem:[%s6807_s2 + $0x34] sm:$0xf] (!%p221_p3) }
   0xd   : > { %5065 = vmatprep.subr.msk.mxu0 (!%p221_p3), %vm405_vm0, %v337_v3  ;;  %p299_p7 = scmp.lt.s32.totalorder (!%p221_p3), %s4766_s28, 17  ;;  %v4505_v57 = vld [vmem:[%s6807_s2 + $0x24] sm:$0xf] (!%p221_p3)  ;;  %v4630_v62 = vld [vmem:[%s6807_s2 + $0x30] sm:$0xf] (!%p221_p3)  ;;  %p312_p8 = scmp.lt.s32.totalorder (!%p221_p3), %s5790_s24, 15 }
   0xe   : > { %v4490_v63 = vld [vmem:[%s6807_s2 + $0x20] sm:$0xf] (!%p221_p3)  ;;  %v4692_v2 = vld [vmem:[%s6807_s2 + $0x38] sm:$0xf] (!%p221_p3)  ;;  %vm2217_vm2 = vcmask (!%p221_p3), 64544  }
  0x10   : > { %s6821_s16 = smov (!%p279_p5, %s5717_s16), 1  ;;  %s6823_s28 = smov (!%p299_p7, %s4766_s28), 17 }
  0x11   : > { %s282_s5 = scalar_select %p281_p6, %s5790_s24, 17 }
  0x12   : > { %s5648_s6 = smul.u32 54, %s6821_s16  ;;  %s6825_s24 = smov (!%p312_p8, %s5790_s24), 15 }
  0x13   : > { %s5647_s7 = smul.u32 3, %s282_s5 }
  0x15   : > { %s285_s8 = sadd.s32 %s5648_s6, %s5647_s7  ;;  %s4273_s7 = sshll.u32 %s6825_s24, 2 }
  0x16   : > { %s4268_s9 = sshll.u32 %s285_s8, 3  ;;  %s5649_s8 = smul.u32 3, %s6823_s28 }
  0x17   : > { %s5817_s12 = scalar_lea.vmem %s6805_s0, %s4268_s9 }
  0x18   : > { %v1267_v4 = vld [vmem:[%s5817_s12 + $0x2] sm:$0xff]  ;;  %v1268_v5 = vld [vmem:[%s5817_s12 + $0xa] sm:$0xff]  ;;  %v5822_v6 = vld [vmem:[%s5817_s12 + $0x1a] sm:$0xff]  ;;  %s303_s9 = sadd.s32 %s5649_s8, %s5648_s6  ;;  %s4274_s8 = sshll.u32 %s6821_s16, 6 }
  0x19   : > { %5145 = vmatprep.mubr.msk.f32.mxu1 %vm356_vm1, %v1267_v4  ;;  %v5835_v8 = vld [vmem:[%s5817_s12 + $0x22] sm:$0xff]  ;;  %v5842_v11 = vld [vmem:[%s5817_s12 + $0x32] sm:$0xff]  ;;  %v5867_v15 = vld [vmem:[%s5817_s12 + $0x3a] sm:$0xff]  ;;  %s4271_s10 = sshll.u32 %s303_s9, 3  ;;  %s316_s9 = sadd.s32 %s4274_s8, %s4273_s7 }
  0x1a   : > { %5146 = vmatmul.mubr.msk.f32.vlgmr.msra.gmra.mrb[0].mxu1 %vm356_vm1, %v1268_v5  ;;  %v338_v9 = vld [vmem:[%s5817_s12 + $0x1] sm:$0xff]  ;;  %v5839_v10 = vld [vmem:[%s5817_s12 + $0x9] sm:$0xff]  ;;  %v5846_v12 = vld [vmem:[%s5817_s12 + $0x19] sm:$0xff]  ;;  %s6159_s13 = scalar_lea.vmem %s6806_s1, %s4271_s10 }
  0x1b   : > { %5170 = vmatpush3.msk.msra.mxu1 %vm405_vm0, %v4376_v1  ;;  %5148 = vmatprep.mubr.msk.f32.mxu1 %vm356_vm1, %v5822_v6  ;;  %v5862_v14 = vld [vmem:[%s5817_s12 + $0x21] sm:$0xff]  ;;  %v5870_v16 = vld [vmem:[%s5817_s12 + $0x31] sm:$0xff]  ;;  %v5885_v18 = vld [vmem:[%s5817_s12 + $0x39] sm:$0xff] }
  0x1c   : > { %5041 = vmatprep.mubr.msk.f32.mxu0 %vm356_vm1, %v338_v9  ;;  %5195 = vmatprep.subr.msk.mxu1 %vm405_vm0, %v5828_v7  ;;  %v5874_v17 = vld [vmem:[%s5817_s12 + $0x4a] sm:$0xff]  ;;  %v5890_v19 = vld [vmem:[%s5817_s12 + $0x52] sm:$0xff]  ;;  %v5896_v21 = vld [vmem:[%s5817_s12 + $0x62] sm:$0xff] }
  0x1d   : > { %5042 = vmatmul.mubr.msk.f32.vlgmr.msra.gmra.mrb[0].mxu0 %vm356_vm1, %v5839_v10  ;;  %v5893_v20 = vld [vmem:[%s5817_s12 + $0x49] sm:$0xff]  ;;  %v5905_v22 = vld [vmem:[%s5817_s12 + $0x51] sm:$0xff]  ;;  %v5913_v24 = vld [vmem:[%s5817_s12 + $0x61] sm:$0xff] }
  0x1e   : > { %5149 = vmatmul.mubr.msk.f32.gmra.mrb[2].mxu1 %vm356_vm1, %v5835_v8  ;;  %5044 = vmatprep.mubr.msk.f32.mxu0 %vm356_vm1, %v5846_v12  ;;  %v5910_v23 = vld [vmem:[%s5817_s12 + $0x6a] sm:$0xff]  ;;  %v5916_v25 = vld [vmem:[%s5817_s12 + $0x7a] sm:$0xff]  ;;  %v5930_v27 = vld [vmem:[%s5817_s12 + $0x82] sm:$0xff] }
  0x1f   : > { %5151 = vmatprep.mubr.msk.f32.mxu1 %vm356_vm1, %v5842_v11  ;;  %5066 = vmatpush3.msk.msra.mxu0 %vm405_vm0, %v337_v3  ;;  %v5925_v26 = vld [vmem:[%s5817_s12 + $0x69] sm:$0xff]  ;;  %v5933_v28 = vld [vmem:[%s5817_s12 + $0x79] sm:$0xff]  ;;  %v5945_v30 = vld [vmem:[%s5817_s12 + $0x81] sm:$0xff] }
  0x20   : > { %5091 = vmatprep.subr.msk.mxu0 %vm405_vm0, %v5855_v13  ;;  %v5936_v29 = vld [vmem:[%s5817_s12 + $0x92] sm:$0xff]  ;;  %v5950_v31 = vld [vmem:[%s5817_s12 + $0x9a] sm:$0xff]  ;;  %v5956_v33 = vld [vmem:[%s5817_s12 + $0xaa] sm:$0xff] }
  0x21   : > { %5045 = vmatmul.mubr.msk.f32.gmra.mrb[2].mxu0 %vm356_vm1, %v5862_v14  ;;  %v5953_v32 = vld [vmem:[%s5817_s12 + $0x91] sm:$0xff]  ;;  %v5965_v34 = vld [vmem:[%s5817_s12 + $0x99] sm:$0xff]  ;;  %v5973_v36 = vld [vmem:[%s5817_s12 + $0xa9] sm:$0xff] }
  0x22   : > { %5152 = vmatmul.mubr.msk.f32.gmra.mrb[4].mxu1 %vm356_vm1, %v5867_v15  ;;  %5047 = vmatprep.mubr.msk.f32.mxu0 %vm356_vm1, %v5870_v16  ;;  %v5970_v35 = vld [vmem:[%s5817_s12 + $0xb2] sm:$0xff]  ;;  %v321_v38 = vld [vmem:[%s5817_s12] sm:$0xff]  ;;  %v322_v40 = vld [vmem:[%s5817_s12 + $0x8] sm:$0xff] }
  0x23   : > { %5154 = vmatprep.mubr.msk.f32.mxu1 %vm356_vm1, %v5874_v17  ;;  %v5982_v37 = vld [vmem:[%s5817_s12 + $0xb1] sm:$0xff]  ;;  %v6012_v43 = vld [vmem:[%s5817_s12 + $0x20] sm:$0xff]  ;;  %v6034_v46 = vld [vmem:[%s5817_s12 + $0x48] sm:$0xff] }
  0x24   : > { %v6000_v41 = vld [vmem:[%s5817_s12 + $0x18] sm:$0xff]  ;;  %v6017_v44 = vld [vmem:[%s5817_s12 + $0x30] sm:$0xff]  ;;  %v6048_v48 = vld [vmem:[%s5817_s12 + $0x60] sm:$0xff] }
  0x25   : > { %5048 = vmatmul.mubr.msk.f32.gmra.mrb[4].mxu0 %vm356_vm1, %v5885_v18  ;;  %v6029_v45 = vld [vmem:[%s5817_s12 + $0x38] sm:$0xff]  ;;  %v6043_v47 = vld [vmem:[%s5817_s12 + $0x50] sm:$0xff]  ;;  %v6057_v49 = vld [vmem:[%s5817_s12 + $0x68] sm:$0xff] }
  0x26   : > { %5155 = vmatmul.mubr.msk.f32.gmra.mrb[6].mxu1 %vm356_vm1, %v5890_v19  ;;  %5050 = vmatprep.mubr.msk.f32.mxu0 %vm356_vm1, %v5893_v20  ;;  %v6062_v50 = vld [vmem:[%s5817_s12 + $0x78] sm:$0xff]  ;;  %v6071_v51 = vld [vmem:[%s5817_s12 + $0x80] sm:$0xff]  ;;  %v6076_v52 = vld [vmem:[%s5817_s12 + $0x90] sm:$0xff] }
  0x27   : > { %5157 = vmatprep.mubr.msk.f32.mxu1 %vm356_vm1, %v5896_v21  ;;  %v6085_v53 = vld [vmem:[%s5817_s12 + $0x98] sm:$0xff]  ;;  %v6090_v54 = vld [vmem:[%s5817_s12 + $0xa8] sm:$0xff]  ;;  %v6099_v55 = vld [vmem:[%s5817_s12 + $0xb0] sm:$0xff]  ;;  %s4275_s12 = sshll.u32 %s316_s9, 3 }
  0x28   : > { %v6170_v58 = vld [vmem:[%s6159_s13 + $0x1] sm:$0xff]  ;;  %v6181_v59 = vld [vmem:[%s6159_s13 + $0x9] sm:$0xff]  ;;  %v4722_v4 = vld [vmem:[%s6807_s2 + $0x3c] sm:$0xf]  ;;  %s6566_s15 = scalar_lea.vmem %s6809_s4, %s4275_s12 }
  0x29   : > { %5051 = vmatmul.mubr.msk.f32.gmra.mrb[6].mxu0 %vm356_vm1, %v5905_v22  ;;  %v6184_v60 = vld [vmem:[%s6159_s13] sm:$0xff]  ;;  %v6193_v61 = vld [vmem:[%s6159_s13 + $0x8] sm:$0xff] }
  0x2a   : > { %5158 = vmatmul.mubr.msk.f32.gmra.mrb[8].mxu1 %vm356_vm1, %v5910_v23  ;;  %5053 = vmatprep.mubr.msk.f32.mxu0 %vm356_vm1, %v5913_v24  ;;  %v6256_v0 = vld [vmem:[%s6159_s13 + $0x2] sm:$0xff]  ;;  %v6267_v1 = vld [vmem:[%s6159_s13 + $0xa] sm:$0xff] }
  0x2b   : > { %5160 = vmatprep.mubr.msk.f32.mxu1 %vm356_vm1, %v5916_v25  ;;  %v4552_v3 = vld [vmem:[%s6807_s2 + $0x28] sm:$0xf]  ;;  %v4582_v5 = vld [vmem:[%s6807_s2 + $0x2c] sm:$0xf] }
  0x2d   : > { %5054 = vmatmul.mubr.msk.f32.gmra.mrb[8].mxu0 %vm356_vm1, %v5925_v26 }
  0x2e   : > { %5161 = vmatmul.mubr.msk.f32.gmra.mrb[10].mxu1 %vm356_vm1, %v5930_v27  ;;  %5056 = vmatprep.mubr.msk.f32.mxu0 %vm356_vm1, %v5933_v28 }
  0x2f   : > { %5163 = vmatprep.mubr.msk.f32.mxu1 %vm356_vm1, %v5936_v29 }
  0x31   : > { %5057 = vmatmul.mubr.msk.f32.gmra.mrb[10].mxu0 %vm356_vm1, %v5945_v30 }
  0x32   : > { %5164 = vmatmul.mubr.msk.f32.gmra.mrb[12].mxu1 %vm356_vm1, %v5950_v31  ;;  %5059 = vmatprep.mubr.msk.f32.mxu0 %vm356_vm1, %v5953_v32 }
  0x33   : > { %5166 = vmatprep.mubr.msk.f32.mxu1 %vm356_vm1, %v5956_v33 }
  0x35   : > { %5060 = vmatmul.mubr.msk.f32.gmra.mrb[12].mxu0 %vm356_vm1, %v5965_v34 }
  0x36   : > { %5167 = vmatmul.mubr.msk.f32.gmra.mrb[14].mxu1 %vm356_vm1, %v5970_v35  ;;  %5062 = vmatprep.mubr.msk.f32.mxu0 %vm356_vm1, %v5973_v36 }
  0x37   : > { %5171 = vmatprep.mubr.msk.f32.mxu1 %vm356_vm1, %v338_v9  ;;  %v2678_v9 = vld [vmem:[%s6159_s13 + $0x20] sm:$0xff] }
  0x39   : > { %5063 = vmatmul.mubr.msk.f32.gmra.mrb[14].mxu0 %vm356_vm1, %v5982_v37 }
  0x3a   : > { %5172 = vmatmul.mubr.msk.f32.vlgmr.msra.gmra.mrb[0].mxu1 %vm356_vm1, %v5839_v10  ;;  %5067 = vmatprep.mubr.msk.f32.mxu0 %vm356_vm1, %v321_v38  ;;  %v3828_v10 = vld [vmem:[%s6159_s13 + $0x1a] sm:$0xff] }
  0x3b   : > { %5196 = vmatpush3.msk.msra.mxu1 %vm405_vm0, %v5828_v7  ;;  %5174 = vmatprep.mubr.msk.f32.mxu1 %vm356_vm1, %v5846_v12  ;;  %v3599_v7 = vld [vmem:[%s6159_s13 + $0x21] sm:$0xff] }
  0x3c   : > { %5221 = vmatprep.subr.msk.mxu1 %vm405_vm0, %v4458_v39 }
  0x3d   : > { %5068 = vmatmul.mubr.msk.f32.vlgmr.msra.gmra.mrb[0].mxu0 %vm356_vm1, %v322_v40 }
  0x3e   : > { %5175 = vmatmul.mubr.msk.f32.gmra.mrb[2].mxu1 %vm356_vm1, %v5862_v14  ;;  %5070 = vmatprep.mubr.msk.f32.mxu0 %vm356_vm1, %v6000_v41 }
  0x3f   : > { %5177 = vmatprep.mubr.msk.f32.mxu1 %vm356_vm1, %v5870_v16  ;;  %5092 = vmatpush3.msk.msra.mxu0 %vm405_vm0, %v5855_v13 }
  0x40   : > { %5117 = vmatprep.subr.msk.mxu0 %vm405_vm0, %v4357_v42 }
  0x41   : > { %5071 = vmatmul.mubr.msk.f32.gmra.mrb[2].mxu0 %vm356_vm1, %v6012_v43 }
  0x42   : > { %5178 = vmatmul.mubr.msk.f32.gmra.mrb[4].mxu1 %vm356_vm1, %v5885_v18  ;;  %5073 = vmatprep.mubr.msk.f32.mxu0 %vm356_vm1, %v6017_v44 }
  0x43   : > { %5180 = vmatprep.mubr.msk.f32.mxu1 %vm356_vm1, %v5893_v20 }
  0x45   : > { %5074 = vmatmul.mubr.msk.f32.gmra.mrb[4].mxu0 %vm356_vm1, %v6029_v45 }
  0x46   : > { %5181 = vmatmul.mubr.msk.f32.gmra.mrb[6].mxu1 %vm356_vm1, %v5905_v22  ;;  %5076 = vmatprep.mubr.msk.f32.mxu0 %vm356_vm1, %v6034_v46 }
  0x47   : > { %5183 = vmatprep.mubr.msk.f32.mxu1 %vm356_vm1, %v5913_v24 }
  0x49   : > { %5077 = vmatmul.mubr.msk.f32.gmra.mrb[6].mxu0 %vm356_vm1, %v6043_v47 }
  0x4a   : > { %5184 = vmatmul.mubr.msk.f32.gmra.mrb[8].mxu1 %vm356_vm1, %v5925_v26  ;;  %5079 = vmatprep.mubr.msk.f32.mxu0 %vm356_vm1, %v6048_v48 }
  0x4b   : > { %5186 = vmatprep.mubr.msk.f32.mxu1 %vm356_vm1, %v5933_v28 }
  0x4d   : > { %5080 = vmatmul.mubr.msk.f32.gmra.mrb[8].mxu0 %vm356_vm1, %v6057_v49 }
  0x4e   : > { %5187 = vmatmul.mubr.msk.f32.gmra.mrb[10].mxu1 %vm356_vm1, %v5945_v30  ;;  %5082 = vmatprep.mubr.msk.f32.mxu0 %vm356_vm1, %v6062_v50 }
  0x4f   : > { %5189 = vmatprep.mubr.msk.f32.mxu1 %vm356_vm1, %v5953_v32 }
  0x51   : > { %5083 = vmatmul.mubr.msk.f32.gmra.mrb[10].mxu0 %vm356_vm1, %v6071_v51 }
  0x52   : > { %5190 = vmatmul.mubr.msk.f32.gmra.mrb[12].mxu1 %vm356_vm1, %v5965_v34  ;;  %5085 = vmatprep.mubr.msk.f32.mxu0 %vm356_vm1, %v6076_v52 }
  0x53   : > { %5192 = vmatprep.mubr.msk.f32.mxu1 %vm356_vm1, %v5973_v36 }
  0x55   : > { %5086 = vmatmul.mubr.msk.f32.gmra.mrb[12].mxu0 %vm356_vm1, %v6085_v53 }
  0x56   : > { %5193 = vmatmul.mubr.msk.f32.gmra.mrb[14].mxu1 %vm356_vm1, %v5982_v37  ;;  %5088 = vmatprep.mubr.msk.f32.mxu0 %vm356_vm1, %v6090_v54 }
  0x57   : > { %5197 = vmatprep.mubr.msk.f32.mxu1 %vm356_vm1, %v5846_v12 }
  0x59   : > { %5089 = vmatmul.mubr.msk.f32.gmra.mrb[14].mxu0 %vm356_vm1, %v6099_v55 }
  0x5a   : > { %5198 = vmatmul.mubr.msk.f32.vlgmr.msra.gmra.mrb[0].mxu1 %vm356_vm1, %v5862_v14  ;;  %5093 = vmatprep.mubr.msk.f32.mxu0 %vm356_vm1, %v6000_v41 }
  0x5b   : > { %5222 = vmatpush3.msk.msra.mxu1 %vm405_vm0, %v4458_v39  ;;  %5200 = vmatprep.mubr.msk.f32.mxu1 %vm356_vm1, %v5870_v16 }
  0x5c   : > { %5351 = vmatprep.subr.msk.mxu1 %vm405_vm0, %v4645_v56 }
  0x5d   : > { %5094 = vmatmul.mubr.msk.f32.vlgmr.msra.gmra.mrb[0].mxu0 %vm356_vm1, %v6012_v43 }
  0x5e   : > { %5201 = vmatmul.mubr.msk.f32.gmra.mrb[2].mxu1 %vm356_vm1, %v5885_v18  ;;  %5096 = vmatprep.mubr.msk.f32.mxu0 %vm356_vm1, %v6017_v44 }
  0x5f   : > { %5203 = vmatprep.mubr.msk.f32.mxu1 %vm356_vm1, %v5893_v20  ;;  %5118 = vmatpush3.msk.msra.mxu0 %vm405_vm0, %v4357_v42 }
  0x60   : > { %5247 = vmatprep.subr.msk.mxu0 %vm405_vm0, %v4505_v57 }
  0x61   : > { %5097 = vmatmul.mubr.msk.f32.gmra.mrb[2].mxu0 %vm356_vm1, %v6029_v45 }
  0x62   : > { %5204 = vmatmul.mubr.msk.f32.gmra.mrb[4].mxu1 %vm356_vm1, %v5905_v22  ;;  %5099 = vmatprep.mubr.msk.f32.mxu0 %vm356_vm1, %v6034_v46 }
  0x63   : > { %5206 = vmatprep.mubr.msk.f32.mxu1 %vm356_vm1, %v5913_v24 }
  0x65   : > { %5100 = vmatmul.mubr.msk.f32.gmra.mrb[4].mxu0 %vm356_vm1, %v6043_v47 }
  0x66   : > { %5207 = vmatmul.mubr.msk.f32.gmra.mrb[6].mxu1 %vm356_vm1, %v5925_v26  ;;  %5102 = vmatprep.mubr.msk.f32.mxu0 %vm356_vm1, %v6048_v48 }
  0x67   : > { %5209 = vmatprep.mubr.msk.f32.mxu1 %vm356_vm1, %v5933_v28 }
  0x69   : > { %5103 = vmatmul.mubr.msk.f32.gmra.mrb[6].mxu0 %vm356_vm1, %v6057_v49 }
  0x6a   : > { %5210 = vmatmul.mubr.msk.f32.gmra.mrb[8].mxu1 %vm356_vm1, %v5945_v30  ;;  %5105 = vmatprep.mubr.msk.f32.mxu0 %vm356_vm1, %v6062_v50 }
  0x6b   : > { %5212 = vmatprep.mubr.msk.f32.mxu1 %vm356_vm1, %v5953_v32 }
  0x6d   : > { %5106 = vmatmul.mubr.msk.f32.gmra.mrb[8].mxu0 %vm356_vm1, %v6071_v51 }
  0x6e   : > { %5213 = vmatmul.mubr.msk.f32.gmra.mrb[10].mxu1 %vm356_vm1, %v5965_v34  ;;  %5108 = vmatprep.mubr.msk.f32.mxu0 %vm356_vm1, %v6076_v52 }
  0x6f   : > { %5215 = vmatprep.mubr.msk.f32.mxu1 %vm356_vm1, %v5973_v36 }
  0x71   : > { %5109 = vmatmul.mubr.msk.f32.gmra.mrb[10].mxu0 %vm356_vm1, %v6085_v53 }
  0x72   : > { %5216 = vmatmul.mubr.msk.f32.gmra.mrb[12].mxu1 %vm356_vm1, %v5982_v37  ;;  %5111 = vmatprep.mubr.msk.f32.mxu0 %vm356_vm1, %v6090_v54 }
  0x73   : > { %5218 = vmatprep.mubr.msk.f32.mxu1 %vm356_vm1, %v6170_v58 }
  0x75   : > { %5112 = vmatmul.mubr.msk.f32.gmra.mrb[12].mxu0 %vm356_vm1, %v6099_v55 }
  0x76   : > { %5219 = vmatmul.mubr.msk.f32.gmra.mrb[14].mxu1 %vm356_vm1, %v6181_v59  ;;  %5114 = vmatprep.mubr.msk.f32.mxu0 %vm356_vm1, %v6184_v60 }
  0x77   : > { %5223 = vmatprep.mubr.msk.f32.mxu1 %vm356_vm1, %v5822_v6 }
  0x79   : > { %5115 = vmatmul.mubr.msk.f32.gmra.mrb[14].mxu0 %vm356_vm1, %v6193_v61 }
  0x7a   : > { %5224 = vmatmul.mubr.msk.f32.vlgmr.msra.gmra.mrb[0].mxu1 %vm356_vm1, %v5835_v8  ;;  %5119 = vmatprep.mubr.msk.f32.mxu0 %vm356_vm1, %v5846_v12 }
  0x7b   : > { %5352 = vmatpush3.msk.msra.mxu1 %vm405_vm0, %v4645_v56  ;;  %5226 = vmatprep.mubr.msk.f32.mxu1 %vm356_vm1, %v5842_v11 }
  0x7c   : > { %5377 = vmatprep.subr.msk.mxu1 %vm405_vm0, %v4630_v62 }
  0x7d   : > { %5120 = vmatmul.mubr.msk.f32.vlgmr.msra.gmra.mrb[0].mxu0 %vm356_vm1, %v5862_v14 }
  0x7e   : > { %5227 = vmatmul.mubr.msk.f32.gmra.mrb[2].mxu1 %vm356_vm1, %v5867_v15  ;;  %5122 = vmatprep.mubr.msk.f32.mxu0 %vm356_vm1, %v5870_v16 }
  0x7f   : > { %5229 = vmatprep.mubr.msk.f32.mxu1 %vm356_vm1, %v5874_v17  ;;  %5248 = vmatpush3.msk.msra.mxu0 %vm405_vm0, %v4505_v57 }
  0x80   : > { %5273 = vmatprep.subr.msk.mxu0 %vm405_vm0, %v4490_v63 }
  0x81   : > { %5123 = vmatmul.mubr.msk.f32.gmra.mrb[2].mxu0 %vm356_vm1, %v5885_v18 }
  0x82   : > { %5230 = vmatmul.mubr.msk.f32.gmra.mrb[4].mxu1 %vm356_vm1, %v5890_v19  ;;  %5125 = vmatprep.mubr.msk.f32.mxu0 %vm356_vm1, %v5893_v20 }
  0x83   : > { %5232 = vmatprep.mubr.msk.f32.mxu1 %vm356_vm1, %v5896_v21 }
  0x85   : > { %5126 = vmatmul.mubr.msk.f32.gmra.mrb[4].mxu0 %vm356_vm1, %v5905_v22 }
  0x86   : > { %5233 = vmatmul.mubr.msk.f32.gmra.mrb[6].mxu1 %vm356_vm1, %v5910_v23  ;;  %5128 = vmatprep.mubr.msk.f32.mxu0 %vm356_vm1, %v5913_v24 }
  0x87   : > { %5235 = vmatprep.mubr.msk.f32.mxu1 %vm356_vm1, %v5916_v25 }
  0x89   : > { %5129 = vmatmul.mubr.msk.f32.gmra.mrb[6].mxu0 %vm356_vm1, %v5925_v26 }
  0x8a   : > { %5236 = vmatmul.mubr.msk.f32.gmra.mrb[8].mxu1 %vm356_vm1, %v5930_v27  ;;  %5131 = vmatprep.mubr.msk.f32.mxu0 %vm356_vm1, %v5933_v28 }
  0x8b   : > { %5238 = vmatprep.mubr.msk.f32.mxu1 %vm356_vm1, %v5936_v29 }
  0x8d   : > { %5132 = vmatmul.mubr.msk.f32.gmra.mrb[8].mxu0 %vm356_vm1, %v5945_v30 }
  0x8e   : > { %5239 = vmatmul.mubr.msk.f32.gmra.mrb[10].mxu1 %vm356_vm1, %v5950_v31  ;;  %5134 = vmatprep.mubr.msk.f32.mxu0 %vm356_vm1, %v5953_v32 }
  0x8f   : > { %5241 = vmatprep.mubr.msk.f32.mxu1 %vm356_vm1, %v5956_v33 }
  0x91   : > { %5135 = vmatmul.mubr.msk.f32.gmra.mrb[10].mxu0 %vm356_vm1, %v5965_v34 }
  0x92   : > { %5242 = vmatmul.mubr.msk.f32.gmra.mrb[12].mxu1 %vm356_vm1, %v5970_v35  ;;  %5137 = vmatprep.mubr.msk.f32.mxu0 %vm356_vm1, %v5973_v36 }
  0x93   : > { %5244 = vmatprep.mubr.msk.f32.mxu1 %vm356_vm1, %v6256_v0 }
  0x95   : > { %5138 = vmatmul.mubr.msk.f32.gmra.mrb[12].mxu0 %vm356_vm1, %v5982_v37 }
  0x96   : > { %5245 = vmatmul.mubr.msk.f32.gmra.mrb[14].mxu1 %vm356_vm1, %v6267_v1  ;;  %5140 = vmatprep.mubr.msk.f32.mxu0 %vm356_vm1, %v6170_v58 }
  0x97   : > { %5353 = vmatprep.mubr.msk.f32.mxu1 %vm356_vm1, %v5822_v6  ;;  %v3598_v6 = vld [vmem:[%s6159_s13 + $0x19] sm:$0xff] }
  0x99   : > { %5141 = vmatmul.mubr.msk.f32.gmra.mrb[14].mxu0 %vm356_vm1, %v6181_v59 }
  0x9a   : > { %5354 = vmatmul.mubr.msk.f32.vlgmr.msra.gmra.mrb[16].mxu1 %vm356_vm1, %v5835_v8  ;;  %5249 = vmatprep.mubr.msk.f32.mxu0 %vm356_vm1, %v5846_v12  ;;  %v2677_v8 = vld [vmem:[%s6159_s13 + $0x18] sm:$0xff] }
  0x9b   : > { %5378 = vmatpush3.msk.msra.mxu1 %vm405_vm0, %v4630_v62  ;;  %5356 = vmatprep.mubr.msk.f32.mxu1 %vm356_vm1, %v5842_v11 }
  0x9c   : > { %5403 = vmatprep.subr.msk.mxu1 %vm405_vm0, %v4692_v2 }
  0x9d   : > { %5250 = vmatmul.mubr.msk.f32.vlgmr.msra.gmra.mrb[16].mxu0 %vm356_vm1, %v5862_v14 }
  0x9e   : > { %5357 = vmatmul.mubr.msk.f32.gmra.mrb[18].mxu1 %vm356_vm1, %v5867_v15  ;;  %5252 = vmatprep.mubr.msk.f32.mxu0 %vm356_vm1, %v5870_v16 }
  0x9f   : > { %5359 = vmatprep.mubr.msk.f32.mxu1 %vm356_vm1, %v5874_v17  ;;  %5274 = vmatpush3.msk.msra.mxu0 %vm405_vm0, %v4490_v63 }
  0xa0   : > { %5299 = vmatprep.subr.msk.mxu0 %vm405_vm0, %v4552_v3 }
  0xa1   : > { %5253 = vmatmul.mubr.msk.f32.gmra.mrb[18].mxu0 %vm356_vm1, %v5885_v18 }
  0xa2   : > { %5360 = vmatmul.mubr.msk.f32.gmra.mrb[20].mxu1 %vm356_vm1, %v5890_v19  ;;  %5255 = vmatprep.mubr.msk.f32.mxu0 %vm356_vm1, %v5893_v20 }
  0xa3   : > { %5362 = vmatprep.mubr.msk.f32.mxu1 %vm356_vm1, %v5896_v21 }
  0xa5   : > { %5256 = vmatmul.mubr.msk.f32.gmra.mrb[20].mxu0 %vm356_vm1, %v5905_v22 }
  0xa6   : > { %5363 = vmatmul.mubr.msk.f32.gmra.mrb[22].mxu1 %vm356_vm1, %v5910_v23  ;;  %5258 = vmatprep.mubr.msk.f32.mxu0 %vm356_vm1, %v5913_v24 }
  0xa7   : > { %5365 = vmatprep.mubr.msk.f32.mxu1 %vm356_vm1, %v5916_v25 }
  0xa9   : > { %5259 = vmatmul.mubr.msk.f32.gmra.mrb[22].mxu0 %vm356_vm1, %v5925_v26 }
  0xaa   : > { %5366 = vmatmul.mubr.msk.f32.gmra.mrb[24].mxu1 %vm356_vm1, %v5930_v27  ;;  %5261 = vmatprep.mubr.msk.f32.mxu0 %vm356_vm1, %v5933_v28 }
  0xab   : > { %5368 = vmatprep.mubr.msk.f32.mxu1 %vm356_vm1, %v5936_v29 }
  0xad   : > { %5262 = vmatmul.mubr.msk.f32.gmra.mrb[24].mxu0 %vm356_vm1, %v5945_v30 }
  0xae   : > { %5369 = vmatmul.mubr.msk.f32.gmra.mrb[26].mxu1 %vm356_vm1, %v5950_v31  ;;  %5264 = vmatprep.mubr.msk.f32.mxu0 %vm356_vm1, %v5953_v32 }
  0xaf   : > { %5371 = vmatprep.mubr.msk.f32.mxu1 %vm356_vm1, %v5956_v33 }
  0xb1   : > { %5265 = vmatmul.mubr.msk.f32.gmra.mrb[26].mxu0 %vm356_vm1, %v5965_v34 }
  0xb2   : > { %5372 = vmatmul.mubr.msk.f32.gmra.mrb[28].mxu1 %vm356_vm1, %v5970_v35  ;;  %5267 = vmatprep.mubr.msk.f32.mxu0 %vm356_vm1, %v5973_v36 }
  0xb3   : > { %5374 = vmatprep.mubr.msk.f32.mxu1 %vm356_vm1, %v6256_v0 }
  0xb5   : > { %5268 = vmatmul.mubr.msk.f32.gmra.mrb[28].mxu0 %vm356_vm1, %v5982_v37 }
  0xb6   : > { %5375 = vmatmul.mubr.msk.f32.gmra.mrb[30].mxu1 %vm356_vm1, %v6267_v1  ;;  %5270 = vmatprep.mubr.msk.f32.mxu0 %vm356_vm1, %v6170_v58 }
  0xb7   : > { %5379 = vmatprep.mubr.msk.f32.mxu1 %vm356_vm1, %v5846_v12  ;;  %v6559_v12 = vld [vmem:[%s6808_s3] ss:$0 sm:$0xff] }
  0xb9   : > { %5271 = vmatmul.mubr.msk.f32.gmra.mrb[30].mxu0 %vm356_vm1, %v6181_v59 }
  0xba   : > { %5380 = vmatmul.mubr.msk.f32.vlgmr.msra.gmra.mrb[16].mxu1 %vm356_vm1, %v5862_v14  ;;  %5275 = vmatprep.mubr.msk.f32.mxu0 %vm356_vm1, %v6000_v41 }
  0xbb   : > { %5404 = vmatpush3.msk.msra.mxu1 %vm405_vm0, %v4692_v2  ;;  %5382 = vmatprep.mubr.msk.f32.mxu1 %vm356_vm1, %v5870_v16 }
  0xbc   : > { %5429 = vmatprep.subr.msk.mxu1 %vm405_vm0, %v4722_v4 }
  0xbd   : > { %5276 = vmatmul.mubr.msk.f32.vlgmr.msra.gmra.mrb[16].mxu0 %vm356_vm1, %v6012_v43 }
  0xbe   : > { %5383 = vmatmul.mubr.msk.f32.gmra.mrb[18].mxu1 %vm356_vm1, %v5885_v18  ;;  %5278 = vmatprep.mubr.msk.f32.mxu0 %vm356_vm1, %v6017_v44 }
  0xbf   : > { %5385 = vmatprep.mubr.msk.f32.mxu1 %vm356_vm1, %v5893_v20  ;;  %5300 = vmatpush3.msk.msra.mxu0 %vm405_vm0, %v4552_v3 }
  0xc0   : > { %5325 = vmatprep.subr.msk.mxu0 %vm405_vm0, %v4582_v5 }
  0xc1   : > { %5279 = vmatmul.mubr.msk.f32.gmra.mrb[18].mxu0 %vm356_vm1, %v6029_v45 }
  0xc2   : > { %5386 = vmatmul.mubr.msk.f32.gmra.mrb[20].mxu1 %vm356_vm1, %v5905_v22  ;;  %5281 = vmatprep.mubr.msk.f32.mxu0 %vm356_vm1, %v6034_v46 }
  0xc3   : > { %5388 = vmatprep.mubr.msk.f32.mxu1 %vm356_vm1, %v5913_v24 }
  0xc5   : > { %5282 = vmatmul.mubr.msk.f32.gmra.mrb[20].mxu0 %vm356_vm1, %v6043_v47 }
  0xc6   : > { %5389 = vmatmul.mubr.msk.f32.gmra.mrb[22].mxu1 %vm356_vm1, %v5925_v26  ;;  %5284 = vmatprep.mubr.msk.f32.mxu0 %vm356_vm1, %v6048_v48 }
  0xc7   : > { %5391 = vmatprep.mubr.msk.f32.mxu1 %vm356_vm1, %v5933_v28 }
  0xc9   : > { %5285 = vmatmul.mubr.msk.f32.gmra.mrb[22].mxu0 %vm356_vm1, %v6057_v49 }
  0xca   : > { %5392 = vmatmul.mubr.msk.f32.gmra.mrb[24].mxu1 %vm356_vm1, %v5945_v30  ;;  %5287 = vmatprep.mubr.msk.f32.mxu0 %vm356_vm1, %v6062_v50 }
  0xcb   : > { %5394 = vmatprep.mubr.msk.f32.mxu1 %vm356_vm1, %v5953_v32 }
  0xcd   : > { %5288 = vmatmul.mubr.msk.f32.gmra.mrb[24].mxu0 %vm356_vm1, %v6071_v51 }
  0xce   : > { %5395 = vmatmul.mubr.msk.f32.gmra.mrb[26].mxu1 %vm356_vm1, %v5965_v34  ;;  %5290 = vmatprep.mubr.msk.f32.mxu0 %vm356_vm1, %v6076_v52 }
  0xcf   : > { %5397 = vmatprep.mubr.msk.f32.mxu1 %vm356_vm1, %v5973_v36 }
  0xd1   : > { %5291 = vmatmul.mubr.msk.f32.gmra.mrb[26].mxu0 %vm356_vm1, %v6085_v53 }
  0xd2   : > { %5398 = vmatmul.mubr.msk.f32.gmra.mrb[28].mxu1 %vm356_vm1, %v5982_v37  ;;  %5293 = vmatprep.mubr.msk.f32.mxu0 %vm356_vm1, %v6090_v54 }
  0xd3   : > { %5400 = vmatprep.mubr.msk.f32.mxu1 %vm356_vm1, %v6170_v58 }
  0xd5   : > { %5294 = vmatmul.mubr.msk.f32.gmra.mrb[28].mxu0 %vm356_vm1, %v6099_v55 }
  0xd6   : > { %5401 = vmatmul.mubr.msk.f32.gmra.mrb[30].mxu1 %vm356_vm1, %v6181_v59  ;;  %5296 = vmatprep.mubr.msk.f32.mxu0 %vm356_vm1, %v6184_v60 }
  0xd7   : > { %5405 = vmatprep.mubr.msk.f32.mxu1 %vm356_vm1, %v5870_v16 }
  0xd9   : > { %5297 = vmatmul.mubr.msk.f32.gmra.mrb[30].mxu0 %vm356_vm1, %v6193_v61 }
  0xda   : > { %5406 = vmatmul.mubr.msk.f32.vlgmr.msra.gmra.mrb[16].mxu1 %vm356_vm1, %v5885_v18  ;;  %5301 = vmatprep.mubr.msk.f32.mxu0 %vm356_vm1, %v6017_v44 }
  0xdb   : > { %5430 = vmatpush3.msk.msra.mxu1 %vm405_vm0, %v4722_v4  ;;  %5408 = vmatprep.mubr.msk.f32.mxu1 %vm356_vm1, %v5893_v20 }
  0xdd   : > { %5302 = vmatmul.mubr.msk.f32.vlgmr.msra.gmra.mrb[16].mxu0 %vm356_vm1, %v6029_v45 }
  0xde   : > { %5409 = vmatmul.mubr.msk.f32.gmra.mrb[18].mxu1 %vm356_vm1, %v5905_v22  ;;  %5304 = vmatprep.mubr.msk.f32.mxu0 %vm356_vm1, %v6034_v46 }
  0xdf   : > { %5411 = vmatprep.mubr.msk.f32.mxu1 %vm356_vm1, %v5913_v24  ;;  %5326 = vmatpush3.msk.msra.mxu0 %vm405_vm0, %v4582_v5 }
  0xe1   : > { %5305 = vmatmul.mubr.msk.f32.gmra.mrb[18].mxu0 %vm356_vm1, %v6043_v47 }
  0xe2   : > { %5412 = vmatmul.mubr.msk.f32.gmra.mrb[20].mxu1 %vm356_vm1, %v5925_v26  ;;  %5307 = vmatprep.mubr.msk.f32.mxu0 %vm356_vm1, %v6048_v48 }
  0xe3   : > { %5414 = vmatprep.mubr.msk.f32.mxu1 %vm356_vm1, %v5933_v28 }
  0xe5   : > { %5308 = vmatmul.mubr.msk.f32.gmra.mrb[20].mxu0 %vm356_vm1, %v6057_v49 }
  0xe6   : > { %5415 = vmatmul.mubr.msk.f32.gmra.mrb[22].mxu1 %vm356_vm1, %v5945_v30  ;;  %5310 = vmatprep.mubr.msk.f32.mxu0 %vm356_vm1, %v6062_v50 }
  0xe7   : > { %5417 = vmatprep.mubr.msk.f32.mxu1 %vm356_vm1, %v5953_v32 }
  0xe9   : > { %5311 = vmatmul.mubr.msk.f32.gmra.mrb[22].mxu0 %vm356_vm1, %v6071_v51 }
  0xea   : > { %5418 = vmatmul.mubr.msk.f32.gmra.mrb[24].mxu1 %vm356_vm1, %v5965_v34  ;;  %5313 = vmatprep.mubr.msk.f32.mxu0 %vm356_vm1, %v6076_v52 }
  0xeb   : > { %5420 = vmatprep.mubr.msk.f32.mxu1 %vm356_vm1, %v5973_v36 }
  0xed   : > { %5314 = vmatmul.mubr.msk.f32.gmra.mrb[24].mxu0 %vm356_vm1, %v6085_v53 }
  0xee   : > { %5421 = vmatmul.mubr.msk.f32.gmra.mrb[26].mxu1 %vm356_vm1, %v5982_v37  ;;  %5316 = vmatprep.mubr.msk.f32.mxu0 %vm356_vm1, %v6090_v54 }
  0xef   : > { %5423 = vmatprep.mubr.msk.f32.mxu1 %vm356_vm1, %v6170_v58 }
  0xf1   : > { %5317 = vmatmul.mubr.msk.f32.gmra.mrb[26].mxu0 %vm356_vm1, %v6099_v55 }
  0xf2   : > { %5424 = vmatmul.mubr.msk.f32.gmra.mrb[28].mxu1 %vm356_vm1, %v6181_v59  ;;  %5319 = vmatprep.mubr.msk.f32.mxu0 %vm356_vm1, %v6184_v60 }
  0xf3   : > { %5426 = vmatprep.mubr.msk.f32.mxu1 %vm356_vm1, %v3598_v6 }
  0xf5   : > { %5320 = vmatmul.mubr.msk.f32.gmra.mrb[28].mxu0 %vm356_vm1, %v6193_v61 }
  0xf6   : > { %5427 = vmatmul.mubr.msk.f32.gmra.mrb[30].mxu1 %vm356_vm1, %v3599_v7  ;;  %5322 = vmatprep.mubr.msk.f32.mxu0 %vm356_vm1, %v2677_v8 }
  0xf7   : > { %5431 = vmatprep.mubr.msk.f32.mxu1 %vm356_vm1, %v5842_v11  ;;  %v3829_v11 = vld [vmem:[%s6159_s13 + $0x22] sm:$0xff]  ;;  %s5731_s13 = smov 4  }
  0xf9   : > { %5323 = vmatmul.mubr.msk.f32.gmra.mrb[30].mxu0 %vm356_vm1, %v2678_v9 }
  0xfa   : > { %5432 = vmatmul.mubr.msk.f32.vlgmr.msra.gmra.mrb[16].mxu1 %vm356_vm1, %v5867_v15  ;;  %5327 = vmatprep.mubr.msk.f32.mxu0 %vm356_vm1, %v5870_v16 }
  0xfb   : > { %5434 = vmatprep.mubr.msk.f32.mxu1 %vm356_vm1, %v5874_v17 }
  0xfd   : > { %5328 = vmatmul.mubr.msk.f32.vlgmr.msra.gmra.mrb[16].mxu0 %vm356_vm1, %v5885_v18 }
  0xfe   : > { %5435 = vmatmul.mubr.msk.f32.gmra.mrb[18].mxu1 %vm356_vm1, %v5890_v19  ;;  %5330 = vmatprep.mubr.msk.f32.mxu0 %vm356_vm1, %v5893_v20 }
  0xff   : > { %5437 = vmatprep.mubr.msk.f32.mxu1 %vm356_vm1, %v5896_v21 }
 0x101   : > { %5331 = vmatmul.mubr.msk.f32.gmra.mrb[18].mxu0 %vm356_vm1, %v5905_v22 }
 0x102   : > { %5438 = vmatmul.mubr.msk.f32.gmra.mrb[20].mxu1 %vm356_vm1, %v5910_v23  ;;  %5333 = vmatprep.mubr.msk.f32.mxu0 %vm356_vm1, %v5913_v24 }
 0x103   : > { %5440 = vmatprep.mubr.msk.f32.mxu1 %vm356_vm1, %v5916_v25 }
 0x105   : > { %5334 = vmatmul.mubr.msk.f32.gmra.mrb[20].mxu0 %vm356_vm1, %v5925_v26 }
 0x106   : > { %5441 = vmatmul.mubr.msk.f32.gmra.mrb[22].mxu1 %vm356_vm1, %v5930_v27  ;;  %5336 = vmatprep.mubr.msk.f32.mxu0 %vm356_vm1, %v5933_v28 }
 0x107   : > { %5443 = vmatprep.mubr.msk.f32.mxu1 %vm356_vm1, %v5936_v29 }
 0x109   : > { %5337 = vmatmul.mubr.msk.f32.gmra.mrb[22].mxu0 %vm356_vm1, %v5945_v30 }
 0x10a   : > { %5444 = vmatmul.mubr.msk.f32.gmra.mrb[24].mxu1 %vm356_vm1, %v5950_v31  ;;  %5339 = vmatprep.mubr.msk.f32.mxu0 %vm356_vm1, %v5953_v32 }
 0x10b   : > { %5446 = vmatprep.mubr.msk.f32.mxu1 %vm356_vm1, %v5956_v33 }
 0x10d   : > { %5340 = vmatmul.mubr.msk.f32.gmra.mrb[24].mxu0 %vm356_vm1, %v5965_v34 }
 0x10e   : > { %5447 = vmatmul.mubr.msk.f32.gmra.mrb[26].mxu1 %vm356_vm1, %v5970_v35  ;;  %5342 = vmatprep.mubr.msk.f32.mxu0 %vm356_vm1, %v5973_v36 }
 0x10f   : > { %5449 = vmatprep.mubr.msk.f32.mxu1 %vm356_vm1, %v6256_v0 }
 0x111   : > { %5343 = vmatmul.mubr.msk.f32.gmra.mrb[26].mxu0 %vm356_vm1, %v5982_v37 }
 0x112   : > { %5450 = vmatmul.mubr.msk.f32.gmra.mrb[28].mxu1 %vm356_vm1, %v6267_v1  ;;  %5345 = vmatprep.mubr.msk.f32.mxu0 %vm356_vm1, %v6170_v58 }
 0x113   : > { %5452 = vmatprep.mubr.msk.f32.mxu1 %vm356_vm1, %v3828_v10 }
 0x115   : > { %5346 = vmatmul.mubr.msk.f32.gmra.mrb[28].mxu0 %vm356_vm1, %v6181_v59 }
 0x116   : > { %5453 = vmatmul.mubr.msk.f32.gmra.mrb[30].mxu1 %vm356_vm1, %v3829_v11  ;;  %5348 = vmatprep.mubr.msk.f32.mxu0 %vm356_vm1, %v3598_v6 }
 0x119   : > { %5349 = vmatmul.mubr.msk.f32.gmra.mrb[30].mxu0 %vm356_vm1, %v3599_v7 }
 0x14d   : > { %v5225_v13 = vpop.f32.mrb[0].mxu1 }
 0x14e   : > { %v2138_v14 = vadd.f32 %v5225_v13, %v6559_v12  ;;  %v2042_v15 = vpop.f32.mrb[1].mxu1 }
 0x14f   : > { %v2137_v20 = vadd.f32 %v6559_v12, %v2042_v15 }
 0x150   : > { %2171 = vrot.lane.b32.xlu0 %v2138_v14, %s5731_s13  ;;  %v5121_v16 = vpop.f32.mrb[0].mxu0 }
 0x151   : > { %v5228_v17 = vpop.f32.mrb[2].mxu1  ;;  %v1218_v18 = vadd.f32 %v5121_v16, %v6559_v12  ;;  %v1116_v19 = vpop.f32.mrb[1].mxu0 }
 0x152   : > { %v2140_v21 = vadd.f32 %v5228_v17, %v6559_v12  ;;  %v2052_v22 = vpop.f32.mrb[3].mxu1  ;;  %v1217_v23 = vadd.f32 %v6559_v12, %v1116_v19 }
 0x153   : > { %1234 = vst.msk [vmem:[%s6566_s15 + $0x8] sm:$0xff] %vm356_vm1, %v1218_v18  ;;  %v2139_v28 = vadd.f32 %v6559_v12, %v2052_v22 }
 0x154   : > { %2169 = vrot.lane.b32.xlu0 %v2137_v20, %s5731_s13  ;;  %2175 = vrot.lane.b32.xlu1 %v2140_v21, %s5731_s13  ;;  %1233 = vst.msk [vmem:[%s6566_s15] sm:$0xff] %vm356_vm1, %v1217_v23  ;;  %v5124_v24 = vpop.f32.mrb[2].mxu0 }
 0x155   : > { %v5231_v25 = vpop.f32.mrb[4].mxu1  ;;  %v1220_v26 = vadd.f32 %v5124_v24, %v6559_v12  ;;  %v1126_v27 = vpop.f32.mrb[3].mxu0 }
 0x156   : > { %v2062_v29 = vpop.f32.mrb[5].mxu1  ;;  %v1219_v30 = vadd.f32 %v6559_v12, %v1126_v27  ;;  %v2142_v36 = vadd.f32 %v5231_v25, %v6559_v12 }
 0x157   : > { %v2141_v31 = vadd.f32 %v6559_v12, %v2062_v29  ;;  %1236 = vst.msk [vmem:[%s6566_s15 + $0x28] sm:$0xff] %vm356_vm1, %v1220_v26 }
 0x158   : > { %2173 = vrot.lane.b32.xlu1 %v2139_v28, %s5731_s13  ;;  %1235 = vst.msk [vmem:[%s6566_s15 + $0x20] sm:$0xff] %vm356_vm1, %v1219_v30  ;;  %v5127_v32 = vpop.f32.mrb[4].mxu0 }
 0x159   : > { %2177 = vrot.lane.b32.xlu0 %v2141_v31, %s5731_s13  ;;  %v5234_v33 = vpop.f32.mrb[6].mxu1  ;;  %v1222_v34 = vadd.f32 %v5127_v32, %v6559_v12  ;;  %v1136_v35 = vpop.f32.mrb[5].mxu0 }
 0x15a   : > { %v2072_v37 = vpop.f32.mrb[7].mxu1  ;;  %v1221_v38 = vadd.f32 %v6559_v12, %v1136_v35  ;;  %v2144_v44 = vadd.f32 %v5234_v33, %v6559_v12 }
 0x15b   : > { %v2143_v39 = vadd.f32 %v6559_v12, %v2072_v37  ;;  %1238 = vst.msk [vmem:[%s6566_s15 + $0x48] sm:$0xff] %vm356_vm1, %v1222_v34 }
 0x15c   : > { %2179 = vrot.lane.b32.xlu1 %v2142_v36, %s5731_s13  ;;  %1237 = vst.msk [vmem:[%s6566_s15 + $0x40] sm:$0xff] %vm356_vm1, %v1221_v38  ;;  %v5130_v40 = vpop.f32.mrb[6].mxu0 }
 0x15d   : > { %2181 = vrot.lane.b32.xlu0 %v2143_v39, %s5731_s13  ;;  %v5237_v41 = vpop.f32.mrb[8].mxu1  ;;  %v1224_v42 = vadd.f32 %v5130_v40, %v6559_v12  ;;  %v1146_v43 = vpop.f32.mrb[7].mxu0 }
 0x15e   : > { %v2082_v45 = vpop.f32.mrb[9].mxu1  ;;  %v1223_v46 = vadd.f32 %v6559_v12, %v1146_v43  ;;  %v2146_v52 = vadd.f32 %v5237_v41, %v6559_v12 }
 0x15f   : > { %v2145_v47 = vadd.f32 %v6559_v12, %v2082_v45  ;;  %1240 = vst.msk [vmem:[%s6566_s15 + $0x68] sm:$0xff] %vm356_vm1, %v1224_v42 }
 0x160   : > { %2183 = vrot.lane.b32.xlu1 %v2144_v44, %s5731_s13  ;;  %1239 = vst.msk [vmem:[%s6566_s15 + $0x60] sm:$0xff] %vm356_vm1, %v1223_v46  ;;  %v5133_v48 = vpop.f32.mrb[8].mxu0 }
 0x161   : > { %2185 = vrot.lane.b32.xlu0 %v2145_v47, %s5731_s13  ;;  %v5240_v49 = vpop.f32.mrb[10].mxu1  ;;  %v1226_v50 = vadd.f32 %v5133_v48, %v6559_v12  ;;  %v1156_v51 = vpop.f32.mrb[9].mxu0 }
 0x162   : > { %v2092_v53 = vpop.f32.mrb[11].mxu1  ;;  %v1225_v54 = vadd.f32 %v6559_v12, %v1156_v51  ;;  %v2148_v60 = vadd.f32 %v5240_v49, %v6559_v12 }
 0x163   : > { %v2147_v55 = vadd.f32 %v6559_v12, %v2092_v53  ;;  %1242 = vst.msk [vmem:[%s6566_s15 + $0x88] sm:$0xff] %vm356_vm1, %v1226_v50 }
 0x164   : > { %2187 = vrot.lane.b32.xlu1 %v2146_v52, %s5731_s13  ;;  %1241 = vst.msk [vmem:[%s6566_s15 + $0x80] sm:$0xff] %vm356_vm1, %v1225_v54  ;;  %v5136_v56 = vpop.f32.mrb[10].mxu0 }
 0x165   : > { %2189 = vrot.lane.b32.xlu0 %v2147_v55, %s5731_s13  ;;  %v5243_v57 = vpop.f32.mrb[12].mxu1  ;;  %v1228_v58 = vadd.f32 %v5136_v56, %v6559_v12  ;;  %v1166_v59 = vpop.f32.mrb[11].mxu0 }
 0x166   : > { %v2102_v61 = vpop.f32.mrb[13].mxu1  ;;  %v1227_v62 = vadd.f32 %v6559_v12, %v1166_v59  ;;  %v2150_v4 = vadd.f32 %v5243_v57, %v6559_v12 }
 0x167   : > { %v2149_v63 = vadd.f32 %v6559_v12, %v2102_v61  ;;  %1244 = vst.msk [vmem:[%s6566_s15 + $0xa8] sm:$0xff] %vm356_vm1, %v1228_v58 }
 0x168   : > { %2191 = vrot.lane.b32.xlu1 %v2148_v60, %s5731_s13  ;;  %1243 = vst.msk [vmem:[%s6566_s15 + $0xa0] sm:$0xff] %vm356_vm1, %v1227_v62  ;;  %v5139_v0 = vpop.f32.mrb[12].mxu0 }
 0x169   : > { %2193 = vrot.lane.b32.xlu0 %v2149_v63, %s5731_s13  ;;  %v5246_v1 = vpop.f32.mrb[14].mxu1  ;;  %v1230_v2 = vadd.f32 %v5139_v0, %v6559_v12  ;;  %v1176_v3 = vpop.f32.mrb[13].mxu0 }
 0x16a   : > { %v2112_v5 = vpop.f32.mrb[15].mxu1  ;;  %v1229_v6 = vadd.f32 %v6559_v12, %v1176_v3  ;;  %v2152_v11 = vadd.f32 %v5246_v1, %v6559_v12 }
 0x16b   : > { %v2151_v7 = vadd.f32 %v6559_v12, %v2112_v5  ;;  %1246 = vst.msk [vmem:[%s6566_s15 + $0xc8] sm:$0xff] %vm356_vm1, %v1230_v2 }
 0x16c   : > { %2195 = vrot.lane.b32.xlu1 %v2150_v4, %s5731_s13  ;;  %1245 = vst.msk [vmem:[%s6566_s15 + $0xc0] sm:$0xff] %vm356_vm1, %v1229_v6  ;;  %v5142_v8 = vpop.f32.mrb[14].mxu0 }
 0x16d   : > { %2197 = vrot.lane.b32.xlu0 %v2151_v7, %s5731_s13  ;;  %v1232_v9 = vadd.f32 %v5142_v8, %v6559_v12  ;;  %v1186_v10 = vpop.f32.mrb[15].mxu0 }
 0x16e   : > { %v1231_v13 = vadd.f32 %v6559_v12, %v1186_v10 }
 0x16f   : > { %1248 = vst.msk [vmem:[%s6566_s15 + $0xe8] sm:$0xff] %vm356_vm1, %v1232_v9 }
 0x170   : > { %2199 = vrot.lane.b32.xlu1 %v2152_v11, %s5731_s13  ;;  %1247 = vst.msk [vmem:[%s6566_s15 + $0xe0] sm:$0xff] %vm356_vm1, %v1231_v13 }
 0x1c2   : > { %v2172_v14 = vpop.permute.xlu0 %2171 }
 0x1c3   : > { %2219 = vst.msk [vmem:[%s6566_s15 + $0x8] sm:$0xff] %vm2217_vm2, %v2172_v14 }
 0x1c6   : > { %v2170_v15 = vpop.permute.xlu0 %2169  ;;  %v2176_v16 = vpop.permute.xlu1 %2175 }
 0x1c7   : > { %2218 = vst.msk [vmem:[%s6566_s15] sm:$0xff] %vm2217_vm2, %v2170_v15  ;;  %2221 = vst.msk [vmem:[%s6566_s15 + $0x28] sm:$0xff] %vm2217_vm2, %v2176_v16 }
 0x1ca   : > { %v2174_v17 = vpop.permute.xlu1 %2173 }
 0x1cb   : > { %2220 = vst.msk [vmem:[%s6566_s15 + $0x20] sm:$0xff] %vm2217_vm2, %v2174_v17  ;;  %v2178_v18 = vpop.permute.xlu0 %2177 }
 0x1cc   : > { %2222 = vst.msk [vmem:[%s6566_s15 + $0x40] sm:$0xff] %vm2217_vm2, %v2178_v18 }
 0x1cd   : > { %v5433_v19 = vpop.f32.mrb[16].mxu1 }
 0x1ce   : > { %v4045_v20 = vadd.f32 %v5433_v19, %v6559_v12  ;;  %v2180_v21 = vpop.permute.xlu1 %2179  ;;  %v3949_v22 = vpop.f32.mrb[17].mxu1 }
 0x1cf   : > { %2223 = vst.msk [vmem:[%s6566_s15 + $0x48] sm:$0xff] %vm2217_vm2, %v2180_v21  ;;  %v4044_v23 = vadd.f32 %v6559_v12, %v3949_v22  ;;  %v2182_v24 = vpop.permute.xlu0 %2181 }
 0x1d0   : > { %2224 = vst.msk [vmem:[%s6566_s15 + $0x60] sm:$0xff] %vm2217_vm2, %v2182_v24  ;;  %4078 = vrot.lane.b32.xlu1 %v4045_v20, %s5731_s13  ;;  %v5329_v25 = vpop.f32.mrb[16].mxu0 }
 0x1d1   : > { %v5436_v26 = vpop.f32.mrb[18].mxu1  ;;  %4076 = vrot.lane.b32.xlu0 %v4044_v23, %s5731_s13  ;;  %v3124_v27 = vadd.f32 %v5329_v25, %v6559_v12  ;;  %v3028_v28 = vpop.f32.mrb[17].mxu0 }
 0x1d2   : > { %v4047_v29 = vadd.f32 %v5436_v26, %v6559_v12  ;;  %v2184_v30 = vpop.permute.xlu1 %2183  ;;  %v3959_v31 = vpop.f32.mrb[19].mxu1  ;;  %v3123_v32 = vadd.f32 %v6559_v12, %v3028_v28 }
 0x1d3   : > { %2225 = vst.msk [vmem:[%s6566_s15 + $0x68] sm:$0xff] %vm2217_vm2, %v2184_v30  ;;  %v4046_v33 = vadd.f32 %v6559_v12, %v3959_v31  ;;  %v2186_v34 = vpop.permute.xlu0 %2185 }
 0x1d4   : > { %4601 = vst.msk [vmem:[%s6566_s15 + $0x18] sm:$0xff] %vm356_vm1, %v3124_v27  ;;  %4082 = vrot.lane.b32.xlu1 %v4047_v29, %s5731_s13  ;;  %4600 = vst.msk [vmem:[%s6566_s15 + $0x10] sm:$0xff] %vm356_vm1, %v3123_v32  ;;  %v5332_v35 = vpop.f32.mrb[18].mxu0 }
 0x1d5   : > { %2226 = vst.msk [vmem:[%s6566_s15 + $0x80] sm:$0xff] %vm2217_vm2, %v2186_v34  ;;  %v5439_v36 = vpop.f32.mrb[20].mxu1  ;;  %4080 = vrot.lane.b32.xlu0 %v4046_v33, %s5731_s13  ;;  %v3126_v37 = vadd.f32 %v5332_v35, %v6559_v12  ;;  %v3038_v38 = vpop.f32.mrb[19].mxu0 }
 0x1d6   : > { %v4049_v39 = vadd.f32 %v5439_v36, %v6559_v12  ;;  %v2188_v40 = vpop.permute.xlu1 %2187  ;;  %v3969_v41 = vpop.f32.mrb[21].mxu1  ;;  %v3125_v42 = vadd.f32 %v6559_v12, %v3038_v38 }
 0x1d7   : > { %2227 = vst.msk [vmem:[%s6566_s15 + $0x88] sm:$0xff] %vm2217_vm2, %v2188_v40  ;;  %v4048_v43 = vadd.f32 %v6559_v12, %v3969_v41  ;;  %v2190_v44 = vpop.permute.xlu0 %2189 }
 0x1d8   : > { %4603 = vst.msk [vmem:[%s6566_s15 + $0x38] sm:$0xff] %vm356_vm1, %v3126_v37  ;;  %4086 = vrot.lane.b32.xlu1 %v4049_v39, %s5731_s13  ;;  %4602 = vst.msk [vmem:[%s6566_s15 + $0x30] sm:$0xff] %vm356_vm1, %v3125_v42  ;;  %v5335_v45 = vpop.f32.mrb[20].mxu0 }
 0x1d9   : > { %2228 = vst.msk [vmem:[%s6566_s15 + $0xa0] sm:$0xff] %vm2217_vm2, %v2190_v44  ;;  %v5442_v46 = vpop.f32.mrb[22].mxu1  ;;  %4084 = vrot.lane.b32.xlu0 %v4048_v43, %s5731_s13  ;;  %v3128_v47 = vadd.f32 %v5335_v45, %v6559_v12  ;;  %v3048_v48 = vpop.f32.mrb[21].mxu0 }
 0x1da   : > { %v4051_v49 = vadd.f32 %v5442_v46, %v6559_v12  ;;  %v2192_v50 = vpop.permute.xlu1 %2191  ;;  %v3979_v51 = vpop.f32.mrb[23].mxu1  ;;  %v3127_v52 = vadd.f32 %v6559_v12, %v3048_v48 }
 0x1db   : > { %2229 = vst.msk [vmem:[%s6566_s15 + $0xa8] sm:$0xff] %vm2217_vm2, %v2192_v50  ;;  %v4050_v53 = vadd.f32 %v6559_v12, %v3979_v51  ;;  %v2194_v54 = vpop.permute.xlu0 %2193 }
 0x1dc   : > { %4605 = vst.msk [vmem:[%s6566_s15 + $0x58] sm:$0xff] %vm356_vm1, %v3128_v47  ;;  %4090 = vrot.lane.b32.xlu1 %v4051_v49, %s5731_s13  ;;  %4604 = vst.msk [vmem:[%s6566_s15 + $0x50] sm:$0xff] %vm356_vm1, %v3127_v52  ;;  %v5338_v55 = vpop.f32.mrb[22].mxu0 }
 0x1dd   : > { %2230 = vst.msk [vmem:[%s6566_s15 + $0xc0] sm:$0xff] %vm2217_vm2, %v2194_v54  ;;  %v5445_v56 = vpop.f32.mrb[24].mxu1  ;;  %4088 = vrot.lane.b32.xlu0 %v4050_v53, %s5731_s13  ;;  %v3130_v57 = vadd.f32 %v5338_v55, %v6559_v12  ;;  %v3058_v58 = vpop.f32.mrb[23].mxu0 }
 0x1de   : > { %v4053_v59 = vadd.f32 %v5445_v56, %v6559_v12  ;;  %v2196_v60 = vpop.permute.xlu1 %2195  ;;  %v3989_v61 = vpop.f32.mrb[25].mxu1  ;;  %v3129_v62 = vadd.f32 %v6559_v12, %v3058_v58 }
 0x1df   : > { %2231 = vst.msk [vmem:[%s6566_s15 + $0xc8] sm:$0xff] %vm2217_vm2, %v2196_v60  ;;  %v4052_v63 = vadd.f32 %v6559_v12, %v3989_v61  ;;  %v2198_v0 = vpop.permute.xlu0 %2197 }
 0x1e0   : > { %4607 = vst.msk [vmem:[%s6566_s15 + $0x78] sm:$0xff] %vm356_vm1, %v3130_v57  ;;  %4094 = vrot.lane.b32.xlu1 %v4053_v59, %s5731_s13  ;;  %4606 = vst.msk [vmem:[%s6566_s15 + $0x70] sm:$0xff] %vm356_vm1, %v3129_v62  ;;  %v5341_v1 = vpop.f32.mrb[24].mxu0 }
 0x1e1   : > { %2232 = vst.msk [vmem:[%s6566_s15 + $0xe0] sm:$0xff] %vm2217_vm2, %v2198_v0  ;;  %v5448_v2 = vpop.f32.mrb[26].mxu1  ;;  %4092 = vrot.lane.b32.xlu0 %v4052_v63, %s5731_s13  ;;  %v3132_v3 = vadd.f32 %v5341_v1, %v6559_v12  ;;  %v3068_v4 = vpop.f32.mrb[25].mxu0 }
 0x1e2   : > { %v4055_v5 = vadd.f32 %v5448_v2, %v6559_v12  ;;  %v2200_v6 = vpop.permute.xlu1 %2199  ;;  %v3999_v7 = vpop.f32.mrb[27].mxu1  ;;  %v3131_v8 = vadd.f32 %v6559_v12, %v3068_v4 }
 0x1e3   : > { %2233 = vst.msk [vmem:[%s6566_s15 + $0xe8] sm:$0xff] %vm2217_vm2, %v2200_v6  ;;  %v4054_v9 = vadd.f32 %v6559_v12, %v3999_v7 }
 0x1e4   : > { %4609 = vst.msk [vmem:[%s6566_s15 + $0x98] sm:$0xff] %vm356_vm1, %v3132_v3  ;;  %4098 = vrot.lane.b32.xlu1 %v4055_v5, %s5731_s13  ;;  %4608 = vst.msk [vmem:[%s6566_s15 + $0x90] sm:$0xff] %vm356_vm1, %v3131_v8  ;;  %v5344_v10 = vpop.f32.mrb[26].mxu0 }
 0x1e5   : > { %v5451_v11 = vpop.f32.mrb[28].mxu1  ;;  %4096 = vrot.lane.b32.xlu0 %v4054_v9, %s5731_s13  ;;  %v3134_v13 = vadd.f32 %v5344_v10, %v6559_v12  ;;  %v3078_v14 = vpop.f32.mrb[27].mxu0 }
 0x1e6   : > { %v4057_v15 = vadd.f32 %v5451_v11, %v6559_v12  ;;  %v4009_v16 = vpop.f32.mrb[29].mxu1  ;;  %v3133_v17 = vadd.f32 %v6559_v12, %v3078_v14 }
 0x1e7   : > { %v4056_v18 = vadd.f32 %v6559_v12, %v4009_v16  ;;  %4611 = vst.msk [vmem:[%s6566_s15 + $0xb8] sm:$0xff] %vm356_vm1, %v3134_v13 }
 0x1e8   : > { %4102 = vrot.lane.b32.xlu1 %v4057_v15, %s5731_s13  ;;  %4610 = vst.msk [vmem:[%s6566_s15 + $0xb0] sm:$0xff] %vm356_vm1, %v3133_v17  ;;  %v5347_v19 = vpop.f32.mrb[28].mxu0 }
 0x1e9   : > { %v5454_v20 = vpop.f32.mrb[30].mxu1  ;;  %4100 = vrot.lane.b32.xlu0 %v4056_v18, %s5731_s13  ;;  %v3136_v21 = vadd.f32 %v5347_v19, %v6559_v12  ;;  %v3088_v22 = vpop.f32.mrb[29].mxu0 }
 0x1ea   : > { %v4059_v23 = vadd.f32 %v5454_v20, %v6559_v12  ;;  %v4019_v24 = vpop.f32.mrb[31].mxu1  ;;  %v3135_v25 = vadd.f32 %v6559_v12, %v3088_v22 }
 0x1eb   : > { %v4058_v26 = vadd.f32 %v6559_v12, %v4019_v24  ;;  %4613 = vst.msk [vmem:[%s6566_s15 + $0xd8] sm:$0xff] %vm356_vm1, %v3136_v21 }
 0x1ec   : > { %4106 = vrot.lane.b32.xlu1 %v4059_v23, %s5731_s13  ;;  %4612 = vst.msk [vmem:[%s6566_s15 + $0xd0] sm:$0xff] %vm356_vm1, %v3135_v25  ;;  %v5350_v27 = vpop.f32.mrb[30].mxu0 }
 0x1ed   : > { %4104 = vrot.lane.b32.xlu0 %v4058_v26, %s5731_s13  ;;  %v3138_v28 = vadd.f32 %v5350_v27, %v6559_v12  ;;  %v3098_v29 = vpop.f32.mrb[31].mxu0 }
 0x1ee   : > { %v3137_v30 = vadd.f32 %v6559_v12, %v3098_v29 }
 0x1ef   : > { %4615 = vst.msk [vmem:[%s6566_s15 + $0xf8] sm:$0xff] %vm356_vm1, %v3138_v28 }
 0x1f0   : > { %4614 = vst.msk [vmem:[%s6566_s15 + $0xf0] sm:$0xff] %vm356_vm1, %v3137_v30 }
 0x242   : > { %v4079_v31 = vpop.permute.xlu1 %4078 }
 0x243   : > { %4741 = vst.msk [vmem:[%s6566_s15 + $0x18] sm:$0xff] %vm2217_vm2, %v4079_v31  ;;  %v4077_v32 = vpop.permute.xlu0 %4076 }
 0x244   : > { %4740 = vst.msk [vmem:[%s6566_s15 + $0x10] sm:$0xff] %vm2217_vm2, %v4077_v32 }
 0x246   : > { %v4083_v33 = vpop.permute.xlu1 %4082 }
 0x247   : > { %4743 = vst.msk [vmem:[%s6566_s15 + $0x38] sm:$0xff] %vm2217_vm2, %v4083_v33  ;;  %v4081_v34 = vpop.permute.xlu0 %4080 }
 0x248   : > { %4742 = vst.msk [vmem:[%s6566_s15 + $0x30] sm:$0xff] %vm2217_vm2, %v4081_v34 }
 0x24a   : > { %v4087_v12 = vpop.permute.xlu1 %4086 }
 0x24b   : > { %4745 = vst.msk [vmem:[%s6566_s15 + $0x58] sm:$0xff] %vm2217_vm2, %v4087_v12  ;;  %v4085_v35 = vpop.permute.xlu0 %4084 }
 0x24c   : > { %4744 = vst.msk [vmem:[%s6566_s15 + $0x50] sm:$0xff] %vm2217_vm2, %v4085_v35 }
 0x24e   : > { %v4091_v36 = vpop.permute.xlu1 %4090 }
 0x24f   : > { %4747 = vst.msk [vmem:[%s6566_s15 + $0x78] sm:$0xff] %vm2217_vm2, %v4091_v36  ;;  %v4089_v37 = vpop.permute.xlu0 %4088 }
 0x250   : > { %4746 = vst.msk [vmem:[%s6566_s15 + $0x70] sm:$0xff] %vm2217_vm2, %v4089_v37 }
 0x252   : > { %v4095_v38 = vpop.permute.xlu1 %4094 }
 0x253   : > { %4749 = vst.msk [vmem:[%s6566_s15 + $0x98] sm:$0xff] %vm2217_vm2, %v4095_v38  ;;  %v4093_v39 = vpop.permute.xlu0 %4092 }
 0x254   : > { %4748 = vst.msk [vmem:[%s6566_s15 + $0x90] sm:$0xff] %vm2217_vm2, %v4093_v39 }
 0x256   : > { %v4099_v40 = vpop.permute.xlu1 %4098 }
 0x257   : > { %4751 = vst.msk [vmem:[%s6566_s15 + $0xb8] sm:$0xff] %vm2217_vm2, %v4099_v40  ;;  %v4097_v41 = vpop.permute.xlu0 %4096 }
 0x258   : > { %4750 = vst.msk [vmem:[%s6566_s15 + $0xb0] sm:$0xff] %vm2217_vm2, %v4097_v41 }
 0x25a   : > { %v4103_v42 = vpop.permute.xlu1 %4102 }
 0x25b   : > { %4753 = vst.msk [vmem:[%s6566_s15 + $0xd8] sm:$0xff] %vm2217_vm2, %v4103_v42  ;;  %v4101_v43 = vpop.permute.xlu0 %4100 }
 0x25c   : > { %4752 = vst.msk [vmem:[%s6566_s15 + $0xd0] sm:$0xff] %vm2217_vm2, %v4101_v43 }
 0x25e   : > { %v4107_v44 = vpop.permute.xlu1 %4106 }
 0x25f   : > { %4755 = vst.msk [vmem:[%s6566_s15 + $0xf8] sm:$0xff] %vm2217_vm2, %v4107_v44  ;;  %v4105_v45 = vpop.permute.xlu0 %4104 }
 0x260   : > { %4754 = vst.msk [vmem:[%s6566_s15 + $0xf0] sm:$0xff] %vm2217_vm2, %v4105_v45 }
 0x261 PF: > { %s14_s19 = sadd.s32 1, %s5729_s19   ;;  %s6810_s15 = smov %s5721_s17 }
 0x262   : > { %p11_p9 = scmp.ge.s32.totalorder %s14_s19, 6   ;;  %s6811_s16 = smov %s5725_s18 }
 0x263   : > { %s6812_s17 = smov %s6815_s20  ;;  %s6813_s18 = smov %s6819_s21 }
 0x264   :  { %13 = sbr.rel (!%p11_p9) target bundleno = 3 (0x3), region = 87 }

// kernel: tpu_custom_call.1
= control target key start
LH: loop header
LB: loop body
LE: loop exit
PB: predicated region body
PF: predicated region fallthrough
CT: control target
= control target key end

     0   :  { %s5757_s15 = smov 0   ;;  %s5759_s16 = smov 0   ;;  %s6805_s0 = inlined_call_operand.vmem [shape: f32[2,18,18,4], index: 0, kind: input, shape index: {}]   ;;  %s6806_s1 = inlined_call_operand.vmem [shape: f32[2,18,18,4], index: 1, kind: input, shape index: {}]   ;;  %s6807_s2 = inlined_call_operand.vmem [shape: f32[2,2,2,2,4,4], index: 2, kind: input, shape index: {}]   ;;  %s6808_s3 = inlined_call_operand.vmem [shape: f32[1,4], index: 3, kind: input, shape index: {}]   ;;  %s6809_s4 = inlined_call_operand.vmem [shape: f32[2,16,2,16,8], index: 4, kind: output, shape index: {}]  }
   0x1   :  { %s5761_s17 = smov 0   ;;  %s5763_s18 = smov 0  }
   0x2   :  { %s5765_s19 = smov 0  }
   0x3 LB: > { %s23_s20 = sadd.s32 1, %s5721_s17  ;;  %s26_s21 = sadd.s32 1, %s5725_s18  ;;  %s5729_s19 = sphi %s5765_s19, %s14_s19   ;;  %s5725_s18 = sphi %s5763_s18, %s6813_s18   ;;  %s5721_s17 = sphi %s5761_s17, %s6812_s17   ;;  %s5717_s16 = sphi %s5759_s16, %s6811_s16   ;;  %s5713_s15 = sphi %s5757_s15, %s6810_s15  }
   0x4   : > { %p24_p0 = scmp.ge.s32.totalorder %s23_s20, 2  ;;  %p4266_p1 = scmp.ge.s32.totalorder %s5729_s19, 1 }
   0x5   : > { %p220_p2 = scmp.lt.s32.totalorder %s5729_s19, 5 }
   0x6   : > { %s6815_s20 = smov (%p24_p0, %s23_s20), 0  ;;  %s6817_s21 = smov (!%p24_p0, %s26_s21), %s5725_s18 }
   0x7   : > { %p221_p3 = pnand %p4266_p1, %p220_p2  ;;  %p28_p4 = scmp.ge.s32.totalorder %s6817_s21, 2 }
   0x8   : > { %vm405_vm0 = vcmask (!%p221_p3), 1043456   ;;  %v4377_v0 = vld [vmem:[%s6807_s2 + $0x14] sm:$0xf] (!%p221_p3)  ;;  %s5790_s24 = sshll.u32 (!%p221_p3), %s5713_s15, 3  ;;  %p279_p5 = scmp.lt.s32.totalorder (!%p221_p3), %s5717_s16, 1  ;;  %vm356_vm1 = vcmask (!%p221_p3), 31744  }
   0x9   : > { %s6819_s21 = smov (%p28_p4, %s6817_s21), 0  ;;  %224 = sbr.rel (%p221_p3) target bundleno = 609 (0x261), region = 36 }
   0xa   : > { %5143 = vmatprep.subr.msk.mxu1 (!%p221_p3), %vm405_vm0, %v4377_v0  ;;  %p281_p6 = scmp.lt.s32.totalorder (!%p221_p3), %s5790_s24, 17  ;;  %v4376_v1 = vld [vmem:[%s6807_s2 + $0x10] sm:$0xf] (!%p221_p3)  ;;  %v4276_v2 = vld [vmem:[%s6807_s2 + $0x4] sm:$0xf] (!%p221_p3)  ;;  %s4766_s28 = sadd.s32 (!%p221_p3), 8, %s5790_s24 }
   0xb   : > { %5144 = vmatpush3.msk.msra.mxu1 (!%p221_p3), %vm405_vm0, %v4377_v0  ;;  %5039 = vmatprep.subr.msk.mxu0 (!%p221_p3), %vm405_vm0, %v4276_v2  ;;  %v337_v3 = vld [vmem:[%s6807_s2] sm:$0xf] (!%p221_p3)  ;;  %v5828_v7 = vld [vmem:[%s6807_s2 + $0x18] sm:$0xf] (!%p221_p3)  ;;  %v5855_v13 = vld [vmem:[%s6807_s2 + $0x8] sm:$0xf] (!%p221_p3) }
   0xc   : > { %5169 = vmatprep.subr.msk.mxu1 (!%p221_p3), %vm405_vm0, %v4376_v1  ;;  %5040 = vmatpush3.msk.msra.mxu0 (!%p221_p3), %vm405_vm0, %v4276_v2  ;;  %v4458_v39 = vld [vmem:[%s6807_s2 + $0x1c] sm:$0xf] (!%p221_p3)  ;;  %v4357_v42 = vld [vmem:[%s6807_s2 + $0xc] sm:$0xf] (!%p221_p3)  ;;  %v4645_v56 = vld [vmem:[%s6807_s2 + $0x34] sm:$0xf] (!%p221_p3) }
   0xd   : > { %5065 = vmatprep.subr.msk.mxu0 (!%p221_p3), %vm405_vm0, %v337_v3  ;;  %p299_p7 = scmp.lt.s32.totalorder (!%p221_p3), %s4766_s28, 17  ;;  %v4505_v57 = vld [vmem:[%s6807_s2 + $0x24] sm:$0xf] (!%p221_p3)  ;;  %v4630_v62 = vld [vmem:[%s6807_s2 + $0x30] sm:$0xf] (!%p221_p3)  ;;  %p312_p8 = scmp.lt.s32.totalorder (!%p221_p3), %s5790_s24, 15 }
   0xe   : > { %v4490_v63 = vld [vmem:[%s6807_s2 + $0x20] sm:$0xf] (!%p221_p3)  ;;  %v4692_v2 = vld [vmem:[%s6807_s2 + $0x38] sm:$0xf] (!%p221_p3)  ;;  %vm2217_vm2 = vcmask (!%p221_p3), 64544  }
  0x10   : > { %s6821_s16 = smov (!%p279_p5, %s5717_s16), 1  ;;  %s6823_s28 = smov (!%p299_p7, %s4766_s28), 17 }
  0x11   : > { %s282_s5 = scalar_select %p281_p6, %s5790_s24, 17 }
  0x12   : > { %s5648_s6 = smul.u32 54, %s6821_s16  ;;  %s6825_s24 = smov (!%p312_p8, %s5790_s24), 15 }
  0x13   : > { %s5647_s7 = smul.u32 3, %s282_s5 }
  0x15   : > { %s285_s8 = sadd.s32 %s5648_s6, %s5647_s7  ;;  %s4273_s7 = sshll.u32 %s6825_s24, 2 }
  0x16   : > { %s4268_s9 = sshll.u32 %s285_s8, 3  ;;  %s5649_s8 = smul.u32 3, %s6823_s28 }
  0x17   : > { %s5817_s12 = scalar_lea.vmem %s6805_s0, %s4268_s9 }
  0x18   : > { %v1267_v4 = vld [vmem:[%s5817_s12 + $0x2] sm:$0xff]  ;;  %v1268_v5 = vld [vmem:[%s5817_s12 + $0xa] sm:$0xff]  ;;  %v5822_v6 = vld [vmem:[%s5817_s12 + $0x1a] sm:$0xff]  ;;  %s303_s9 = sadd.s32 %s5649_s8, %s5648_s6  ;;  %s4274_s8 = sshll.u32 %s6821_s16, 6 }
  0x19   : > { %5145 = vmatprep.mubr.msk.f32.mxu1 %vm356_vm1, %v1267_v4  ;;  %v5835_v8 = vld [vmem:[%s5817_s12 + $0x22] sm:$0xff]  ;;  %v5842_v11 = vld [vmem:[%s5817_s12 + $0x32] sm:$0xff]  ;;  %v5867_v15 = vld [vmem:[%s5817_s12 + $0x3a] sm:$0xff]  ;;  %s4271_s10 = sshll.u32 %s303_s9, 3  ;;  %s316_s9 = sadd.s32 %s4274_s8, %s4273_s7 }
  0x1a   : > { %5146 = vmatmul.mubr.msk.f32.vlgmr.msra.gmra.mrb[0].mxu1 %vm356_vm1, %v1268_v5  ;;  %v338_v9 = vld [vmem:[%s5817_s12 + $0x1] sm:$0xff]  ;;  %v5839_v10 = vld [vmem:[%s5817_s12 + $0x9] sm:$0xff]  ;;  %v5846_v12 = vld [vmem:[%s5817_s12 + $0x19] sm:$0xff]  ;;  %s6159_s13 = scalar_lea.vmem %s6806_s1, %s4271_s10 }
  0x1b   : > { %5170 = vmatpush3.msk.msra.mxu1 %vm405_vm0, %v4376_v1  ;;  %5148 = vmatprep.mubr.msk.f32.mxu1 %vm356_vm1, %v5822_v6  ;;  %v5862_v14 = vld [vmem:[%s5817_s12 + $0x21] sm:$0xff]  ;;  %v5870_v16 = vld [vmem:[%s5817_s12 + $0x31] sm:$0xff]  ;;  %v5885_v18 = vld [vmem:[%s5817_s12 + $0x39] sm:$0xff] }
  0x1c   : > { %5041 = vmatprep.mubr.msk.f32.mxu0 %vm356_vm1, %v338_v9  ;;  %5195 = vmatprep.subr.msk.mxu1 %vm405_vm0, %v5828_v7  ;;  %v5874_v17 = vld [vmem:[%s5817_s12 + $0x4a] sm:$0xff]  ;;  %v5890_v19 = vld [vmem:[%s5817_s12 + $0x52] sm:$0xff]  ;;  %v5896_v21 = vld [vmem:[%s5817_s12 + $0x62] sm:$0xff] }
  0x1d   : > { %5042 = vmatmul.mubr.msk.f32.vlgmr.msra.gmra.mrb[0].mxu0 %vm356_vm1, %v5839_v10  ;;  %v5893_v20 = vld [vmem:[%s5817_s12 + $0x49] sm:$0xff]  ;;  %v5905_v22 = vld [vmem:[%s5817_s12 + $0x51] sm:$0xff]  ;;  %v5913_v24 = vld [vmem:[%s5817_s12 + $0x61] sm:$0xff] }
  0x1e   : > { %5149 = vmatmul.mubr.msk.f32.gmra.mrb[2].mxu1 %vm356_vm1, %v5835_v8  ;;  %5044 = vmatprep.mubr.msk.f32.mxu0 %vm356_vm1, %v5846_v12  ;;  %v5910_v23 = vld [vmem:[%s5817_s12 + $0x6a] sm:$0xff]  ;;  %v5916_v25 = vld [vmem:[%s5817_s12 + $0x7a] sm:$0xff]  ;;  %v5930_v27 = vld [vmem:[%s5817_s12 + $0x82] sm:$0xff] }
  0x1f   : > { %5151 = vmatprep.mubr.msk.f32.mxu1 %vm356_vm1, %v5842_v11  ;;  %5066 = vmatpush3.msk.msra.mxu0 %vm405_vm0, %v337_v3  ;;  %v5925_v26 = vld [vmem:[%s5817_s12 + $0x69] sm:$0xff]  ;;  %v5933_v28 = vld [vmem:[%s5817_s12 + $0x79] sm:$0xff]  ;;  %v5945_v30 = vld [vmem:[%s5817_s12 + $0x81] sm:$0xff] }
  0x20   : > { %5091 = vmatprep.subr.msk.mxu0 %vm405_vm0, %v5855_v13  ;;  %v5936_v29 = vld [vmem:[%s5817_s12 + $0x92] sm:$0xff]  ;;  %v5950_v31 = vld [vmem:[%s5817_s12 + $0x9a] sm:$0xff]  ;;  %v5956_v33 = vld [vmem:[%s5817_s12 + $0xaa] sm:$0xff] }
  0x21   : > { %5045 = vmatmul.mubr.msk.f32.gmra.mrb[2].mxu0 %vm356_vm1, %v5862_v14  ;;  %v5953_v32 = vld [vmem:[%s5817_s12 + $0x91] sm:$0xff]  ;;  %v5965_v34 = vld [vmem:[%s5817_s12 + $0x99] sm:$0xff]  ;;  %v5973_v36 = vld [vmem:[%s5817_s12 + $0xa9] sm:$0xff] }
  0x22   : > { %5152 = vmatmul.mubr.msk.f32.gmra.mrb[4].mxu1 %vm356_vm1, %v5867_v15  ;;  %5047 = vmatprep.mubr.msk.f32.mxu0 %vm356_vm1, %v5870_v16  ;;  %v5970_v35 = vld [vmem:[%s5817_s12 + $0xb2] sm:$0xff]  ;;  %v321_v38 = vld [vmem:[%s5817_s12] sm:$0xff]  ;;  %v322_v40 = vld [vmem:[%s5817_s12 + $0x8] sm:$0xff] }
  0x23   : > { %5154 = vmatprep.mubr.msk.f32.mxu1 %vm356_vm1, %v5874_v17  ;;  %v5982_v37 = vld [vmem:[%s5817_s12 + $0xb1] sm:$0xff]  ;;  %v6012_v43 = vld [vmem:[%s5817_s12 + $0x20] sm:$0xff]  ;;  %v6034_v46 = vld [vmem:[%s5817_s12 + $0x48] sm:$0xff] }
  0x24   : > { %v6000_v41 = vld [vmem:[%s5817_s12 + $0x18] sm:$0xff]  ;;  %v6017_v44 = vld [vmem:[%s5817_s12 + $0x30] sm:$0xff]  ;;  %v6048_v48 = vld [vmem:[%s5817_s12 + $0x60] sm:$0xff] }
  0x25   : > { %5048 = vmatmul.mubr.msk.f32.gmra.mrb[4].mxu0 %vm356_vm1, %v5885_v18  ;;  %v6029_v45 = vld [vmem:[%s5817_s12 + $0x38] sm:$0xff]  ;;  %v6043_v47 = vld [vmem:[%s5817_s12 + $0x50] sm:$0xff]  ;;  %v6057_v49 = vld [vmem:[%s5817_s12 + $0x68] sm:$0xff] }
  0x26   : > { %5155 = vmatmul.mubr.msk.f32.gmra.mrb[6].mxu1 %vm356_vm1, %v5890_v19  ;;  %5050 = vmatprep.mubr.msk.f32.mxu0 %vm356_vm1, %v5893_v20  ;;  %v6062_v50 = vld [vmem:[%s5817_s12 + $0x78] sm:$0xff]  ;;  %v6071_v51 = vld [vmem:[%s5817_s12 + $0x80] sm:$0xff]  ;;  %v6076_v52 = vld [vmem:[%s5817_s12 + $0x90] sm:$0xff] }
  0x27   : > { %5157 = vmatprep.mubr.msk.f32.mxu1 %vm356_vm1, %v5896_v21  ;;  %v6085_v53 = vld [vmem:[%s5817_s12 + $0x98] sm:$0xff]  ;;  %v6090_v54 = vld [vmem:[%s5817_s12 + $0xa8] sm:$0xff]  ;;  %v6099_v55 = vld [vmem:[%s5817_s12 + $0xb0] sm:$0xff]  ;;  %s4275_s12 = sshll.u32 %s316_s9, 3 }
  0x28   : > { %v6170_v58 = vld [vmem:[%s6159_s13 + $0x1] sm:$0xff]  ;;  %v6181_v59 = vld [vmem:[%s6159_s13 + $0x9] sm:$0xff]  ;;  %v4722_v4 = vld [vmem:[%s6807_s2 + $0x3c] sm:$0xf]  ;;  %s6566_s15 = scalar_lea.vmem %s6809_s4, %s4275_s12 }
  0x29   : > { %5051 = vmatmul.mubr.msk.f32.gmra.mrb[6].mxu0 %vm356_vm1, %v5905_v22  ;;  %v6184_v60 = vld [vmem:[%s6159_s13] sm:$0xff]  ;;  %v6193_v61 = vld [vmem:[%s6159_s13 + $0x8] sm:$0xff] }
  0x2a   : > { %5158 = vmatmul.mubr.msk.f32.gmra.mrb[8].mxu1 %vm356_vm1, %v5910_v23  ;;  %5053 = vmatprep.mubr.msk.f32.mxu0 %vm356_vm1, %v5913_v24  ;;  %v6256_v0 = vld [vmem:[%s6159_s13 + $0x2] sm:$0xff]  ;;  %v6267_v1 = vld [vmem:[%s6159_s13 + $0xa] sm:$0xff] }
  0x2b   : > { %5160 = vmatprep.mubr.msk.f32.mxu1 %vm356_vm1, %v5916_v25  ;;  %v4552_v3 = vld [vmem:[%s6807_s2 + $0x28] sm:$0xf]  ;;  %v4582_v5 = vld [vmem:[%s6807_s2 + $0x2c] sm:$0xf] }
  0x2d   : > { %5054 = vmatmul.mubr.msk.f32.gmra.mrb[8].mxu0 %vm356_vm1, %v5925_v26 }
  0x2e   : > { %5161 = vmatmul.mubr.msk.f32.gmra.mrb[10].mxu1 %vm356_vm1, %v5930_v27  ;;  %5056 = vmatprep.mubr.msk.f32.mxu0 %vm356_vm1, %v5933_v28 }
  0x2f   : > { %5163 = vmatprep.mubr.msk.f32.mxu1 %vm356_vm1, %v5936_v29 }
  0x31   : > { %5057 = vmatmul.mubr.msk.f32.gmra.mrb[10].mxu0 %vm356_vm1, %v5945_v30 }
  0x32   : > { %5164 = vmatmul.mubr.msk.f32.gmra.mrb[12].mxu1 %vm356_vm1, %v5950_v31  ;;  %5059 = vmatprep.mubr.msk.f32.mxu0 %vm356_vm1, %v5953_v32 }
  0x33   : > { %5166 = vmatprep.mubr.msk.f32.mxu1 %vm356_vm1, %v5956_v33 }
  0x35   : > { %5060 = vmatmul.mubr.msk.f32.gmra.mrb[12].mxu0 %vm356_vm1, %v5965_v34 }
  0x36   : > { %5167 = vmatmul.mubr.msk.f32.gmra.mrb[14].mxu1 %vm356_vm1, %v5970_v35  ;;  %5062 = vmatprep.mubr.msk.f32.mxu0 %vm356_vm1, %v5973_v36 }
  0x37   : > { %5171 = vmatprep.mubr.msk.f32.mxu1 %vm356_vm1, %v338_v9  ;;  %v2678_v9 = vld [vmem:[%s6159_s13 + $0x20] sm:$0xff] }
  0x39   : > { %5063 = vmatmul.mubr.msk.f32.gmra.mrb[14].mxu0 %vm356_vm1, %v5982_v37 }
  0x3a   : > { %5172 = vmatmul.mubr.msk.f32.vlgmr.msra.gmra.mrb[0].mxu1 %vm356_vm1, %v5839_v10  ;;  %5067 = vmatprep.mubr.msk.f32.mxu0 %vm356_vm1, %v321_v38  ;;  %v3828_v10 = vld [vmem:[%s6159_s13 + $0x1a] sm:$0xff] }
  0x3b   : > { %5196 = vmatpush3.msk.msra.mxu1 %vm405_vm0, %v5828_v7  ;;  %5174 = vmatprep.mubr.msk.f32.mxu1 %vm356_vm1, %v5846_v12  ;;  %v3599_v7 = vld [vmem:[%s6159_s13 + $0x21] sm:$0xff] }
  0x3c   : > { %5221 = vmatprep.subr.msk.mxu1 %vm405_vm0, %v4458_v39 }
  0x3d   : > { %5068 = vmatmul.mubr.msk.f32.vlgmr.msra.gmra.mrb[0].mxu0 %vm356_vm1, %v322_v40 }
  0x3e   : > { %5175 = vmatmul.mubr.msk.f32.gmra.mrb[2].mxu1 %vm356_vm1, %v5862_v14  ;;  %5070 = vmatprep.mubr.msk.f32.mxu0 %vm356_vm1, %v6000_v41 }
  0x3f   : > { %5177 = vmatprep.mubr.msk.f32.mxu1 %vm356_vm1, %v5870_v16  ;;  %5092 = vmatpush3.msk.msra.mxu0 %vm405_vm0, %v5855_v13 }
  0x40   : > { %5117 = vmatprep.subr.msk.mxu0 %vm405_vm0, %v4357_v42 }
  0x41   : > { %5071 = vmatmul.mubr.msk.f32.gmra.mrb[2].mxu0 %vm356_vm1, %v6012_v43 }
  0x42   : > { %5178 = vmatmul.mubr.msk.f32.gmra.mrb[4].mxu1 %vm356_vm1, %v5885_v18  ;;  %5073 = vmatprep.mubr.msk.f32.mxu0 %vm356_vm1, %v6017_v44 }
  0x43   : > { %5180 = vmatprep.mubr.msk.f32.mxu1 %vm356_vm1, %v5893_v20 }
  0x45   : > { %5074 = vmatmul.mubr.msk.f32.gmra.mrb[4].mxu0 %vm356_vm1, %v6029_v45 }
  0x46   : > { %5181 = vmatmul.mubr.msk.f32.gmra.mrb[6].mxu1 %vm356_vm1, %v5905_v22  ;;  %5076 = vmatprep.mubr.msk.f32.mxu0 %vm356_vm1, %v6034_v46 }
  0x47   : > { %5183 = vmatprep.mubr.msk.f32.mxu1 %vm356_vm1, %v5913_v24 }
  0x49   : > { %5077 = vmatmul.mubr.msk.f32.gmra.mrb[6].mxu0 %vm356_vm1, %v6043_v47 }
  0x4a   : > { %5184 = vmatmul.mubr.msk.f32.gmra.mrb[8].mxu1 %vm356_vm1, %v5925_v26  ;;  %5079 = vmatprep.mubr.msk.f32.mxu0 %vm356_vm1, %v6048_v48 }
  0x4b   : > { %5186 = vmatprep.mubr.msk.f32.mxu1 %vm356_vm1, %v5933_v28 }
  0x4d   : > { %5080 = vmatmul.mubr.msk.f32.gmra.mrb[8].mxu0 %vm356_vm1, %v6057_v49 }
  0x4e   : > { %5187 = vmatmul.mubr.msk.f32.gmra.mrb[10].mxu1 %vm356_vm1, %v5945_v30  ;;  %5082 = vmatprep.mubr.msk.f32.mxu0 %vm356_vm1, %v6062_v50 }
  0x4f   : > { %5189 = vmatprep.mubr.msk.f32.mxu1 %vm356_vm1, %v5953_v32 }
  0x51   : > { %5083 = vmatmul.mubr.msk.f32.gmra.mrb[10].mxu0 %vm356_vm1, %v6071_v51 }
  0x52   : > { %5190 = vmatmul.mubr.msk.f32.gmra.mrb[12].mxu1 %vm356_vm1, %v5965_v34  ;;  %5085 = vmatprep.mubr.msk.f32.mxu0 %vm356_vm1, %v6076_v52 }
  0x53   : > { %5192 = vmatprep.mubr.msk.f32.mxu1 %vm356_vm1, %v5973_v36 }
  0x55   : > { %5086 = vmatmul.mubr.msk.f32.gmra.mrb[12].mxu0 %vm356_vm1, %v6085_v53 }
  0x56   : > { %5193 = vmatmul.mubr.msk.f32.gmra.mrb[14].mxu1 %vm356_vm1, %v5982_v37  ;;  %5088 = vmatprep.mubr.msk.f32.mxu0 %vm356_vm1, %v6090_v54 }
  0x57   : > { %5197 = vmatprep.mubr.msk.f32.mxu1 %vm356_vm1, %v5846_v12 }
  0x59   : > { %5089 = vmatmul.mubr.msk.f32.gmra.mrb[14].mxu0 %vm356_vm1, %v6099_v55 }
  0x5a   : > { %5198 = vmatmul.mubr.msk.f32.vlgmr.msra.gmra.mrb[0].mxu1 %vm356_vm1, %v5862_v14  ;;  %5093 = vmatprep.mubr.msk.f32.mxu0 %vm356_vm1, %v6000_v41 }
  0x5b   : > { %5222 = vmatpush3.msk.msra.mxu1 %vm405_vm0, %v4458_v39  ;;  %5200 = vmatprep.mubr.msk.f32.mxu1 %vm356_vm1, %v5870_v16 }
  0x5c   : > { %5351 = vmatprep.subr.msk.mxu1 %vm405_vm0, %v4645_v56 }
  0x5d   : > { %5094 = vmatmul.mubr.msk.f32.vlgmr.msra.gmra.mrb[0].mxu0 %vm356_vm1, %v6012_v43 }
  0x5e   : > { %5201 = vmatmul.mubr.msk.f32.gmra.mrb[2].mxu1 %vm356_vm1, %v5885_v18  ;;  %5096 = vmatprep.mubr.msk.f32.mxu0 %vm356_vm1, %v6017_v44 }
  0x5f   : > { %5203 = vmatprep.mubr.msk.f32.mxu1 %vm356_vm1, %v5893_v20  ;;  %5118 = vmatpush3.msk.msra.mxu0 %vm405_vm0, %v4357_v42 }
  0x60   : > { %5247 = vmatprep.subr.msk.mxu0 %vm405_vm0, %v4505_v57 }
  0x61   : > { %5097 = vmatmul.mubr.msk.f32.gmra.mrb[2].mxu0 %vm356_vm1, %v6029_v45 }
  0x62   : > { %5204 = vmatmul.mubr.msk.f32.gmra.mrb[4].mxu1 %vm356_vm1, %v5905_v22  ;;  %5099 = vmatprep.mubr.msk.f32.mxu0 %vm356_vm1, %v6034_v46 }
  0x63   : > { %5206 = vmatprep.mubr.msk.f32.mxu1 %vm356_vm1, %v5913_v24 }
  0x65   : > { %5100 = vmatmul.mubr.msk.f32.gmra.mrb[4].mxu0 %vm356_vm1, %v6043_v47 }
  0x66   : > { %5207 = vmatmul.mubr.msk.f32.gmra.mrb[6].mxu1 %vm356_vm1, %v5925_v26  ;;  %5102 = vmatprep.mubr.msk.f32.mxu0 %vm356_vm1, %v6048_v48 }
  0x67   : > { %5209 = vmatprep.mubr.msk.f32.mxu1 %vm356_vm1, %v5933_v28 }
  0x69   : > { %5103 = vmatmul.mubr.msk.f32.gmra.mrb[6].mxu0 %vm356_vm1, %v6057_v49 }
  0x6a   : > { %5210 = vmatmul.mubr.msk.f32.gmra.mrb[8].mxu1 %vm356_vm1, %v5945_v30  ;;  %5105 = vmatprep.mubr.msk.f32.mxu0 %vm356_vm1, %v6062_v50 }
  0x6b   : > { %5212 = vmatprep.mubr.msk.f32.mxu1 %vm356_vm1, %v5953_v32 }
  0x6d   : > { %5106 = vmatmul.mubr.msk.f32.gmra.mrb[8].mxu0 %vm356_vm1, %v6071_v51 }
  0x6e   : > { %5213 = vmatmul.mubr.msk.f32.gmra.mrb[10].mxu1 %vm356_vm1, %v5965_v34  ;;  %5108 = vmatprep.mubr.msk.f32.mxu0 %vm356_vm1, %v6076_v52 }
  0x6f   : > { %5215 = vmatprep.mubr.msk.f32.mxu1 %vm356_vm1, %v5973_v36 }
  0x71   : > { %5109 = vmatmul.mubr.msk.f32.gmra.mrb[10].mxu0 %vm356_vm1, %v6085_v53 }
  0x72   : > { %5216 = vmatmul.mubr.msk.f32.gmra.mrb[12].mxu1 %vm356_vm1, %v5982_v37  ;;  %5111 = vmatprep.mubr.msk.f32.mxu0 %vm356_vm1, %v6090_v54 }
  0x73   : > { %5218 = vmatprep.mubr.msk.f32.mxu1 %vm356_vm1, %v6170_v58 }
  0x75   : > { %5112 = vmatmul.mubr.msk.f32.gmra.mrb[12].mxu0 %vm356_vm1, %v6099_v55 }
  0x76   : > { %5219 = vmatmul.mubr.msk.f32.gmra.mrb[14].mxu1 %vm356_vm1, %v6181_v59  ;;  %5114 = vmatprep.mubr.msk.f32.mxu0 %vm356_vm1, %v6184_v60 }
  0x77   : > { %5223 = vmatprep.mubr.msk.f32.mxu1 %vm356_vm1, %v5822_v6 }
  0x79   : > { %5115 = vmatmul.mubr.msk.f32.gmra.mrb[14].mxu0 %vm356_vm1, %v6193_v61 }
  0x7a   : > { %5224 = vmatmul.mubr.msk.f32.vlgmr.msra.gmra.mrb[0].mxu1 %vm356_vm1, %v5835_v8  ;;  %5119 = vmatprep.mubr.msk.f32.mxu0 %vm356_vm1, %v5846_v12 }
  0x7b   : > { %5352 = vmatpush3.msk.msra.mxu1 %vm405_vm0, %v4645_v56  ;;  %5226 = vmatprep.mubr.msk.f32.mxu1 %vm356_vm1, %v5842_v11 }
  0x7c   : > { %5377 = vmatprep.subr.msk.mxu1 %vm405_vm0, %v4630_v62 }
  0x7d   : > { %5120 = vmatmul.mubr.msk.f32.vlgmr.msra.gmra.mrb[0].mxu0 %vm356_vm1, %v5862_v14 }
  0x7e   : > { %5227 = vmatmul.mubr.msk.f32.gmra.mrb[2].mxu1 %vm356_vm1, %v5867_v15  ;;  %5122 = vmatprep.mubr.msk.f32.mxu0 %vm356_vm1, %v5870_v16 }
  0x7f   : > { %5229 = vmatprep.mubr.msk.f32.mxu1 %vm356_vm1, %v5874_v17  ;;  %5248 = vmatpush3.msk.msra.mxu0 %vm405_vm0, %v4505_v57 }
  0x80   : > { %5273 = vmatprep.subr.msk.mxu0 %vm405_vm0, %v4490_v63 }
  0x81   : > { %5123 = vmatmul.mubr.msk.f32.gmra.mrb[2].mxu0 %vm356_vm1, %v5885_v18 }
  0x82   : > { %5230 = vmatmul.mubr.msk.f32.gmra.mrb[4].mxu1 %vm356_vm1, %v5890_v19  ;;  %5125 = vmatprep.mubr.msk.f32.mxu0 %vm356_vm1, %v5893_v20 }
  0x83   : > { %5232 = vmatprep.mubr.msk.f32.mxu1 %vm356_vm1, %v5896_v21 }
  0x85   : > { %5126 = vmatmul.mubr.msk.f32.gmra.mrb[4].mxu0 %vm356_vm1, %v5905_v22 }
  0x86   : > { %5233 = vmatmul.mubr.msk.f32.gmra.mrb[6].mxu1 %vm356_vm1, %v5910_v23  ;;  %5128 = vmatprep.mubr.msk.f32.mxu0 %vm356_vm1, %v5913_v24 }
  0x87   : > { %5235 = vmatprep.mubr.msk.f32.mxu1 %vm356_vm1, %v5916_v25 }
  0x89   : > { %5129 = vmatmul.mubr.msk.f32.gmra.mrb[6].mxu0 %vm356_vm1, %v5925_v26 }
  0x8a   : > { %5236 = vmatmul.mubr.msk.f32.gmra.mrb[8].mxu1 %vm356_vm1, %v5930_v27  ;;  %5131 = vmatprep.mubr.msk.f32.mxu0 %vm356_vm1, %v5933_v28 }
  0x8b   : > { %5238 = vmatprep.mubr.msk.f32.mxu1 %vm356_vm1, %v5936_v29 }
  0x8d   : > { %5132 = vmatmul.mubr.msk.f32.gmra.mrb[8].mxu0 %vm356_vm1, %v5945_v30 }
  0x8e   : > { %5239 = vmatmul.mubr.msk.f32.gmra.mrb[10].mxu1 %vm356_vm1, %v5950_v31  ;;  %5134 = vmatprep.mubr.msk.f32.mxu0 %vm356_vm1, %v5953_v32 }
  0x8f   : > { %5241 = vmatprep.mubr.msk.f32.mxu1 %vm356_vm1, %v5956_v33 }
  0x91   : > { %5135 = vmatmul.mubr.msk.f32.gmra.mrb[10].mxu0 %vm356_vm1, %v5965_v34 }
  0x92   : > { %5242 = vmatmul.mubr.msk.f32.gmra.mrb[12].mxu1 %vm356_vm1, %v5970_v35  ;;  %5137 = vmatprep.mubr.msk.f32.mxu0 %vm356_vm1, %v5973_v36 }
  0x93   : > { %5244 = vmatprep.mubr.msk.f32.mxu1 %vm356_vm1, %v6256_v0 }
  0x95   : > { %5138 = vmatmul.mubr.msk.f32.gmra.mrb[12].mxu0 %vm356_vm1, %v5982_v37 }
  0x96   : > { %5245 = vmatmul.mubr.msk.f32.gmra.mrb[14].mxu1 %vm356_vm1, %v6267_v1  ;;  %5140 = vmatprep.mubr.msk.f32.mxu0 %vm356_vm1, %v6170_v58 }
  0x97   : > { %5353 = vmatprep.mubr.msk.f32.mxu1 %vm356_vm1, %v5822_v6  ;;  %v3598_v6 = vld [vmem:[%s6159_s13 + $0x19] sm:$0xff] }
  0x99   : > { %5141 = vmatmul.mubr.msk.f32.gmra.mrb[14].mxu0 %vm356_vm1, %v6181_v59 }
  0x9a   : > { %5354 = vmatmul.mubr.msk.f32.vlgmr.msra.gmra.mrb[16].mxu1 %vm356_vm1, %v5835_v8  ;;  %5249 = vmatprep.mubr.msk.f32.mxu0 %vm356_vm1, %v5846_v12  ;;  %v2677_v8 = vld [vmem:[%s6159_s13 + $0x18] sm:$0xff] }
  0x9b   : > { %5378 = vmatpush3.msk.msra.mxu1 %vm405_vm0, %v4630_v62  ;;  %5356 = vmatprep.mubr.msk.f32.mxu1 %vm356_vm1, %v5842_v11 }
  0x9c   : > { %5403 = vmatprep.subr.msk.mxu1 %vm405_vm0, %v4692_v2 }
  0x9d   : > { %5250 = vmatmul.mubr.msk.f32.vlgmr.msra.gmra.mrb[16].mxu0 %vm356_vm1, %v5862_v14 }
  0x9e   : > { %5357 = vmatmul.mubr.msk.f32.gmra.mrb[18].mxu1 %vm356_vm1, %v5867_v15  ;;  %5252 = vmatprep.mubr.msk.f32.mxu0 %vm356_vm1, %v5870_v16 }
  0x9f   : > { %5359 = vmatprep.mubr.msk.f32.mxu1 %vm356_vm1, %v5874_v17  ;;  %5274 = vmatpush3.msk.msra.mxu0 %vm405_vm0, %v4490_v63 }
  0xa0   : > { %5299 = vmatprep.subr.msk.mxu0 %vm405_vm0, %v4552_v3 }
  0xa1   : > { %5253 = vmatmul.mubr.msk.f32.gmra.mrb[18].mxu0 %vm356_vm1, %v5885_v18 }
  0xa2   : > { %5360 = vmatmul.mubr.msk.f32.gmra.mrb[20].mxu1 %vm356_vm1, %v5890_v19  ;;  %5255 = vmatprep.mubr.msk.f32.mxu0 %vm356_vm1, %v5893_v20 }
  0xa3   : > { %5362 = vmatprep.mubr.msk.f32.mxu1 %vm356_vm1, %v5896_v21 }
  0xa5   : > { %5256 = vmatmul.mubr.msk.f32.gmra.mrb[20].mxu0 %vm356_vm1, %v5905_v22 }
  0xa6   : > { %5363 = vmatmul.mubr.msk.f32.gmra.mrb[22].mxu1 %vm356_vm1, %v5910_v23  ;;  %5258 = vmatprep.mubr.msk.f32.mxu0 %vm356_vm1, %v5913_v24 }
  0xa7   : > { %5365 = vmatprep.mubr.msk.f32.mxu1 %vm356_vm1, %v5916_v25 }
  0xa9   : > { %5259 = vmatmul.mubr.msk.f32.gmra.mrb[22].mxu0 %vm356_vm1, %v5925_v26 }
  0xaa   : > { %5366 = vmatmul.mubr.msk.f32.gmra.mrb[24].mxu1 %vm356_vm1, %v5930_v27  ;;  %5261 = vmatprep.mubr.msk.f32.mxu0 %vm356_vm1, %v5933_v28 }
  0xab   : > { %5368 = vmatprep.mubr.msk.f32.mxu1 %vm356_vm1, %v5936_v29 }
  0xad   : > { %5262 = vmatmul.mubr.msk.f32.gmra.mrb[24].mxu0 %vm356_vm1, %v5945_v30 }
  0xae   : > { %5369 = vmatmul.mubr.msk.f32.gmra.mrb[26].mxu1 %vm356_vm1, %v5950_v31  ;;  %5264 = vmatprep.mubr.msk.f32.mxu0 %vm356_vm1, %v5953_v32 }
  0xaf   : > { %5371 = vmatprep.mubr.msk.f32.mxu1 %vm356_vm1, %v5956_v33 }
  0xb1   : > { %5265 = vmatmul.mubr.msk.f32.gmra.mrb[26].mxu0 %vm356_vm1, %v5965_v34 }
  0xb2   : > { %5372 = vmatmul.mubr.msk.f32.gmra.mrb[28].mxu1 %vm356_vm1, %v5970_v35  ;;  %5267 = vmatprep.mubr.msk.f32.mxu0 %vm356_vm1, %v5973_v36 }
  0xb3   : > { %5374 = vmatprep.mubr.msk.f32.mxu1 %vm356_vm1, %v6256_v0 }
  0xb5   : > { %5268 = vmatmul.mubr.msk.f32.gmra.mrb[28].mxu0 %vm356_vm1, %v5982_v37 }
  0xb6   : > { %5375 = vmatmul.mubr.msk.f32.gmra.mrb[30].mxu1 %vm356_vm1, %v6267_v1  ;;  %5270 = vmatprep.mubr.msk.f32.mxu0 %vm356_vm1, %v6170_v58 }
  0xb7   : > { %5379 = vmatprep.mubr.msk.f32.mxu1 %vm356_vm1, %v5846_v12  ;;  %v6559_v12 = vld [vmem:[%s6808_s3] ss:$0 sm:$0xff] }
  0xb9   : > { %5271 = vmatmul.mubr.msk.f32.gmra.mrb[30].mxu0 %vm356_vm1, %v6181_v59 }
  0xba   : > { %5380 = vmatmul.mubr.msk.f32.vlgmr.msra.gmra.mrb[16].mxu1 %vm356_vm1, %v5862_v14  ;;  %5275 = vmatprep.mubr.msk.f32.mxu0 %vm356_vm1, %v6000_v41 }
  0xbb   : > { %5404 = vmatpush3.msk.msra.mxu1 %vm405_vm0, %v4692_v2  ;;  %5382 = vmatprep.mubr.msk.f32.mxu1 %vm356_vm1, %v5870_v16 }
  0xbc   : > { %5429 = vmatprep.subr.msk.mxu1 %vm405_vm0, %v4722_v4 }
  0xbd   : > { %5276 = vmatmul.mubr.msk.f32.vlgmr.msra.gmra.mrb[16].mxu0 %vm356_vm1, %v6012_v43 }
  0xbe   : > { %5383 = vmatmul.mubr.msk.f32.gmra.mrb[18].mxu1 %vm356_vm1, %v5885_v18  ;;  %5278 = vmatprep.mubr.msk.f32.mxu0 %vm356_vm1, %v6017_v44 }
  0xbf   : > { %5385 = vmatprep.mubr.msk.f32.mxu1 %vm356_vm1, %v5893_v20  ;;  %5300 = vmatpush3.msk.msra.mxu0 %vm405_vm0, %v4552_v3 }
  0xc0   : > { %5325 = vmatprep.subr.msk.mxu0 %vm405_vm0, %v4582_v5 }
  0xc1   : > { %5279 = vmatmul.mubr.msk.f32.gmra.mrb[18].mxu0 %vm356_vm1, %v6029_v45 }
  0xc2   : > { %5386 = vmatmul.mubr.msk.f32.gmra.mrb[20].mxu1 %vm356_vm1, %v5905_v22  ;;  %5281 = vmatprep.mubr.msk.f32.mxu0 %vm356_vm1, %v6034_v46 }
  0xc3   : > { %5388 = vmatprep.mubr.msk.f32.mxu1 %vm356_vm1, %v5913_v24 }
  0xc5   : > { %5282 = vmatmul.mubr.msk.f32.gmra.mrb[20].mxu0 %vm356_vm1, %v6043_v47 }
  0xc6   : > { %5389 = vmatmul.mubr.msk.f32.gmra.mrb[22].mxu1 %vm356_vm1, %v5925_v26  ;;  %5284 = vmatprep.mubr.msk.f32.mxu0 %vm356_vm1, %v6048_v48 }
  0xc7   : > { %5391 = vmatprep.mubr.msk.f32.mxu1 %vm356_vm1, %v5933_v28 }
  0xc9   : > { %5285 = vmatmul.mubr.msk.f32.gmra.mrb[22].mxu0 %vm356_vm1, %v6057_v49 }
  0xca   : > { %5392 = vmatmul.mubr.msk.f32.gmra.mrb[24].mxu1 %vm356_vm1, %v5945_v30  ;;  %5287 = vmatprep.mubr.msk.f32.mxu0 %vm356_vm1, %v6062_v50 }
  0xcb   : > { %5394 = vmatprep.mubr.msk.f32.mxu1 %vm356_vm1, %v5953_v32 }
  0xcd   : > { %5288 = vmatmul.mubr.msk.f32.gmra.mrb[24].mxu0 %vm356_vm1, %v6071_v51 }
  0xce   : > { %5395 = vmatmul.mubr.msk.f32.gmra.mrb[26].mxu1 %vm356_vm1, %v5965_v34  ;;  %5290 = vmatprep.mubr.msk.f32.mxu0 %vm356_vm1, %v6076_v52 }
  0xcf   : > { %5397 = vmatprep.mubr.msk.f32.mxu1 %vm356_vm1, %v5973_v36 }
  0xd1   : > { %5291 = vmatmul.mubr.msk.f32.gmra.mrb[26].mxu0 %vm356_vm1, %v6085_v53 }
  0xd2   : > { %5398 = vmatmul.mubr.msk.f32.gmra.mrb[28].mxu1 %vm356_vm1, %v5982_v37  ;;  %5293 = vmatprep.mubr.msk.f32.mxu0 %vm356_vm1, %v6090_v54 }
  0xd3   : > { %5400 = vmatprep.mubr.msk.f32.mxu1 %vm356_vm1, %v6170_v58 }
  0xd5   : > { %5294 = vmatmul.mubr.msk.f32.gmra.mrb[28].mxu0 %vm356_vm1, %v6099_v55 }
  0xd6   : > { %5401 = vmatmul.mubr.msk.f32.gmra.mrb[30].mxu1 %vm356_vm1, %v6181_v59  ;;  %5296 = vmatprep.mubr.msk.f32.mxu0 %vm356_vm1, %v6184_v60 }
  0xd7   : > { %5405 = vmatprep.mubr.msk.f32.mxu1 %vm356_vm1, %v5870_v16 }
  0xd9   : > { %5297 = vmatmul.mubr.msk.f32.gmra.mrb[30].mxu0 %vm356_vm1, %v6193_v61 }
  0xda   : > { %5406 = vmatmul.mubr.msk.f32.vlgmr.msra.gmra.mrb[16].mxu1 %vm356_vm1, %v5885_v18  ;;  %5301 = vmatprep.mubr.msk.f32.mxu0 %vm356_vm1, %v6017_v44 }
  0xdb   : > { %5430 = vmatpush3.msk.msra.mxu1 %vm405_vm0, %v4722_v4  ;;  %5408 = vmatprep.mubr.msk.f32.mxu1 %vm356_vm1, %v5893_v20 }
  0xdd   : > { %5302 = vmatmul.mubr.msk.f32.vlgmr.msra.gmra.mrb[16].mxu0 %vm356_vm1, %v6029_v45 }
  0xde   : > { %5409 = vmatmul.mubr.msk.f32.gmra.mrb[18].mxu1 %vm356_vm1, %v5905_v22  ;;  %5304 = vmatprep.mubr.msk.f32.mxu0 %vm356_vm1, %v6034_v46 }
  0xdf   : > { %5411 = vmatprep.mubr.msk.f32.mxu1 %vm356_vm1, %v5913_v24  ;;  %5326 = vmatpush3.msk.msra.mxu0 %vm405_vm0, %v4582_v5 }
  0xe1   : > { %5305 = vmatmul.mubr.msk.f32.gmra.mrb[18].mxu0 %vm356_vm1, %v6043_v47 }
  0xe2   : > { %5412 = vmatmul.mubr.msk.f32.gmra.mrb[20].mxu1 %vm356_vm1, %v5925_v26  ;;  %5307 = vmatprep.mubr.msk.f32.mxu0 %vm356_vm1, %v6048_v48 }
  0xe3   : > { %5414 = vmatprep.mubr.msk.f32.mxu1 %vm356_vm1, %v5933_v28 }
  0xe5   : > { %5308 = vmatmul.mubr.msk.f32.gmra.mrb[20].mxu0 %vm356_vm1, %v6057_v49 }
  0xe6   : > { %5415 = vmatmul.mubr.msk.f32.gmra.mrb[22].mxu1 %vm356_vm1, %v5945_v30  ;;  %5310 = vmatprep.mubr.msk.f32.mxu0 %vm356_vm1, %v6062_v50 }
  0xe7   : > { %5417 = vmatprep.mubr.msk.f32.mxu1 %vm356_vm1, %v5953_v32 }
  0xe9   : > { %5311 = vmatmul.mubr.msk.f32.gmra.mrb[22].mxu0 %vm356_vm1, %v6071_v51 }
  0xea   : > { %5418 = vmatmul.mubr.msk.f32.gmra.mrb[24].mxu1 %vm356_vm1, %v5965_v34  ;;  %5313 = vmatprep.mubr.msk.f32.mxu0 %vm356_vm1, %v6076_v52 }
  0xeb   : > { %5420 = vmatprep.mubr.msk.f32.mxu1 %vm356_vm1, %v5973_v36 }
  0xed   : > { %5314 = vmatmul.mubr.msk.f32.gmra.mrb[24].mxu0 %vm356_vm1, %v6085_v53 }
  0xee   : > { %5421 = vmatmul.mubr.msk.f32.gmra.mrb[26].mxu1 %vm356_vm1, %v5982_v37  ;;  %5316 = vmatprep.mubr.msk.f32.mxu0 %vm356_vm1, %v6090_v54 }
  0xef   : > { %5423 = vmatprep.mubr.msk.f32.mxu1 %vm356_vm1, %v6170_v58 }
  0xf1   : > { %5317 = vmatmul.mubr.msk.f32.gmra.mrb[26].mxu0 %vm356_vm1, %v6099_v55 }
  0xf2   : > { %5424 = vmatmul.mubr.msk.f32.gmra.mrb[28].mxu1 %vm356_vm1, %v6181_v59  ;;  %5319 = vmatprep.mubr.msk.f32.mxu0 %vm356_vm1, %v6184_v60 }
  0xf3   : > { %5426 = vmatprep.mubr.msk.f32.mxu1 %vm356_vm1, %v3598_v6 }
  0xf5   : > { %5320 = vmatmul.mubr.msk.f32.gmra.mrb[28].mxu0 %vm356_vm1, %v6193_v61 }
  0xf6   : > { %5427 = vmatmul.mubr.msk.f32.gmra.mrb[30].mxu1 %vm356_vm1, %v3599_v7  ;;  %5322 = vmatprep.mubr.msk.f32.mxu0 %vm356_vm1, %v2677_v8 }
  0xf7   : > { %5431 = vmatprep.mubr.msk.f32.mxu1 %vm356_vm1, %v5842_v11  ;;  %v3829_v11 = vld [vmem:[%s6159_s13 + $0x22] sm:$0xff]  ;;  %s5731_s13 = smov 4  }
  0xf9   : > { %5323 = vmatmul.mubr.msk.f32.gmra.mrb[30].mxu0 %vm356_vm1, %v2678_v9 }
  0xfa   : > { %5432 = vmatmul.mubr.msk.f32.vlgmr.msra.gmra.mrb[16].mxu1 %vm356_vm1, %v5867_v15  ;;  %5327 = vmatprep.mubr.msk.f32.mxu0 %vm356_vm1, %v5870_v16 }
  0xfb   : > { %5434 = vmatprep.mubr.msk.f32.mxu1 %vm356_vm1, %v5874_v17 }
  0xfd   : > { %5328 = vmatmul.mubr.msk.f32.vlgmr.msra.gmra.mrb[16].mxu0 %vm356_vm1, %v5885_v18 }
  0xfe   : > { %5435 = vmatmul.mubr.msk.f32.gmra.mrb[18].mxu1 %vm356_vm1, %v5890_v19  ;;  %5330 = vmatprep.mubr.msk.f32.mxu0 %vm356_vm1, %v5893_v20 }
  0xff   : > { %5437 = vmatprep.mubr.msk.f32.mxu1 %vm356_vm1, %v5896_v21 }
 0x101   : > { %5331 = vmatmul.mubr.msk.f32.gmra.mrb[18].mxu0 %vm356_vm1, %v5905_v22 }
 0x102   : > { %5438 = vmatmul.mubr.msk.f32.gmra.mrb[20].mxu1 %vm356_vm1, %v5910_v23  ;;  %5333 = vmatprep.mubr.msk.f32.mxu0 %vm356_vm1, %v5913_v24 }
 0x103   : > { %5440 = vmatprep.mubr.msk.f32.mxu1 %vm356_vm1, %v5916_v25 }
 0x105   : > { %5334 = vmatmul.mubr.msk.f32.gmra.mrb[20].mxu0 %vm356_vm1, %v5925_v26 }
 0x106   : > { %5441 = vmatmul.mubr.msk.f32.gmra.mrb[22].mxu1 %vm356_vm1, %v5930_v27  ;;  %5336 = vmatprep.mubr.msk.f32.mxu0 %vm356_vm1, %v5933_v28 }
 0x107   : > { %5443 = vmatprep.mubr.msk.f32.mxu1 %vm356_vm1, %v5936_v29 }
 0x109   : > { %5337 = vmatmul.mubr.msk.f32.gmra.mrb[22].mxu0 %vm356_vm1, %v5945_v30 }
 0x10a   : > { %5444 = vmatmul.mubr.msk.f32.gmra.mrb[24].mxu1 %vm356_vm1, %v5950_v31  ;;  %5339 = vmatprep.mubr.msk.f32.mxu0 %vm356_vm1, %v5953_v32 }
 0x10b   : > { %5446 = vmatprep.mubr.msk.f32.mxu1 %vm356_vm1, %v5956_v33 }
 0x10d   : > { %5340 = vmatmul.mubr.msk.f32.gmra.mrb[24].mxu0 %vm356_vm1, %v5965_v34 }
 0x10e   : > { %5447 = vmatmul.mubr.msk.f32.gmra.mrb[26].mxu1 %vm356_vm1, %v5970_v35  ;;  %5342 = vmatprep.mubr.msk.f32.mxu0 %vm356_vm1, %v5973_v36 }
 0x10f   : > { %5449 = vmatprep.mubr.msk.f32.mxu1 %vm356_vm1, %v6256_v0 }
 0x111   : > { %5343 = vmatmul.mubr.msk.f32.gmra.mrb[26].mxu0 %vm356_vm1, %v5982_v37 }
 0x112   : > { %5450 = vmatmul.mubr.msk.f32.gmra.mrb[28].mxu1 %vm356_vm1, %v6267_v1  ;;  %5345 = vmatprep.mubr.msk.f32.mxu0 %vm356_vm1, %v6170_v58 }
 0x113   : > { %5452 = vmatprep.mubr.msk.f32.mxu1 %vm356_vm1, %v3828_v10 }
 0x115   : > { %5346 = vmatmul.mubr.msk.f32.gmra.mrb[28].mxu0 %vm356_vm1, %v6181_v59 }
 0x116   : > { %5453 = vmatmul.mubr.msk.f32.gmra.mrb[30].mxu1 %vm356_vm1, %v3829_v11  ;;  %5348 = vmatprep.mubr.msk.f32.mxu0 %vm356_vm1, %v3598_v6 }
 0x119   : > { %5349 = vmatmul.mubr.msk.f32.gmra.mrb[30].mxu0 %vm356_vm1, %v3599_v7 }
 0x14d   : > { %v5225_v13 = vpop.f32.mrb[0].mxu1 }
 0x14e   : > { %v2138_v14 = vadd.f32 %v5225_v13, %v6559_v12  ;;  %v2042_v15 = vpop.f32.mrb[1].mxu1 }
 0x14f   : > { %v2137_v20 = vadd.f32 %v6559_v12, %v2042_v15 }
 0x150   : > { %2171 = vrot.lane.b32.xlu0 %v2138_v14, %s5731_s13  ;;  %v5121_v16 = vpop.f32.mrb[0].mxu0 }
 0x151   : > { %v5228_v17 = vpop.f32.mrb[2].mxu1  ;;  %v1218_v18 = vadd.f32 %v5121_v16, %v6559_v12  ;;  %v1116_v19 = vpop.f32.mrb[1].mxu0 }
 0x152   : > { %v2140_v21 = vadd.f32 %v5228_v17, %v6559_v12  ;;  %v2052_v22 = vpop.f32.mrb[3].mxu1  ;;  %v1217_v23 = vadd.f32 %v6559_v12, %v1116_v19 }
 0x153   : > { %1234 = vst.msk [vmem:[%s6566_s15 + $0x8] sm:$0xff] %vm356_vm1, %v1218_v18  ;;  %v2139_v28 = vadd.f32 %v6559_v12, %v2052_v22 }
 0x154   : > { %2169 = vrot.lane.b32.xlu0 %v2137_v20, %s5731_s13  ;;  %2175 = vrot.lane.b32.xlu1 %v2140_v21, %s5731_s13  ;;  %1233 = vst.msk [vmem:[%s6566_s15] sm:$0xff] %vm356_vm1, %v1217_v23  ;;  %v5124_v24 = vpop.f32.mrb[2].mxu0 }
 0x155   : > { %v5231_v25 = vpop.f32.mrb[4].mxu1  ;;  %v1220_v26 = vadd.f32 %v5124_v24, %v6559_v12  ;;  %v1126_v27 = vpop.f32.mrb[3].mxu0 }
 0x156   : > { %v2062_v29 = vpop.f32.mrb[5].mxu1  ;;  %v1219_v30 = vadd.f32 %v6559_v12, %v1126_v27  ;;  %v2142_v36 = vadd.f32 %v5231_v25, %v6559_v12 }
 0x157   : > { %v2141_v31 = vadd.f32 %v6559_v12, %v2062_v29  ;;  %1236 = vst.msk [vmem:[%s6566_s15 + $0x28] sm:$0xff] %vm356_vm1, %v1220_v26 }
 0x158   : > { %2173 = vrot.lane.b32.xlu1 %v2139_v28, %s5731_s13  ;;  %1235 = vst.msk [vmem:[%s6566_s15 + $0x20] sm:$0xff] %vm356_vm1, %v1219_v30  ;;  %v5127_v32 = vpop.f32.mrb[4].mxu0 }
 0x159   : > { %2177 = vrot.lane.b32.xlu0 %v2141_v31, %s5731_s13  ;;  %v5234_v33 = vpop.f32.mrb[6].mxu1  ;;  %v1222_v34 = vadd.f32 %v5127_v32, %v6559_v12  ;;  %v1136_v35 = vpop.f32.mrb[5].mxu0 }
 0x15a   : > { %v2072_v37 = vpop.f32.mrb[7].mxu1  ;;  %v1221_v38 = vadd.f32 %v6559_v12, %v1136_v35  ;;  %v2144_v44 = vadd.f32 %v5234_v33, %v6559_v12 }
 0x15b   : > { %v2143_v39 = vadd.f32 %v6559_v12, %v2072_v37  ;;  %1238 = vst.msk [vmem:[%s6566_s15 + $0x48] sm:$0xff] %vm356_vm1, %v1222_v34 }
 0x15c   : > { %2179 = vrot.lane.b32.xlu1 %v2142_v36, %s5731_s13  ;;  %1237 = vst.msk [vmem:[%s6566_s15 + $0x40] sm:$0xff] %vm356_vm1, %v1221_v38  ;;  %v5130_v40 = vpop.f32.mrb[6].mxu0 }
 0x15d   : > { %2181 = vrot.lane.b32.xlu0 %v2143_v39, %s5731_s13  ;;  %v5237_v41 = vpop.f32.mrb[8].mxu1  ;;  %v1224_v42 = vadd.f32 %v5130_v40, %v6559_v12  ;;  %v1146_v43 = vpop.f32.mrb[7].mxu0 }
 0x15e   : > { %v2082_v45 = vpop.f32.mrb[9].mxu1  ;;  %v1223_v46 = vadd.f32 %v6559_v12, %v1146_v43  ;;  %v2146_v52 = vadd.f32 %v5237_v41, %v6559_v12 }
 0x15f   : > { %v2145_v47 = vadd.f32 %v6559_v12, %v2082_v45  ;;  %1240 = vst.msk [vmem:[%s6566_s15 + $0x68] sm:$0xff] %vm356_vm1, %v1224_v42 }
 0x160   : > { %2183 = vrot.lane.b32.xlu1 %v2144_v44, %s5731_s13  ;;  %1239 = vst.msk [vmem:[%s6566_s15 + $0x60] sm:$0xff] %vm356_vm1, %v1223_v46  ;;  %v5133_v48 = vpop.f32.mrb[8].mxu0 }
 0x161   : > { %2185 = vrot.lane.b32.xlu0 %v2145_v47, %s5731_s13  ;;  %v5240_v49 = vpop.f32.mrb[10].mxu1  ;;  %v1226_v50 = vadd.f32 %v5133_v48, %v6559_v12  ;;  %v1156_v51 = vpop.f32.mrb[9].mxu0 }
 0x162   : > { %v2092_v53 = vpop.f32.mrb[11].mxu1  ;;  %v1225_v54 = vadd.f32 %v6559_v12, %v1156_v51  ;;  %v2148_v60 = vadd.f32 %v5240_v49, %v6559_v12 }
 0x163   : > { %v2147_v55 = vadd.f32 %v6559_v12, %v2092_v53  ;;  %1242 = vst.msk [vmem:[%s6566_s15 + $0x88] sm:$0xff] %vm356_vm1, %v1226_v50 }
 0x164   : > { %2187 = vrot.lane.b32.xlu1 %v2146_v52, %s5731_s13  ;;  %1241 = vst.msk [vmem:[%s6566_s15 + $0x80] sm:$0xff] %vm356_vm1, %v1225_v54  ;;  %v5136_v56 = vpop.f32.mrb[10].mxu0 }
 0x165   : > { %2189 = vrot.lane.b32.xlu0 %v2147_v55, %s5731_s13  ;;  %v5243_v57 = vpop.f32.mrb[12].mxu1  ;;  %v1228_v58 = vadd.f32 %v5136_v56, %v6559_v12  ;;  %v1166_v59 = vpop.f32.mrb[11].mxu0 }
 0x166   : > { %v2102_v61 = vpop.f32.mrb[13].mxu1  ;;  %v1227_v62 = vadd.f32 %v6559_v12, %v1166_v59  ;;  %v2150_v4 = vadd.f32 %v5243_v57, %v6559_v12 }
 0x167   : > { %v2149_v63 = vadd.f32 %v6559_v12, %v2102_v61  ;;  %1244 = vst.msk [vmem:[%s6566_s15 + $0xa8] sm:$0xff] %vm356_vm1, %v1228_v58 }
 0x168   : > { %2191 = vrot.lane.b32.xlu1 %v2148_v60, %s5731_s13  ;;  %1243 = vst.msk [vmem:[%s6566_s15 + $0xa0] sm:$0xff] %vm356_vm1, %v1227_v62  ;;  %v5139_v0 = vpop.f32.mrb[12].mxu0 }
 0x169   : > { %2193 = vrot.lane.b32.xlu0 %v2149_v63, %s5731_s13  ;;  %v5246_v1 = vpop.f32.mrb[14].mxu1  ;;  %v1230_v2 = vadd.f32 %v5139_v0, %v6559_v12  ;;  %v1176_v3 = vpop.f32.mrb[13].mxu0 }
 0x16a   : > { %v2112_v5 = vpop.f32.mrb[15].mxu1  ;;  %v1229_v6 = vadd.f32 %v6559_v12, %v1176_v3  ;;  %v2152_v11 = vadd.f32 %v5246_v1, %v6559_v12 }
 0x16b   : > { %v2151_v7 = vadd.f32 %v6559_v12, %v2112_v5  ;;  %1246 = vst.msk [vmem:[%s6566_s15 + $0xc8] sm:$0xff] %vm356_vm1, %v1230_v2 }
 0x16c   : > { %2195 = vrot.lane.b32.xlu1 %v2150_v4, %s5731_s13  ;;  %1245 = vst.msk [vmem:[%s6566_s15 + $0xc0] sm:$0xff] %vm356_vm1, %v1229_v6  ;;  %v5142_v8 = vpop.f32.mrb[14].mxu0 }
 0x16d   : > { %2197 = vrot.lane.b32.xlu0 %v2151_v7, %s5731_s13  ;;  %v1232_v9 = vadd.f32 %v5142_v8, %v6559_v12  ;;  %v1186_v10 = vpop.f32.mrb[15].mxu0 }
 0x16e   : > { %v1231_v13 = vadd.f32 %v6559_v12, %v1186_v10 }
 0x16f   : > { %1248 = vst.msk [vmem:[%s6566_s15 + $0xe8] sm:$0xff] %vm356_vm1, %v1232_v9 }
 0x170   : > { %2199 = vrot.lane.b32.xlu1 %v2152_v11, %s5731_s13  ;;  %1247 = vst.msk [vmem:[%s6566_s15 + $0xe0] sm:$0xff] %vm356_vm1, %v1231_v13 }
 0x1c2   : > { %v2172_v14 = vpop.permute.xlu0 %2171 }
 0x1c3   : > { %2219 = vst.msk [vmem:[%s6566_s15 + $0x8] sm:$0xff] %vm2217_vm2, %v2172_v14 }
 0x1c6   : > { %v2170_v15 = vpop.permute.xlu0 %2169  ;;  %v2176_v16 = vpop.permute.xlu1 %2175 }
 0x1c7   : > { %2218 = vst.msk [vmem:[%s6566_s15] sm:$0xff] %vm2217_vm2, %v2170_v15  ;;  %2221 = vst.msk [vmem:[%s6566_s15 + $0x28] sm:$0xff] %vm2217_vm2, %v2176_v16 }
 0x1ca   : > { %v2174_v17 = vpop.permute.xlu1 %2173 }
 0x1cb   : > { %2220 = vst.msk [vmem:[%s6566_s15 + $0x20] sm:$0xff] %vm2217_vm2, %v2174_v17  ;;  %v2178_v18 = vpop.permute.xlu0 %2177 }
 0x1cc   : > { %2222 = vst.msk [vmem:[%s6566_s15 + $0x40] sm:$0xff] %vm2217_vm2, %v2178_v18 }
 0x1cd   : > { %v5433_v19 = vpop.f32.mrb[16].mxu1 }
 0x1ce   : > { %v4045_v20 = vadd.f32 %v5433_v19, %v6559_v12  ;;  %v2180_v21 = vpop.permute.xlu1 %2179  ;;  %v3949_v22 = vpop.f32.mrb[17].mxu1 }
 0x1cf   : > { %2223 = vst.msk [vmem:[%s6566_s15 + $0x48] sm:$0xff] %vm2217_vm2, %v2180_v21  ;;  %v4044_v23 = vadd.f32 %v6559_v12, %v3949_v22  ;;  %v2182_v24 = vpop.permute.xlu0 %2181 }
 0x1d0   : > { %2224 = vst.msk [vmem:[%s6566_s15 + $0x60] sm:$0xff] %vm2217_vm2, %v2182_v24  ;;  %4078 = vrot.lane.b32.xlu1 %v4045_v20, %s5731_s13  ;;  %v5329_v25 = vpop.f32.mrb[16].mxu0 }
 0x1d1   : > { %v5436_v26 = vpop.f32.mrb[18].mxu1  ;;  %4076 = vrot.lane.b32.xlu0 %v4044_v23, %s5731_s13  ;;  %v3124_v27 = vadd.f32 %v5329_v25, %v6559_v12  ;;  %v3028_v28 = vpop.f32.mrb[17].mxu0 }
 0x1d2   : > { %v4047_v29 = vadd.f32 %v5436_v26, %v6559_v12  ;;  %v2184_v30 = vpop.permute.xlu1 %2183  ;;  %v3959_v31 = vpop.f32.mrb[19].mxu1  ;;  %v3123_v32 = vadd.f32 %v6559_v12, %v3028_v28 }
 0x1d3   : > { %2225 = vst.msk [vmem:[%s6566_s15 + $0x68] sm:$0xff] %vm2217_vm2, %v2184_v30  ;;  %v4046_v33 = vadd.f32 %v6559_v12, %v3959_v31  ;;  %v2186_v34 = vpop.permute.xlu0 %2185 }
 0x1d4   : > { %4601 = vst.msk [vmem:[%s6566_s15 + $0x18] sm:$0xff] %vm356_vm1, %v3124_v27  ;;  %4082 = vrot.lane.b32.xlu1 %v4047_v29, %s5731_s13  ;;  %4600 = vst.msk [vmem:[%s6566_s15 + $0x10] sm:$0xff] %vm356_vm1, %v3123_v32  ;;  %v5332_v35 = vpop.f32.mrb[18].mxu0 }
 0x1d5   : > { %2226 = vst.msk [vmem:[%s6566_s15 + $0x80] sm:$0xff] %vm2217_vm2, %v2186_v34  ;;  %v5439_v36 = vpop.f32.mrb[20].mxu1  ;;  %4080 = vrot.lane.b32.xlu0 %v4046_v33, %s5731_s13  ;;  %v3126_v37 = vadd.f32 %v5332_v35, %v6559_v12  ;;  %v3038_v38 = vpop.f32.mrb[19].mxu0 }
 0x1d6   : > { %v4049_v39 = vadd.f32 %v5439_v36, %v6559_v12  ;;  %v2188_v40 = vpop.permute.xlu1 %2187  ;;  %v3969_v41 = vpop.f32.mrb[21].mxu1  ;;  %v3125_v42 = vadd.f32 %v6559_v12, %v3038_v38 }
 0x1d7   : > { %2227 = vst.msk [vmem:[%s6566_s15 + $0x88] sm:$0xff] %vm2217_vm2, %v2188_v40  ;;  %v4048_v43 = vadd.f32 %v6559_v12, %v3969_v41  ;;  %v2190_v44 = vpop.permute.xlu0 %2189 }
 0x1d8   : > { %4603 = vst.msk [vmem:[%s6566_s15 + $0x38] sm:$0xff] %vm356_vm1, %v3126_v37  ;;  %4086 = vrot.lane.b32.xlu1 %v4049_v39, %s5731_s13  ;;  %4602 = vst.msk [vmem:[%s6566_s15 + $0x30] sm:$0xff] %vm356_vm1, %v3125_v42  ;;  %v5335_v45 = vpop.f32.mrb[20].mxu0 }
 0x1d9   : > { %2228 = vst.msk [vmem:[%s6566_s15 + $0xa0] sm:$0xff] %vm2217_vm2, %v2190_v44  ;;  %v5442_v46 = vpop.f32.mrb[22].mxu1  ;;  %4084 = vrot.lane.b32.xlu0 %v4048_v43, %s5731_s13  ;;  %v3128_v47 = vadd.f32 %v5335_v45, %v6559_v12  ;;  %v3048_v48 = vpop.f32.mrb[21].mxu0 }
 0x1da   : > { %v4051_v49 = vadd.f32 %v5442_v46, %v6559_v12  ;;  %v2192_v50 = vpop.permute.xlu1 %2191  ;;  %v3979_v51 = vpop.f32.mrb[23].mxu1  ;;  %v3127_v52 = vadd.f32 %v6559_v12, %v3048_v48 }
 0x1db   : > { %2229 = vst.msk [vmem:[%s6566_s15 + $0xa8] sm:$0xff] %vm2217_vm2, %v2192_v50  ;;  %v4050_v53 = vadd.f32 %v6559_v12, %v3979_v51  ;;  %v2194_v54 = vpop.permute.xlu0 %2193 }
 0x1dc   : > { %4605 = vst.msk [vmem:[%s6566_s15 + $0x58] sm:$0xff] %vm356_vm1, %v3128_v47  ;;  %4090 = vrot.lane.b32.xlu1 %v4051_v49, %s5731_s13  ;;  %4604 = vst.msk [vmem:[%s6566_s15 + $0x50] sm:$0xff] %vm356_vm1, %v3127_v52  ;;  %v5338_v55 = vpop.f32.mrb[22].mxu0 }
 0x1dd   : > { %2230 = vst.msk [vmem:[%s6566_s15 + $0xc0] sm:$0xff] %vm2217_vm2, %v2194_v54  ;;  %v5445_v56 = vpop.f32.mrb[24].mxu1  ;;  %4088 = vrot.lane.b32.xlu0 %v4050_v53, %s5731_s13  ;;  %v3130_v57 = vadd.f32 %v5338_v55, %v6559_v12  ;;  %v3058_v58 = vpop.f32.mrb[23].mxu0 }
 0x1de   : > { %v4053_v59 = vadd.f32 %v5445_v56, %v6559_v12  ;;  %v2196_v60 = vpop.permute.xlu1 %2195  ;;  %v3989_v61 = vpop.f32.mrb[25].mxu1  ;;  %v3129_v62 = vadd.f32 %v6559_v12, %v3058_v58 }
 0x1df   : > { %2231 = vst.msk [vmem:[%s6566_s15 + $0xc8] sm:$0xff] %vm2217_vm2, %v2196_v60  ;;  %v4052_v63 = vadd.f32 %v6559_v12, %v3989_v61  ;;  %v2198_v0 = vpop.permute.xlu0 %2197 }
 0x1e0   : > { %4607 = vst.msk [vmem:[%s6566_s15 + $0x78] sm:$0xff] %vm356_vm1, %v3130_v57  ;;  %4094 = vrot.lane.b32.xlu1 %v4053_v59, %s5731_s13  ;;  %4606 = vst.msk [vmem:[%s6566_s15 + $0x70] sm:$0xff] %vm356_vm1, %v3129_v62  ;;  %v5341_v1 = vpop.f32.mrb[24].mxu0 }
 0x1e1   : > { %2232 = vst.msk [vmem:[%s6566_s15 + $0xe0] sm:$0xff] %vm2217_vm2, %v2198_v0  ;;  %v5448_v2 = vpop.f32.mrb[26].mxu1  ;;  %4092 = vrot.lane.b32.xlu0 %v4052_v63, %s5731_s13  ;;  %v3132_v3 = vadd.f32 %v5341_v1, %v6559_v12  ;;  %v3068_v4 = vpop.f32.mrb[25].mxu0 }
 0x1e2   : > { %v4055_v5 = vadd.f32 %v5448_v2, %v6559_v12  ;;  %v2200_v6 = vpop.permute.xlu1 %2199  ;;  %v3999_v7 = vpop.f32.mrb[27].mxu1  ;;  %v3131_v8 = vadd.f32 %v6559_v12, %v3068_v4 }
 0x1e3   : > { %2233 = vst.msk [vmem:[%s6566_s15 + $0xe8] sm:$0xff] %vm2217_vm2, %v2200_v6  ;;  %v4054_v9 = vadd.f32 %v6559_v12, %v3999_v7 }
 0x1e4   : > { %4609 = vst.msk [vmem:[%s6566_s15 + $0x98] sm:$0xff] %vm356_vm1, %v3132_v3  ;;  %4098 = vrot.lane.b32.xlu1 %v4055_v5, %s5731_s13  ;;  %4608 = vst.msk [vmem:[%s6566_s15 + $0x90] sm:$0xff] %vm356_vm1, %v3131_v8  ;;  %v5344_v10 = vpop.f32.mrb[26].mxu0 }
 0x1e5   : > { %v5451_v11 = vpop.f32.mrb[28].mxu1  ;;  %4096 = vrot.lane.b32.xlu0 %v4054_v9, %s5731_s13  ;;  %v3134_v13 = vadd.f32 %v5344_v10, %v6559_v12  ;;  %v3078_v14 = vpop.f32.mrb[27].mxu0 }
 0x1e6   : > { %v4057_v15 = vadd.f32 %v5451_v11, %v6559_v12  ;;  %v4009_v16 = vpop.f32.mrb[29].mxu1  ;;  %v3133_v17 = vadd.f32 %v6559_v12, %v3078_v14 }
 0x1e7   : > { %v4056_v18 = vadd.f32 %v6559_v12, %v4009_v16  ;;  %4611 = vst.msk [vmem:[%s6566_s15 + $0xb8] sm:$0xff] %vm356_vm1, %v3134_v13 }
 0x1e8   : > { %4102 = vrot.lane.b32.xlu1 %v4057_v15, %s5731_s13  ;;  %4610 = vst.msk [vmem:[%s6566_s15 + $0xb0] sm:$0xff] %vm356_vm1, %v3133_v17  ;;  %v5347_v19 = vpop.f32.mrb[28].mxu0 }
 0x1e9   : > { %v5454_v20 = vpop.f32.mrb[30].mxu1  ;;  %4100 = vrot.lane.b32.xlu0 %v4056_v18, %s5731_s13  ;;  %v3136_v21 = vadd.f32 %v5347_v19, %v6559_v12  ;;  %v3088_v22 = vpop.f32.mrb[29].mxu0 }
 0x1ea   : > { %v4059_v23 = vadd.f32 %v5454_v20, %v6559_v12  ;;  %v4019_v24 = vpop.f32.mrb[31].mxu1  ;;  %v3135_v25 = vadd.f32 %v6559_v12, %v3088_v22 }
 0x1eb   : > { %v4058_v26 = vadd.f32 %v6559_v12, %v4019_v24  ;;  %4613 = vst.msk [vmem:[%s6566_s15 + $0xd8] sm:$0xff] %vm356_vm1, %v3136_v21 }
 0x1ec   : > { %4106 = vrot.lane.b32.xlu1 %v4059_v23, %s5731_s13  ;;  %4612 = vst.msk [vmem:[%s6566_s15 + $0xd0] sm:$0xff] %vm356_vm1, %v3135_v25  ;;  %v5350_v27 = vpop.f32.mrb[30].mxu0 }
 0x1ed   : > { %4104 = vrot.lane.b32.xlu0 %v4058_v26, %s5731_s13  ;;  %v3138_v28 = vadd.f32 %v5350_v27, %v6559_v12  ;;  %v3098_v29 = vpop.f32.mrb[31].mxu0 }
 0x1ee   : > { %v3137_v30 = vadd.f32 %v6559_v12, %v3098_v29 }
 0x1ef   : > { %4615 = vst.msk [vmem:[%s6566_s15 + $0xf8] sm:$0xff] %vm356_vm1, %v3138_v28 }
 0x1f0   : > { %4614 = vst.msk [vmem:[%s6566_s15 + $0xf0] sm:$0xff] %vm356_vm1, %v3137_v30 }
 0x242   : > { %v4079_v31 = vpop.permute.xlu1 %4078 }
 0x243   : > { %4741 = vst.msk [vmem:[%s6566_s15 + $0x18] sm:$0xff] %vm2217_vm2, %v4079_v31  ;;  %v4077_v32 = vpop.permute.xlu0 %4076 }
 0x244   : > { %4740 = vst.msk [vmem:[%s6566_s15 + $0x10] sm:$0xff] %vm2217_vm2, %v4077_v32 }
 0x246   : > { %v4083_v33 = vpop.permute.xlu1 %4082 }
 0x247   : > { %4743 = vst.msk [vmem:[%s6566_s15 + $0x38] sm:$0xff] %vm2217_vm2, %v4083_v33  ;;  %v4081_v34 = vpop.permute.xlu0 %4080 }
 0x248   : > { %4742 = vst.msk [vmem:[%s6566_s15 + $0x30] sm:$0xff] %vm2217_vm2, %v4081_v34 }
 0x24a   : > { %v4087_v12 = vpop.permute.xlu1 %4086 }
 0x24b   : > { %4745 = vst.msk [vmem:[%s6566_s15 + $0x58] sm:$0xff] %vm2217_vm2, %v4087_v12  ;;  %v4085_v35 = vpop.permute.xlu0 %4084 }
 0x24c   : > { %4744 = vst.msk [vmem:[%s6566_s15 + $0x50] sm:$0xff] %vm2217_vm2, %v4085_v35 }
 0x24e   : > { %v4091_v36 = vpop.permute.xlu1 %4090 }
 0x24f   : > { %4747 = vst.msk [vmem:[%s6566_s15 + $0x78] sm:$0xff] %vm2217_vm2, %v4091_v36  ;;  %v4089_v37 = vpop.permute.xlu0 %4088 }
 0x250   : > { %4746 = vst.msk [vmem:[%s6566_s15 + $0x70] sm:$0xff] %vm2217_vm2, %v4089_v37 }
 0x252   : > { %v4095_v38 = vpop.permute.xlu1 %4094 }
 0x253   : > { %4749 = vst.msk [vmem:[%s6566_s15 + $0x98] sm:$0xff] %vm2217_vm2, %v4095_v38  ;;  %v4093_v39 = vpop.permute.xlu0 %4092 }
 0x254   : > { %4748 = vst.msk [vmem:[%s6566_s15 + $0x90] sm:$0xff] %vm2217_vm2, %v4093_v39 }
 0x256   : > { %v4099_v40 = vpop.permute.xlu1 %4098 }
 0x257   : > { %4751 = vst.msk [vmem:[%s6566_s15 + $0xb8] sm:$0xff] %vm2217_vm2, %v4099_v40  ;;  %v4097_v41 = vpop.permute.xlu0 %4096 }
 0x258   : > { %4750 = vst.msk [vmem:[%s6566_s15 + $0xb0] sm:$0xff] %vm2217_vm2, %v4097_v41 }
 0x25a   : > { %v4103_v42 = vpop.permute.xlu1 %4102 }
 0x25b   : > { %4753 = vst.msk [vmem:[%s6566_s15 + $0xd8] sm:$0xff] %vm2217_vm2, %v4103_v42  ;;  %v4101_v43 = vpop.permute.xlu0 %4100 }
 0x25c   : > { %4752 = vst.msk [vmem:[%s6566_s15 + $0xd0] sm:$0xff] %vm2217_vm2, %v4101_v43 }
 0x25e   : > { %v4107_v44 = vpop.permute.xlu1 %4106 }
 0x25f   : > { %4755 = vst.msk [vmem:[%s6566_s15 + $0xf8] sm:$0xff] %vm2217_vm2, %v4107_v44  ;;  %v4105_v45 = vpop.permute.xlu0 %4104 }
 0x260   : > { %4754 = vst.msk [vmem:[%s6566_s15 + $0xf0] sm:$0xff] %vm2217_vm2, %v4105_v45 }
 0x261 PF: > { %s14_s19 = sadd.s32 1, %s5729_s19   ;;  %s6810_s15 = smov %s5721_s17 }
 0x262   : > { %p11_p9 = scmp.ge.s32.totalorder %s14_s19, 6   ;;  %s6811_s16 = smov %s5725_s18 }
 0x263   : > { %s6812_s17 = smov %s6815_s20  ;;  %s6813_s18 = smov %s6819_s21 }
 0x264   :  { %13 = sbr.rel (!%p11_p9) target bundleno = 3 (0x3), region = 87 }

</bundles_post_ra>
